<compile_context>
chip_gen: v7x
topology: tpu7x:2x2x1
jax: 0.10.0
libtpu: 0.0.40
codegen_flags: <defaults>
</compile_context>

<pallas_src>
import functools
import math

import jax
import jax.numpy as jnp
import numpy as np
from jax.experimental import pallas as pl
from jax.experimental.pallas import tpu as pltpu


def _simple_cnn_kernel(x_ref, masks_ref, seg_ref, w1_ref, b1_ref, w2_ref, b2_ref,
                       wf_ref, bf_ref, out_ref, *, mxu_dtype):
    dt = mxu_dtype
    x = x_ref[...]                                   # (Cpad, W) f32
    W = x.shape[1]

    keep_m1 = masks_ref[0:1, :]                      # 0 where l_in_seq == 0
    keep_p1 = masks_ref[1:2, :]                      # 0 where l_in_seq == L-1
    keep_m2 = masks_ref[2:3, :]                      # 0 where l_in_seq < 2
    keep_p2 = masks_ref[3:4, :]                      # 0 where l_in_seq >= L-2

    # ---- Conv1d(Cin->16, k=3, padding=1): one fused MXU matmul over im2col ----
    # Shifted taps via circular lane rolls (XLU); lanes whose source crossed a
    # sequence/tile boundary are zeroed by the precomputed keep-masks.
    x_m1 = pltpu.roll(x, 1, axis=1) * keep_m1        # x[l-1]
    x_p1 = pltpu.roll(x, W - 1, axis=1) * keep_p1    # x[l+1]
    xcol = jnp.concatenate([x_m1, x, x_p1], axis=0).astype(dt)      # (3*Cpad, W)
    h = jnp.dot(w1_ref[...], xcol, preferred_element_type=jnp.float32)
    h = jnp.maximum(h + b1_ref[...], 0.0)            # (16, W) f32

    # ---- MaxPool1d(2): pooled value P[b, p] lives at lane b*L + 2p ----
    m = jnp.maximum(h, pltpu.roll(h, W - 1, axis=1))

    # ---- Conv1d(16->32, k=3, padding=1) on the stride-2 pooled sequence ----
    # TODO(synk): if bundle dumps show vmatmul as the binding slot, compact the
    # pooled sequence to even lanes before this stage (halves MXU work).
    m_m1 = pltpu.roll(m, 2, axis=1) * keep_m2        # P[p-1]
    m_p1 = pltpu.roll(m, W - 2, axis=1) * keep_p2    # P[p+1]
    pcol = jnp.concatenate([m_m1, m, m_p1], axis=0).astype(dt)      # (48, W)
    g = jnp.dot(w2_ref[...], pcol, preferred_element_type=jnp.float32)
    g = jnp.maximum(g + b2_ref[...], 0.0)            # (32, W) f32; valid at even lanes

    # ---- AdaptiveAvgPool1d(1) + Linear(32->1), folded ----
    # r = wf@g contracts the 32 channels first (1, W); r@seg then does the
    # per-sequence mean over the Lp valid (even) lanes -> lane-dense (1, TB).
    r = jnp.dot(wf_ref[...], g.astype(dt), preferred_element_type=jnp.float32)
    logits = jnp.dot(r.astype(dt), seg_ref[...], preferred_element_type=jnp.float32)
    out_ref[...] = (logits + bf_ref[...]).astype(out_ref.dtype)


def simple_cnn_forward(x_ncl, w1, b1, w2, b2, wf, bf, *, mxu_dtype=jnp.float32):
    """x_ncl: (B, Cin, L) as in PyTorch.  Torch-shaped params:
    w1 (16, Cin, 3), b1 (16,), w2 (32, 16, 3), b2 (32,), wf (1, 32), bf (1,).
    Returns (B, 1) float32.  mxu_dtype=jnp.bfloat16 casts only the MXU operands
    (f32 accumulation kept) -- recommended on v6e/v7x."""
    B, Cin, L = x_ncl.shape
    assert L % 2 == 0, "MaxPool1d(2) needs an even length"
    Lp = L // 2
    Cpad = max(8, -(-Cin // 8) * 8)                  # 8-sublane aligned channels

    # --- batch tile: aim for ~2048 lanes / grid step.  TB is a multiple of 128
    #     whenever the grid has >1 step (legal + unmasked lane-dense out block);
    #     >= 2 steps keeps both v7x TCs busy, v5e/v6e just get fewer+bigger steps.
    TB_min = 128 // math.gcd(L, 128)                 # smallest TB with TB*L % 128 == 0
    if B >= 256 and B * L > 2048:
        tiles = max(1, 2048 // (128 * L))            # 128-sequence groups per step
        tiles = min(tiles, max(1, B // 256))         # keep the grid >= 2 steps
        TB = 128 * tiles
        # TODO(synk): cap TB*L for very long sequences to respect v7x VMEM.
    else:
        TB = -(-B // TB_min) * TB_min                # single (padded) grid step
    B_pad = -(-B // TB) * TB
    grid = (B_pad // TB,)
    W = TB * L

    # --- lane-dense activation layout: channels on sublanes, batch*length on lanes
    x_cbl = jnp.transpose(x_ncl, (1, 0, 2))                          # (Cin, B, L)
    x_cbl = jnp.pad(x_cbl, ((0, Cpad - Cin), (0, B_pad - B), (0, 0)))
    x_flat = x_cbl.reshape(Cpad, B_pad * L).astype(jnp.float32)

    # --- fused im2col weights, row index = k * Cpad + c_in (taps l-1, l, l+1)
    w1t = jnp.pad(jnp.transpose(w1, (0, 2, 1)), ((0, 0), (0, 0), (0, Cpad - Cin)))
    w1m = w1t.reshape(16, 3 * Cpad).astype(mxu_dtype)
    w2m = jnp.transpose(w2, (0, 2, 1)).reshape(32, 48).astype(mxu_dtype)
    b1c = b1.reshape(16, 1).astype(jnp.float32)
    b2c = b2.reshape(32, 1).astype(jnp.float32)
    wfm = wf.reshape(1, 32).astype(mxu_dtype)
    bfc = bf.reshape(1, 1).astype(jnp.float32)

    # --- host-built constants (hoisted out of the kernel): boundary keep-masks
    #     and the folded (even-lane selection + 1/Lp) segment-mean matrix.
    #     Both are identical for every grid step -> constant index_map.
    l_in_seq = np.arange(W) % L
    masks_np = np.zeros((8, W), np.float32)
    masks_np[0] = l_in_seq != 0
    masks_np[1] = l_in_seq != L - 1
    masks_np[2] = l_in_seq >= 2
    masks_np[3] = l_in_seq < L - 2
    masks = jnp.asarray(masks_np)

    j = np.arange(W)
    bidx = np.arange(TB)
    seg_np = (j[:, None] // L == bidx[None, :]) & (j[:, None] % 2 == 0)
    seg = jnp.asarray(seg_np.astype(np.float32) / float(Lp), dtype=mxu_dtype)

    const = lambda i: (0, 0)
    out = pl.pallas_call(
        functools.partial(_simple_cnn_kernel, mxu_dtype=mxu_dtype),
        out_shape=jax.ShapeDtypeStruct((1, B_pad), jnp.float32),
        grid_spec=pltpu.PrefetchScalarGridSpec(
            num_scalar_prefetch=0,
            grid=grid,
            in_specs=[
                pl.BlockSpec((Cpad, W), lambda i: (0, i)),   # activations
                pl.BlockSpec((8, W), const),                 # boundary keep-masks
                pl.BlockSpec((W, TB), const),                # segment-mean matrix
                pl.BlockSpec((16, 3 * Cpad), const),         # conv1 weight
                pl.BlockSpec((16, 1), const),                # conv1 bias
                pl.BlockSpec((32, 48), const),               # conv2 weight
                pl.BlockSpec((32, 1), const),                # conv2 bias
                pl.BlockSpec((1, 32), const),                # fc weight
                pl.BlockSpec((1, 1), const),                 # fc bias
            ],
            out_specs=pl.BlockSpec((1, TB), lambda i: (0, i)),
        ),
        compiler_params=pltpu.CompilerParams(
            dimension_semantics=("parallel",)),
    )(x_flat, masks, seg, w1m, b1c, w2m, b2c, wfm, bfc)
    return jnp.transpose(out[:, :B])                 # (B, 1)


def ref_forward(x_ncl, w1, b1, w2, b2, wf, bf):
    """Pure-JAX reference matching torch semantics (NCL layout, OIH weights)."""
    h = jax.lax.conv_general_dilated(x_ncl, w1, window_strides=(1,),
                                     padding=[(1, 1)],
                                     dimension_numbers=('NCH', 'OIH', 'NCH'))
    h = jnp.maximum(h + b1.reshape(1, -1, 1), 0.0)
    Bn, C, Ln = h.shape
    p = h.reshape(Bn, C, Ln // 2, 2).max(-1)                 # MaxPool1d(2)
    g = jax.lax.conv_general_dilated(p, w2, window_strides=(1,),
                                     padding=[(1, 1)],
                                     dimension_numbers=('NCH', 'OIH', 'NCH'))
    g = jnp.maximum(g + b2.reshape(1, -1, 1), 0.0)
    avg = jnp.mean(g, axis=-1)                               # AdaptiveAvgPool1d(1)
    return avg @ wf.T + bf                                   # Linear(32, 1)


if __name__ == "__main__":
    key = jax.random.PRNGKey(0)
    ks = jax.random.split(key, 14)

    # Primary config: batch large enough that the kernel runs 2 grid steps of
    # 2048 lanes each (TB=128 sequences / step, grid multiple of 2 for v7x).
    B, Cin, L = 256, 4, 16
    x  = jax.random.normal(ks[0], (B, Cin, L), jnp.float32)
    w1 = jax.random.normal(ks[1], (16, Cin, 3), jnp.float32) * 0.2
    b1 = jax.random.normal(ks[2], (16,), jnp.float32) * 0.1
    w2 = jax.random.normal(ks[3], (32, 16, 3), jnp.float32) * 0.1
    b2 = jax.random.normal(ks[4], (32,), jnp.float32) * 0.1
    wf = jax.random.normal(ks[5], (1, 32), jnp.float32) * 0.1
    bf = jax.random.normal(ks[6], (1,), jnp.float32) * 0.1

    ref = jax.block_until_ready(ref_forward(x, w1, b1, w2, b2, wf, bf))

    # f32 MXU path (exact vs reference).
    out = jax.block_until_ready(simple_cnn_forward(x, w1, b1, w2, b2, wf, bf))
    np.testing.assert_allclose(np.asarray(out), np.asarray(ref),
                               rtol=1e-4, atol=1e-4)

    # bf16 MXU operands (v6e/v7x recommendation); f32 accumulation kept.
    out_bf16 = jax.block_until_ready(
        simple_cnn_forward(x, w1, b1, w2, b2, wf, bf, mxu_dtype=jnp.bfloat16))
    np.testing.assert_allclose(np.asarray(out_bf16), np.asarray(ref),
                               rtol=5e-2, atol=5e-2)

    # Small / ragged config exercising the single-tile padded-batch path.
    B2, Cin2, L2 = 5, 3, 10
    x2  = jax.random.normal(ks[7], (B2, Cin2, L2), jnp.float32)
    w1b = jax.random.normal(ks[8], (16, Cin2, 3), jnp.float32) * 0.2
    b1b = jax.random.normal(ks[9], (16,), jnp.float32) * 0.1
    w2b = jax.random.normal(ks[10], (32, 16, 3), jnp.float32) * 0.1
    b2b = jax.random.normal(ks[11], (32,), jnp.float32) * 0.1
    wfb = jax.random.normal(ks[12], (1, 32), jnp.float32) * 0.1
    bfb = jax.random.normal(ks[13], (1,), jnp.float32) * 0.1
    out2 = jax.block_until_ready(
        simple_cnn_forward(x2, w1b, b1b, w2b, b2b, wfb, bfb))
    ref2 = jax.block_until_ready(ref_forward(x2, w1b, b1b, w2b, b2b, wfb, bfb))
    np.testing.assert_allclose(np.asarray(out2), np.asarray(ref2),
                               rtol=1e-4, atol=1e-4)

    print("KERNEL_OK")
</pallas_src>

<mosaic_0001>
module attributes {stable_mosaic.version = 11 : i64} {
  func.func @_simple_cnn_kernel(%arg0: i32, %arg1: memref<8x2048xf32, #tpu.memory_space<vmem>>, %arg2: memref<8x2048xf32, #tpu.memory_space<vmem>>, %arg3: memref<2048x128xf32, #tpu.memory_space<vmem>>, %arg4: memref<16x24xf32, #tpu.memory_space<vmem>>, %arg5: memref<16x1xf32, #tpu.memory_space<vmem>>, %arg6: memref<32x48xf32, #tpu.memory_space<vmem>>, %arg7: memref<32x1xf32, #tpu.memory_space<vmem>>, %arg8: memref<1x32xf32, #tpu.memory_space<vmem>>, %arg9: memref<1x1xf32, #tpu.memory_space<vmem>>, %arg10: memref<1x128xf32, #tpu.memory_space<vmem>>) attributes {dimension_semantics = [#tpu.dimension_semantics<parallel>], iteration_bounds = array<i64: 2>, scalar_prefetch = 0 : i64, scratch_operands = 0 : i64, tpu.core_type = #tpu.core_type<tc>, window_params = [{transform_indices = @transform_0, window_bounds = array<i64: 8, 2048>}, {pipeline_mode = #tpu.pipeline_mode<synchronous>, transform_indices = @transform_1, window_bounds = array<i64: 8, 2048>}, {pipeline_mode = #tpu.pipeline_mode<synchronous>, transform_indices = @transform_2, window_bounds = array<i64: 2048, 128>}, {pipeline_mode = #tpu.pipeline_mode<synchronous>, transform_indices = @transform_3, window_bounds = array<i64: 16, 24>}, {pipeline_mode = #tpu.pipeline_mode<synchronous>, transform_indices = @transform_4, window_bounds = array<i64: 16, 1>}, {pipeline_mode = #tpu.pipeline_mode<synchronous>, transform_indices = @transform_5, window_bounds = array<i64: 32, 48>}, {pipeline_mode = #tpu.pipeline_mode<synchronous>, transform_indices = @transform_6, window_bounds = array<i64: 32, 1>}, {pipeline_mode = #tpu.pipeline_mode<synchronous>, transform_indices = @transform_7, window_bounds = array<i64: 1, 32>}, {pipeline_mode = #tpu.pipeline_mode<synchronous>, transform_indices = @transform_8, window_bounds = array<i64: 1, 1>}, {transform_indices = @transform_9, window_bounds = array<i64: 1, 128>}]} {
    %c0 = arith.constant 0 : index
    %c0_0 = arith.constant 0 : index
    %0 = vector.load %arg1[%c0, %c0_0] : memref<8x2048xf32, #tpu.memory_space<vmem>>, vector<8x2048xf32>
    %c0_1 = arith.constant 0 : index
    %c0_2 = arith.constant 0 : index
    %1 = vector.load %arg2[%c0_1, %c0_2] : memref<8x2048xf32, #tpu.memory_space<vmem>>, vector<1x2048xf32>
    %c1 = arith.constant 1 : index
    %c0_3 = arith.constant 0 : index
    %2 = vector.load %arg2[%c1, %c0_3] : memref<8x2048xf32, #tpu.memory_space<vmem>>, vector<1x2048xf32>
    %c2 = arith.constant 2 : index
    %c0_4 = arith.constant 0 : index
    %3 = vector.load %arg2[%c2, %c0_4] : memref<8x2048xf32, #tpu.memory_space<vmem>>, vector<1x2048xf32>
    %c3 = arith.constant 3 : index
    %c0_5 = arith.constant 0 : index
    %4 = vector.load %arg2[%c3, %c0_5] : memref<8x2048xf32, #tpu.memory_space<vmem>>, vector<1x2048xf32>
    %c1_i32 = arith.constant 1 : i32
    %5 = tpu.dynamic_rotate %0 by %c1_i32 dim 1 : vector<8x2048xf32>, i32 -> vector<8x2048xf32>
    %6 = vector.broadcast %1 : vector<1x2048xf32> to vector<8x2048xf32>
    %7 = arith.mulf %5, %6 : vector<8x2048xf32>
    %c2047_i32 = arith.constant 2047 : i32
    %8 = tpu.dynamic_rotate %0 by %c2047_i32 dim 1 : vector<8x2048xf32>, i32 -> vector<8x2048xf32>
    %9 = vector.broadcast %2 : vector<1x2048xf32> to vector<8x2048xf32>
    %10 = arith.mulf %8, %9 : vector<8x2048xf32>
    %11 = tpu.concatenate %7, %0, %10 in 0 : vector<8x2048xf32>, vector<8x2048xf32>, vector<8x2048xf32> -> vector<24x2048xf32>
    %c0_6 = arith.constant 0 : index
    %c0_7 = arith.constant 0 : index
    %12 = vector.load %arg4[%c0_6, %c0_7] : memref<16x24xf32, #tpu.memory_space<vmem>>, vector<16x24xf32>
    %cst = arith.constant dense<0.000000e+00> : vector<16x2048xf32>
    %13 = tpu.matmul %12, %11, %cst {dimension_numbers = #tpu.dot_dimension_numbers<[1], [0], [0], [1], [0, 0, 1, 1], [], []>} : vector<16x24xf32>, vector<24x2048xf32>, vector<16x2048xf32> -> vector<16x2048xf32>
    %c0_8 = arith.constant 0 : index
    %c0_9 = arith.constant 0 : index
    %14 = vector.load %arg5[%c0_8, %c0_9] : memref<16x1xf32, #tpu.memory_space<vmem>>, vector<16x1xf32>
    %15 = vector.broadcast %14 : vector<16x1xf32> to vector<16x2048xf32>
    %16 = arith.addf %13, %15 : vector<16x2048xf32>
    %cst_10 = arith.constant 0.000000e+00 : f32
    %17 = vector.broadcast %cst_10 : f32 to vector<16x2048xf32>
    %18 = arith.maximumf %16, %17 : vector<16x2048xf32>
    %c2047_i32_11 = arith.constant 2047 : i32
    %19 = tpu.dynamic_rotate %18 by %c2047_i32_11 dim 1 : vector<16x2048xf32>, i32 -> vector<16x2048xf32>
    %20 = arith.maximumf %18, %19 : vector<16x2048xf32>
    %c2_i32 = arith.constant 2 : i32
    %21 = tpu.dynamic_rotate %20 by %c2_i32 dim 1 : vector<16x2048xf32>, i32 -> vector<16x2048xf32>
    %22 = vector.broadcast %3 : vector<1x2048xf32> to vector<16x2048xf32>
    %23 = arith.mulf %21, %22 : vector<16x2048xf32>
    %c2046_i32 = arith.constant 2046 : i32
    %24 = tpu.dynamic_rotate %20 by %c2046_i32 dim 1 : vector<16x2048xf32>, i32 -> vector<16x2048xf32>
    %25 = vector.broadcast %4 : vector<1x2048xf32> to vector<16x2048xf32>
    %26 = arith.mulf %24, %25 : vector<16x2048xf32>
    %27 = tpu.concatenate %23, %20, %26 in 0 : vector<16x2048xf32>, vector<16x2048xf32>, vector<16x2048xf32> -> vector<48x2048xf32>
    %c0_12 = arith.constant 0 : index
    %c0_13 = arith.constant 0 : index
    %28 = vector.load %arg6[%c0_12, %c0_13] : memref<32x48xf32, #tpu.memory_space<vmem>>, vector<32x48xf32>
    %cst_14 = arith.constant dense<0.000000e+00> : vector<32x2048xf32>
    %29 = tpu.matmul %28, %27, %cst_14 {dimension_numbers = #tpu.dot_dimension_numbers<[1], [0], [0], [1], [0, 0, 1, 1], [], []>} : vector<32x48xf32>, vector<48x2048xf32>, vector<32x2048xf32> -> vector<32x2048xf32>
    %c0_15 = arith.constant 0 : index
    %c0_16 = arith.constant 0 : index
    %30 = vector.load %arg7[%c0_15, %c0_16] : memref<32x1xf32, #tpu.memory_space<vmem>>, vector<32x1xf32>
    %31 = vector.broadcast %30 : vector<32x1xf32> to vector<32x2048xf32>
    %32 = arith.addf %29, %31 : vector<32x2048xf32>
    %cst_17 = arith.constant 0.000000e+00 : f32
    %33 = vector.broadcast %cst_17 : f32 to vector<32x2048xf32>
    %34 = arith.maximumf %32, %33 : vector<32x2048xf32>
    %c0_18 = arith.constant 0 : index
    %c0_19 = arith.constant 0 : index
    %35 = vector.load %arg8[%c0_18, %c0_19] : memref<1x32xf32, #tpu.memory_space<vmem>>, vector<1x32xf32>
    %cst_20 = arith.constant dense<0.000000e+00> : vector<1x2048xf32>
    %36 = tpu.matmul %35, %34, %cst_20 {dimension_numbers = #tpu.dot_dimension_numbers<[1], [0], [0], [1], [0, 0, 1, 1], [], []>} : vector<1x32xf32>, vector<32x2048xf32>, vector<1x2048xf32> -> vector<1x2048xf32>
    %c0_21 = arith.constant 0 : index
    %c0_22 = arith.constant 0 : index
    %37 = vector.load %arg3[%c0_21, %c0_22] : memref<2048x128xf32, #tpu.memory_space<vmem>>, vector<2048x128xf32>
    %cst_23 = arith.constant dense<0.000000e+00> : vector<1x128xf32>
    %38 = tpu.matmul %36, %37, %cst_23 {dimension_numbers = #tpu.dot_dimension_numbers<[1], [0], [0], [1], [0, 0, 1, 1], [], []>} : vector<1x2048xf32>, vector<2048x128xf32>, vector<1x128xf32> -> vector<1x128xf32>
    %c0_24 = arith.constant 0 : index
    %c0_25 = arith.constant 0 : index
    %39 = vector.load %arg9[%c0_24, %c0_25] : memref<1x1xf32, #tpu.memory_space<vmem>>, vector<1x1xf32>
    %40 = vector.broadcast %39 : vector<1x1xf32> to vector<1x128xf32>
    %41 = arith.addf %38, %40 : vector<1x128xf32>
    %c0_26 = arith.constant 0 : index
    %c0_27 = arith.constant 0 : index
    %42 = vector.load %arg10[%c0_26, %c0_27] : memref<1x128xf32, #tpu.memory_space<vmem>>, vector<1x128xf32>
    tpu.vector_store %arg10[%c0_26, %c0_27], %41 {strides = array<i32>} : memref<1x128xf32, #tpu.memory_space<vmem>>, vector<1x128xf32>,
    return
  }
  func.func @transform_0(%arg0: i32) -> (i32, i32) {
    %c0_i32 = arith.constant 0 : i32
    %c0_i32_0 = arith.constant 0 : i32
    return %c0_i32, %arg0 : i32, i32
  }
  func.func @transform_1(%arg0: i32) -> (i32, i32) {
    %c0_i32 = arith.constant 0 : i32
    %c0_i32_0 = arith.constant 0 : i32
    %c0_i32_1 = arith.constant 0 : i32
    return %c0_i32, %c0_i32_0 : i32, i32
  }
  func.func @transform_2(%arg0: i32) -> (i32, i32) {
    %c0_i32 = arith.constant 0 : i32
    %c0_i32_0 = arith.constant 0 : i32
    %c0_i32_1 = arith.constant 0 : i32
    return %c0_i32, %c0_i32_0 : i32, i32
  }
  func.func @transform_3(%arg0: i32) -> (i32, i32) {
    %c0_i32 = arith.constant 0 : i32
    %c0_i32_0 = arith.constant 0 : i32
    %c0_i32_1 = arith.constant 0 : i32
    return %c0_i32, %c0_i32_0 : i32, i32
  }
  func.func @transform_4(%arg0: i32) -> (i32, i32) {
    %c0_i32 = arith.constant 0 : i32
    %c0_i32_0 = arith.constant 0 : i32
    %c0_i32_1 = arith.constant 0 : i32
    return %c0_i32, %c0_i32_0 : i32, i32
  }
  func.func @transform_5(%arg0: i32) -> (i32, i32) {
    %c0_i32 = arith.constant 0 : i32
    %c0_i32_0 = arith.constant 0 : i32
    %c0_i32_1 = arith.constant 0 : i32
    return %c0_i32, %c0_i32_0 : i32, i32
  }
  func.func @transform_6(%arg0: i32) -> (i32, i32) {
    %c0_i32 = arith.constant 0 : i32
    %c0_i32_0 = arith.constant 0 : i32
    %c0_i32_1 = arith.constant 0 : i32
    return %c0_i32, %c0_i32_0 : i32, i32
  }
  func.func @transform_7(%arg0: i32) -> (i32, i32) {
    %c0_i32 = arith.constant 0 : i32
    %c0_i32_0 = arith.constant 0 : i32
    %c0_i32_1 = arith.constant 0 : i32
    return %c0_i32, %c0_i32_0 : i32, i32
  }
  func.func @transform_8(%arg0: i32) -> (i32, i32) {
    %c0_i32 = arith.constant 0 : i32
    %c0_i32_0 = arith.constant 0 : i32
    %c0_i32_1 = arith.constant 0 : i32
    return %c0_i32, %c0_i32_0 : i32, i32
  }
  func.func @transform_9(%arg0: i32) -> (i32, i32) {
    %c0_i32 = arith.constant 0 : i32
    %c0_i32_0 = arith.constant 0 : i32
    return %c0_i32, %arg0 : i32, i32
  }
}

</mosaic_0001>

<bundles_post_ra>
// kernel: tpu_custom_call.1
= control target key start
LH: loop header
LB: loop body
LE: loop exit
PB: predicated region body
PF: predicated region fallthrough
CT: control target
= control target key end

     0   :  { %s7165_s0 = inlined_call_operand.hbm [shape: f32[8,4096], index: 0, kind: input, shape index: {}]   ;;  %s7166_s1 = inlined_call_operand.hbm [shape: f32[8,2048], index: 1, kind: input, shape index: {}]   ;;  %s7167_s2 = inlined_call_operand.hbm [shape: f32[2048,128], index: 2, kind: input, shape index: {}]   ;;  %s7168_s3 = inlined_call_operand.vmem [shape: f32[16,24], index: 3, kind: input, shape index: {}]   ;;  %s7169_s4 = inlined_call_operand.vmem [shape: f32[16,1], index: 4, kind: input, shape index: {}]   ;;  %s7170_s5 = inlined_call_operand.vmem [shape: f32[32,48], index: 5, kind: input, shape index: {}]   ;;  %s7171_s6 = inlined_call_operand.vmem [shape: f32[32,1], index: 6, kind: input, shape index: {}]   ;;  %s7172_s7 = inlined_call_operand.vmem [shape: f32[1,32], index: 7, kind: input, shape index: {}]   ;;  %s7173_s8 = inlined_call_operand.<no memory space> [shape: f32[1,1], index: 8, kind: input, shape index: {}]   ;;  %s7174_s9 = inlined_call_operand.hbm [shape: f32[1,256], index: 9, kind: output, shape index: {}]  }
   0x1   :  { %v14_v0 = vstv %s7173_s8 }
   0x2   :  { %15 = vst [vmem:[#allocation2] sm:$0x1] %v14_v0 }
   0x3   :  { %16 = vsyncpa [#allocation4], 0 }
   0x4   :  { %18 = vsyncpa [#allocation4 + $0x1], 0 }
   0x5   :  { %19 = vsyncpa [#allocation7], 0 }
   0x6   :  { %20 = vsyncpa [#allocation5], 0 }
   0x7   :  { %22 = vsyncpa [#allocation5 + $0x1], 0  ;;  %s5355_s11 = smov 0   ;;  %s5357_s12 = smov 0  }
   0x8   :  { %s5359_s13 = smov 0   ;;  %s5361_s14 = smov 0  }
   0x9 LB: > { %s5376_s8 = sadd.s32 4294967295, %s5288_s14   ;;  %s4255_s15 = sadd.s32 4294967294, %s5288_s14   ;;  %s5288_s14 = sphi %s5361_s14, %s7298_s14   ;;  %s5284_s13 = sphi %s5359_s13, %s7297_s13   ;;  %s5280_s12 = sphi %s5357_s12, %s7296_s12   ;;  %s5276_s11 = sphi %s5355_s11, %s7295_s11  }
   0xa   : > { %p48_p0 = scmp.ne.s32.totalorder %s5280_s12, %s5276_s11  ;;  %p7175_p1 = scmp.eq.s32.totalorder %s5376_s8, 0 }
   0xb   : > { %p246_p3 = scmp.eq.s32.totalorder %s4255_s15, 1  ;;  %p4256_p5 = scmp.ge.s32.totalorder %s5288_s14, 1 }
   0xc   : > { %p5385_p4 = por %p7175_p1, %p48_p0  ;;  %p253_p7 = scmp.lt.s32.totalorder %s5288_s14, 3 }
   0xd   : > { %p5390_p6 = por %p246_p3, %p48_p0  ;;  %s5290_s19 = smov [#allocation6]  }
   0xe   : > { %s7219_s16 = scalar_select %p5385_p4, 1, 0 }
   0xf   : > { %s7220_s17 = scalar_select %p5390_p6, 1, 0 }
  0x10   : > { %p5395_p8 = pnand %p4256_p5, %p253_p7  ;;  %s266_s20 = sshll.u32 %s5290_s19, 4  ;;  %s267_s20 = int_to_ptr.vmem [resolvable:$true] %s266_s20 }
  0x11   : > { %s5291_s21 = smov [#allocation8]   ;;  %s5132_s26 = scalar_lea.hbm %s7166_s1, 2048 }
  0x12   : > { %s7221_s18 = scalar_select %p5395_p8, 1, 0 }
  0x13   : > { %p5067_p10 = pneg %p5395_p8  ;;  %s276_s22 = sshll.u32 %s5291_s21, 4  ;;  %s5408_s22 = int_to_ptr.vmem [resolvable:$true] %s276_s22 }
  0x14   : > { %p5133_p12 = scmp.ne.s32.totalorder %s7166_s1, %s5132_s26  ;;  %p5139_p5 = scmp.lt.u32.totalorder %s5132_s26, %s7166_s1 }
  0x15   : > { %p5404_p11 = pnand %p5067_p10, %p7175_p1 }
  0x17   : > { %p5134_p13 = pneg %p5404_p11 }
  0x19   : > { %p5135_p0 = pnand %p5134_p13, %p5133_p12 }
  0x1b   : > { %p5136_p3 = pneg %p5135_p0 }
  0x1d   : > { %p5141_p7 = pnand %p5139_p5, %p5136_p3 }
  0x1f   : > { %5144 = shalt.err (!%p5141_p7)
}
  0x20   : > { %s5145_s10 = scalar_lea.vmem %s267_s20, 2048  ;;  %p5153_p2 = scmp.lt.s32.totalorder %s267_s20, %s267_s20 }
  0x21   : > { %p5146_p10 = scmp.ne.s32.totalorder %s267_s20, %s5145_s10  ;;  %p5154_p6 = scmp.lt.s32.totalorder %s5145_s10, %s5145_s10 }
  0x23   : > { %p5148_p9 = pnand %p5146_p10, %p5134_p13  ;;  %p5155_p4 = por %p5154_p6, %p5153_p2 }
  0x25   : > { %p5149_p1 = pneg %p5148_p9 }
  0x27   : > { %p5156_p8 = pnand %p5155_p4, %p5149_p1 }
  0x29   : > { %5159 = shalt.err (!%p5156_p8)
}
  0x2a   : > { %5070 = dma.hbm_to_vmem [thread:$0]  (!%p5404_p11), %s7166_s1, 2048, %s267_s20, [#allocation7]  }
  0x2b   : > { %s5160_s25 = scalar_lea.hbm %s7167_s2, 32768 }
  0x2c   : > { %p5161_p9 = scmp.ne.s32.totalorder %s7167_s2, %s5160_s25  ;;  %p5167_p4 = scmp.lt.u32.totalorder %s5160_s25, %s7167_s2 }
  0x2e   : > { %p5163_p2 = pnand %p5161_p9, %p5134_p13 }
  0x30   : > { %p5164_p1 = pneg %p5163_p2 }
  0x32   : > { %p5169_p6 = pnand %p5167_p4, %p5164_p1 }
  0x34   : > { %5172 = shalt.err (!%p5169_p6)
}
  0x35   : > { %s5173_s20 = scalar_lea.vmem %s5408_s22, 32768  ;;  %p5181_p3 = scmp.lt.s32.totalorder %s5408_s22, %s5408_s22 }
  0x36   : > { %p5174_p8 = scmp.ne.s32.totalorder %s5408_s22, %s5173_s20  ;;  %p5182_p5 = scmp.lt.s32.totalorder %s5173_s20, %s5173_s20 }
  0x38   : > { %p5176_p12 = pnand %p5174_p8, %p5134_p13  ;;  %p5183_p7 = por %p5182_p5, %p5181_p3 }
  0x3a   : > { %p5177_p0 = pneg %p5176_p12 }
  0x3c   : > { %p5184_p10 = pnand %p5183_p7, %p5177_p0 }
  0x3e   : > { %5187 = shalt.err (!%p5184_p10)
}
  0x3f   : > { %s5292_s30 = smov 128   ;;  %s5293_s10 = smov 8  }
  0x40   : > { %5073 = dma.hbm_to_vmem [thread:$0]  (!%p5404_p11), %s7167_s2, 32768, %s5408_s22, [#allocation7], %s5292_s30, %s5292_s30, %s5293_s10  }
  0x41   : > { %s5458_s21 = sadd.s32 1, %s5288_s14   ;;  %s35_s24 = sadd.s32 1, %s5284_s13 }
  0x42   : > { %s32_s25 = ssub.s32 %s5288_s14, %s5458_s21  ;;  %p42_p13 = scmp.ne.s32.totalorder %s5284_s13, %s5280_s12 }
  0x43   : > { %p33_p9 = scmp.eq.s32.totalorder %s32_s25, 0  ;;  %p43_p2 = scmp.eq.s32.totalorder %s5288_s14, 0 }
  0x44   : > { %p7223_p1 = scmp.eq.s32.totalorder %s5376_s8, 1  ;;  %p5084_p6 = scmp.lt.s32.totalorder %s5288_s14, 2 }
  0x45   : > { %s5474_s27 = scalar_select %p33_p9, %s5284_s13, %s35_s24  }
  0x46   : > { %p5468_p4 = por %p7223_p1, %p42_p13  ;;  %p44_p8 = por %p43_p2, %p42_p13 }
  0x47   : > { %s308_s23 = sand.u32 1, %s5284_s13   ;;  %s4326_s22 = sshll.u32 %s5288_s14, 11 }
  0x48   : > { %s4260_s28 = sshll.u32 %s308_s23, 7  ;;  %s5481_s30 = scalar_lea.hbm %s7165_s0, %s4326_s22 }
  0x49   : > { %s312_s10 = scalar_lea.vmem [#allocation3], %s4260_s28  ;;  %p5485_p11 = pnand %p5084_p6, %p44_p8 }
  0x4a   : > { %s320_s15 = sshll.u32 %s312_s10, 4  ;;  %s309_s24 = scalar_lea.sflag [#allocation4], %s308_s23  ;;  %s5483_s15 = int_to_ptr.vmem [resolvable:$true] %s320_s15 }
  0x4b   : > { %s5188_s25 = scalar_lea.hbm %s5481_s30, 2048  ;;  %p5190_p0 = pneg %p5485_p11 }
  0x4c   : > { %p5189_p12 = scmp.ne.s32.totalorder %s5481_s30, %s5188_s25  ;;  %s5193_s29 = scalar_lea.hbm %s7165_s0, 4096 }
  0x4d   : > { %p5194_p7 = scmp.lt.u32.totalorder %s5481_s30, %s7165_s0  ;;  %p5195_p10 = scmp.lt.u32.totalorder %s5193_s29, %s5188_s25 }
  0x4e   : > { %p5191_p3 = pnand %p5190_p0, %p5189_p12  ;;  %p5197_p9 = scmp.lt.u32.totalorder %s5188_s25, %s5481_s30 }
  0x4f   : > { %p5196_p13 = por %p5195_p10, %p5194_p7 }
  0x50   : > { %p5192_p5 = pneg %p5191_p3 }
  0x51   : > { %p5198_p2 = por %p5197_p9, %p5196_p13 }
  0x53   : > { %p5199_p1 = pnand %p5198_p2, %p5192_p5 }
  0x55   : > { %5202 = shalt.err (!%p5199_p1)
}
  0x56   : > { %s5203_s23 = scalar_lea.vmem %s5483_s15, 2048  ;;  %s5294_s22 = smov [#allocation3]  }
  0x57   : > { %p5204_p6 = scmp.ne.s32.totalorder %s5483_s15, %s5203_s23  ;;  %s5208_s28 = sshll.u32 %s5294_s22, 4  ;;  %s5209_s28 = int_to_ptr.vmem [resolvable:$false] %s5208_s28 }
  0x58   : > { %s5210_s20 = scalar_lea.vmem %s5209_s28, 4096  ;;  %p5211_p3 = scmp.lt.s32.totalorder %s5483_s15, %s5209_s28 }
  0x59   : > { %p5206_p8 = pnand %p5204_p6, %p5190_p0  ;;  %p5212_p7 = scmp.lt.s32.totalorder %s5210_s20, %s5203_s23 }
  0x5b   : > { %p5207_p12 = pneg %p5206_p8  ;;  %p5213_p10 = por %p5212_p7, %p5211_p3 }
  0x5d   : > { %p5214_p13 = pnand %p5213_p10, %p5207_p12 }
  0x5f   : > { %5217 = shalt.err (!%p5214_p13)
}
  0x60   : > { %5077 = dma.hbm_to_vmem [thread:$0]  (!%p5485_p11), %s5481_s30, 2048, %s5483_s15, %s309_s24  }
  0x61   : > { %p7226_p5 = scmp.ne.s32.totalorder %s7221_s18, 0 }
  0x63   : > { %329 = sbr.rel (%p7226_p5) target bundleno = 1617 (0x651), region = 56 }
  0x6a   : > { %s5517_s25 = sand.u32 1, %s5280_s12   ;;  %p7227_p0 = scmp.ne.s32.totalorder %s7219_s16, 0 }
  0x6b   : > { %s4264_s29 = sshll.u32 %s5517_s25, 7  ;;  %s332_s10 = scalar_lea.sflag [#allocation4], %s5517_s25 }
  0x6c   : > { %s5521_s23 = scalar_lea.vmem [#allocation3], %s4264_s29 }
  0x6d   : > { %5263 = dma.done.wait (%p7227_p0), %s332_s10, 2048  }
  0x6e   : > { %5265 = vsyncadd (%p7227_p0), %s332_s10, 4294965248  ;;  %p7228_p11 = scmp.eq.s32.totalorder %s5376_s8, 0 }
  0x70   : > { %5267 = dma.done.wait (%p7228_p11), [#allocation7], 34816   ;;  %p7229_p9 = pmov %p7228_p11 }
  0x71   : > { %v5532_v1 = vld [vmem:[%s5521_s23 + $0x10] sm:$0xff]  ;;  %v5535_v2 = vld [vmem:[%s5521_s23 + $0x8] sm:$0xff]  ;;  %s5295_s18 = smov 1   ;;  %v5542_v3 = vld [vmem:[%s5521_s23 + $0x18] sm:$0xff]  ;;  %s5296_s16 = smov 127   ;;  %v7178_v5 = vmov 0.0   ;;  %v457_v21 = vlaneseq }
  0x72   : > { %5269 = vsyncadd (%p7229_p9), [#allocation7], 4294932480  ;;  %429 = vrot.lane.b32.xlu0 %v5532_v1, %s5295_s18  ;;  %427 = vrot.lane.b32.xlu1 %v5535_v2, %s5295_s18  ;;  %v5549_v4 = vld [vmem:[%s5521_s23 + $0x20] sm:$0xff]  ;;  %v5557_v6 = vld [vmem:[%s5521_s23 + $0x30] sm:$0xff]  ;;  %v5298_v20 = vmov 0   ;;  %vm735_vm2 = vcmask 195584  }
  0x73   : > { %883 = vmatprep.mubr.f32.mxu1 %v7178_v5  ;;  %v5560_v7 = vld [vmem:[%s5521_s23 + $0x38] sm:$0xff]  ;;  %806 = vmatprep.mubr.f32.mxu0 %v7178_v5  ;;  %v5568_v8 = vld [vmem:[%s5521_s23 + $0x28] sm:$0xff]  ;;  %v5575_v9 = vld [vmem:[%s5521_s23 + $0x40] sm:$0xff]  ;;  %v5651_v22 = vand.u32 127, %v457_v21  ;;  %v5653_v23 = vshrl.u32 %v457_v21, 7  ;;  %s5299_s10 = smov 2  }
  0x74   : > { %v5582_v10 = vld [vmem:[%s5521_s23 + $0x50] sm:$0xff]  ;;  %v5585_v11 = vld [vmem:[%s5521_s23 + $0x58] sm:$0xff]  ;;  %v5592_v12 = vld [vmem:[%s5521_s23 + $0x48] sm:$0xff]  ;;  %5130 = vset.pattern.permute.xlu0 %v5298_v20  ;;  %5131 = vset.pattern.permute.xlu1 %v5298_v20  ;;  %vm1968_vm5 = vcmask 392192   ;;  %vm2758_vm6 = vcmask 261120   ;;  %s4323_s22 = sshll.u32 %s5376_s8, 4 }
  0x75   : > { %v5595_v13 = vld [vmem:[%s5521_s23] sm:$0xff]  ;;  %v5602_v14 = vld [vmem:[%s5521_s23 + $0x78] sm:$0xff]  ;;  %v5616_v16 = vld [vmem:[%s5521_s23 + $0x70] sm:$0xff]  ;;  %v5658_v27 = vsub.s32 2, %v5653_v23  ;;  %vm459_vm0 = vcmp.lt.s32.totalorder %v5651_v22, 1  ;;  %v5662_v28 = vsub.s32 3, %v5653_v23 }
  0x76   : > { %431 = vrot.lane.b32.xlu0 %v5542_v3, %s5295_s18  ;;  %580 = vrot.lane.b32.xlu1 %v5542_v3, %s5296_s16  ;;  %v5609_v15 = vld [vmem:[%s5521_s23 + $0x60] sm:$0xff]  ;;  %v5623_v17 = vld [vmem:[%s5521_s23 + $0x68] sm:$0xff]  ;;  %vm606_vm1 = vcmp.lt.s32.totalorder %v5651_v22, 127  ;;  %v5684_v43 = vsub.s32 7, %v5653_v23  ;;  %v5703_v53 = vsub.s32 6, %v5653_v23  ;;  %s5300_s23 = smov 126  }
  0x77   : > { %v723_v18 = vld [vmem:[%s7169_s4] sm:$0xff]  ;;  %v724_v19 = vld [vmem:[%s7169_s4 + $0x8] sm:$0xff]  ;;  %vm1582_vm3 = vcmp.lt.s32.totalorder %v5651_v22, 2  ;;  %vm1793_vm4 = vcmp.lt.s32.totalorder %v5651_v22, 126  ;;  %s376_s28 = scalar_lea.vmem [#allocation9], %s5517_s25  ;;  %s5301_s8 = smov [#allocation9]  }
  0x78   : > { %v394_v24 = vld [vmem:[#allocation6] ss:$8 sm:$0xf]  ;;  %v402_v29 = vld [vmem:[#allocation6 + $0x1] ss:$8 sm:$0xf] }
  0x79   : > { %v395_v25 = vld [vmem:[#allocation6] ss:$8 sm:$0xf0]  ;;  %v403_v30 = vld [vmem:[#allocation6 + $0x1] ss:$8 sm:$0xf0] }
  0x7a   : > { %582 = vrot.lane.b32.xlu0 %v5549_v4, %s5296_s16  ;;  %578 = vrot.lane.b32.xlu1 %v5532_v1, %s5296_s16  ;;  %v5655_v26 = vor.u32 %v395_v25, %v394_v24  ;;  %v5673_v36 = vor.u32 %v403_v30, %v402_v29  ;;  %v5713_v58 = vld [vmem:[%s7168_s3] sm:$0xff]  ;;  %s4170_s20 = sshll.u32 %s376_s28, 4  ;;  %s7123_s20 = int_to_ptr.vmem [resolvable:$true] %s4170_s20 }
  0x7b   : > { %v398_v61 = vld [vmem:[#allocation6 + $0x40] ss:$8 sm:$0xf]  ;;  %s5218_s30 = scalar_lea.vmem %s7123_s20, 16 }
  0x7c   : > { %v489_v33 = vrot.slane %v5655_v26, %v5658_v27  ;;  %v493_v35 = vrot.slane %v5655_v26, %v5662_v28  ;;  %v640_v42 = vrot.slane %v5673_v36, %v5662_v28  ;;  %v636_v49 = vrot.slane %v5673_v36, %v5658_v27  ;;  %v399_v62 = vld [vmem:[#allocation6 + $0x40] ss:$8 sm:$0xf0]  ;;  %p5219_p2 = scmp.ne.s32.totalorder %s7123_s20, %s5218_s30 }
  0x7d   : > { %v509_v52 = vrot.slane %v5655_v26, %v5684_v43  ;;  %v505_v60 = vrot.slane %v5655_v26, %v5703_v53  ;;  %v656_v20 = vrot.slane %v5673_v36, %v5684_v43  ;;  %v652_v25 = vrot.slane %v5673_v36, %v5703_v53 }
  0x7e   : > { %437 = vrot.lane.b32.xlu0 %v5557_v6, %s5295_s18  ;;  %439 = vrot.lane.b32.xlu1 %v5560_v7, %s5295_s18  ;;  %p5220_p1 = pnand %p5219_p2, %p5468_p4 }
  0x80   : > { %p5221_p6 = pneg %p5220_p1 }
  0x82   : > { %435 = vrot.lane.b32.xlu0 %v5568_v8, %s5295_s18  ;;  %588 = vrot.lane.b32.xlu1 %v5560_v7, %s5296_s16 }
  0x86   : > { %590 = vrot.lane.b32.xlu0 %v5575_v9, %s5296_s16  ;;  %586 = vrot.lane.b32.xlu1 %v5557_v6, %s5296_s16 }
  0x8a   : > { %445 = vrot.lane.b32.xlu0 %v5582_v10, %s5295_s18  ;;  %447 = vrot.lane.b32.xlu1 %v5585_v11, %s5295_s18 }
  0x8e   : > { %443 = vrot.lane.b32.xlu0 %v5592_v12, %s5295_s18  ;;  %425 = vrot.lane.b32.xlu1 %v5595_v13, %s5295_s18 }
  0x92   : > { %455 = vrot.lane.b32.xlu0 %v5602_v14, %s5295_s18  ;;  %596 = vrot.lane.b32.xlu1 %v5585_v11, %s5296_s16 }
  0x96   : > { %598 = vrot.lane.b32.xlu0 %v5609_v15, %s5296_s16  ;;  %594 = vrot.lane.b32.xlu1 %v5582_v10, %s5296_s16 }
  0x9a   : > { %453 = vrot.lane.b32.xlu0 %v5616_v16, %s5295_s18  ;;  %576 = vrot.lane.b32.xlu1 %v5535_v2, %s5296_s16 }
  0x9e   : > { %451 = vrot.lane.b32.xlu0 %v5623_v17, %s5295_s18  ;;  %574 = vrot.lane.b32.xlu1 %v5595_v13, %s5296_s16 }
  0xa2   : > { %433 = vrot.lane.b32.xlu0 %v5549_v4, %s5295_s18  ;;  %604 = vrot.lane.b32.xlu1 %v5602_v14, %s5296_s16 }
  0xa6   : > { %602 = vrot.lane.b32.xlu0 %v5616_v16, %s5296_s16  ;;  %584 = vrot.lane.b32.xlu1 %v5568_v8, %s5296_s16 }
  0xaa   : > { %441 = vrot.lane.b32.xlu0 %v5575_v9, %s5295_s18  ;;  %592 = vrot.lane.b32.xlu1 %v5592_v12, %s5296_s16 }
  0xae   : > { %449 = vrot.lane.b32.xlu0 %v5609_v15, %s5295_s18  ;;  %600 = vrot.lane.b32.xlu1 %v5623_v17, %s5296_s16  ;;  %s7121_s18 = scalar_lea.hbm %s7174_s9, %s4323_s22 }
  0xb2   : > { %727 = vperm.xlu0 %5130, %v723_v18   ;;  %732 = vperm.xlu1 %5131, %v724_v19   ;;  %v5729_v18 = vld [vmem:[%s7168_s3 + $0x8] sm:$0xff] }
  0xe4   : > { %v430_v31 = vpop.permute.xlu0 %429  ;;  %v5664_v32 = vpop.permute.xlu1 %427 }
  0xe5   : > { %v473_v34 = vsel %vm459_vm0, %v5664_v32, %v430_v31 }
  0xe6   : > { %v560_v40 = vmul.f32 %v489_v33, %v473_v34  ;;  %v5754_v34 = vsub.s32 1, %v5653_v23 }
  0xe8   : > { %v5675_v37 = vpop.permute.xlu0 %431  ;;  %v581_v38 = vpop.permute.xlu1 %580  ;;  %v4613_v48 = vpack.c.bf16 %v5532_v1, %v560_v40 }
  0xe9   : > { %v472_v39 = vsel %vm459_vm0, %v430_v31, %v5675_v37 }
  0xea   : > { %v561_v41 = vmul.f32 %v493_v35, %v472_v39 }
  0xec   : > { %v5686_v44 = vpop.permute.xlu0 %582  ;;  %v5688_v45 = vpop.permute.xlu1 %578  ;;  %v4611_v46 = vpack.c.bf16 %v5542_v3, %v561_v41 }
  0xed   : > { %v618_v47 = vsel %vm606_vm1, %v581_v38, %v5686_v44  ;;  %v619_v50 = vsel %vm606_vm1, %v5688_v45, %v581_v38 }
  0xee   : > { %4612 = vmatprep.subr.bf16.mxu1 %v4611_v46  ;;  %v708_v51 = vmul.f32 %v640_v42, %v618_v47  ;;  %v707_v57 = vmul.f32 %v636_v49, %v619_v50  ;;  %v485_v46 = vrot.slane %v5655_v26, %v5754_v34  ;;  %v5766_v47 = vsub.s32 0, %v5653_v23  ;;  %v407_v49 = vld [vmem:[#allocation6 + $0x41] ss:$8 sm:$0xf0] }
  0xef   : > { %4614 = vmatpush1.bf16.msra.mxu1 %v4613_v48  ;;  %v406_v48 = vld [vmem:[#allocation6 + $0x41] ss:$8 sm:$0xf] }
  0xf0   : > { %v438_v54 = vpop.permute.xlu0 %437  ;;  %823 = vmatprep.subr.mxu1 %v708_v51  ;;  %v5705_v55 = vpop.permute.xlu1 %439 }
  0xf1   : > { %v468_v56 = vsel %vm459_vm0, %v438_v54, %v5705_v55 }
  0xf2   : > { %v565_v59 = vmul.f32 %v509_v52, %v468_v56 }
  0xf3   : > { %824 = vmatpush1.msra.mxu1 %v707_v57 }
  0xf4   : > { %v5717_v63 = vpop.permute.xlu0 %435  ;;  %v589_v0 = vpop.permute.xlu1 %588  ;;  %v4619_v1 = vpack.c.bf16 %v5560_v7, %v565_v59  ;;  %4269 = vmatmul.mubr.msk.f32.vlgmr.msra.gmra.mrb[0].mxu1 %vm735_vm2, %v5713_v58  ;;  %v5733_v7 = vor.u32 %v399_v62, %v398_v61  ;;  %v481_v61 = vrot.slane %v5655_v26, %v5766_v47 }
  0xf5   : > { %v469_v3 = vsel %vm459_vm0, %v5717_v63, %v438_v54  ;;  %889 = vmatprep.mubr.f32.mxu1 %v7178_v5 }
  0xf6   : > { %v564_v19 = vmul.f32 %v505_v60, %v469_v3  ;;  %4620 = vmatprep.subr.bf16.mxu1 %v4619_v1  ;;  %v525_v33 = vrot.slane %v5733_v7, %v5662_v28  ;;  %v521_v42 = vrot.slane %v5733_v7, %v5658_v27  ;;  %v5780_v60 = vor.u32 %v407_v49, %v406_v48 }
  0xf7   : > { %v537_v49 = vrot.slane %v5733_v7, %v5703_v53 }
  0xf8   : > { %v4621_v21 = vpack.c.bf16 %v5557_v6, %v564_v19  ;;  %v5736_v24 = vpop.permute.xlu0 %590  ;;  %v5740_v29 = vpop.permute.xlu1 %586  ;;  %4270 = vmatmul.mubr.msk.f32.gmra.mrb[2].mxu1 %vm735_vm2, %v5729_v18  ;;  %v668_v3 = vrot.slane %v5780_v60, %v5658_v27 }
  0xf9   : > { %v614_v30 = vsel %vm606_vm1, %v589_v0, %v5736_v24  ;;  %v615_v31 = vsel %vm606_vm1, %v5740_v29, %v589_v0  ;;  %1037 = vmatprep.mubr.f32.mxu1 %v7178_v5 }
  0xfa   : > { %4622 = vmatpush1.bf16.msra.mxu1 %v4621_v21  ;;  %v712_v6 = vmul.f32 %v656_v20, %v614_v30  ;;  %v711_v35 = vmul.f32 %v652_v25, %v615_v31  ;;  %v672_v20 = vrot.slane %v5780_v60, %v5662_v28 }
  0xfc   : > { %v446_v38 = vpop.permute.xlu0 %445  ;;  %977 = vmatprep.subr.mxu1 %v712_v6  ;;  %v5756_v39 = vpop.permute.xlu1 %447  ;;  %v541_v6 = vrot.slane %v5733_v7, %v5684_v43 }
  0xfd   : > { %v464_v40 = vsel %vm459_vm0, %v446_v38, %v5756_v39 }
  0xfe   : > { %v569_v41 = vmul.f32 %v525_v33, %v464_v40  ;;  %978 = vmatpush1.msra.mxu1 %v711_v35  ;;  %v632_v35 = vrot.slane %v5673_v36, %v5754_v34 }
  0xff   : > { %4273 = vmatmul.mubr.msk.f32.vlgmr.msra.gmra.mrb[4].mxu1 %vm735_vm2, %v5713_v58 }
 0x100   : > { %v5770_v50 = vpop.permute.xlu0 %443  ;;  %v426_v51 = vpop.permute.xlu1 %425  ;;  %v4627_v52 = vpack.c.bf16 %v5585_v11, %v569_v41  ;;  %1043 = vmatprep.mubr.f32.mxu1 %v7178_v5 }
 0x101   : > { %v465_v54 = vsel %vm459_vm0, %v5770_v50, %v446_v38  ;;  %v474_v56 = vsel %vm459_vm0, %v426_v51, %v5664_v32 }
 0x102   : > { %v568_v57 = vmul.f32 %v521_v42, %v465_v54  ;;  %4628 = vmatprep.subr.bf16.mxu1 %v4627_v52  ;;  %v559_v59 = vmul.f32 %v485_v46, %v474_v56  ;;  %v5816_v42 = vsub.s32 4, %v5653_v23  ;;  %v5819_v46 = vsub.s32 5, %v5653_v23 }
 0x103   : > { %4274 = vmatmul.mubr.msk.f32.gmra.mrb[6].mxu1 %vm735_vm2, %v5729_v18  ;;  %v628_v52 = vrot.slane %v5673_v36, %v5766_v47 }
 0x104   : > { %v4629_v11 = vpack.c.bf16 %v5582_v10, %v568_v57  ;;  %v456_v62 = vpop.permute.xlu0 %455  ;;  %v597_v0 = vpop.permute.xlu1 %596  ;;  %v4607_v1 = vpack.c.bf16 %v5535_v2, %v559_v59  ;;  %1191 = vmatprep.mubr.f32.mxu1 %v7178_v5  ;;  %v497_v59 = vrot.slane %v5655_v26, %v5816_v42 }
 0x105   : > { %v475_v32 = vsel %vm459_vm0, %v456_v62, %v426_v51 }
 0x106   : > { %4608 = vmatprep.subr.bf16.mxu0 %v4607_v1  ;;  %4630 = vmatpush1.bf16.msra.mxu1 %v4629_v11  ;;  %v558_v19 = vmul.f32 %v481_v61, %v475_v32  ;;  %v501_v61 = vrot.slane %v5655_v26, %v5819_v46 }
 0x108   : > { %v5795_v21 = vpop.permute.xlu0 %598  ;;  %v5797_v10 = vpop.permute.xlu1 %594  ;;  %v4609_v2 = vpack.c.bf16 %v5595_v13, %v558_v19 }
 0x109   : > { %v610_v25 = vsel %vm606_vm1, %v597_v0, %v5795_v21  ;;  %v611_v30 = vsel %vm606_vm1, %v5797_v10, %v597_v0 }
 0x10a   : > { %v715_v31 = vmul.f32 %v668_v3, %v611_v30  ;;  %4610 = vmatpush1.bf16.msra.mxu0 %v4609_v2  ;;  %v716_v33 = vmul.f32 %v672_v20, %v610_v25  ;;  %v684_v3 = vrot.slane %v5780_v60, %v5703_v53 }
 0x10c   : > { %v454_v38 = vpop.permute.xlu0 %453  ;;  %1131 = vmatprep.subr.mxu1 %v716_v33  ;;  %v577_v13 = vpop.permute.xlu1 %576 }
 0x10d   : > { %v460_v40 = vsel %vm459_vm0, %v454_v38, %v456_v62  ;;  %v620_v41 = vsel %vm606_vm1, %v577_v13, %v5688_v45  ;;  %1132 = vmatpush1.msra.mxu1 %v715_v31 }
 0x10e   : > { %v573_v48 = vmul.f32 %v541_v6, %v460_v40  ;;  %v706_v51 = vmul.f32 %v632_v35, %v620_v41  ;;  %4277 = vmatmul.mubr.msk.f32.vlgmr.msra.gmra.mrb[8].mxu1 %vm735_vm2, %v5713_v58 }
 0x10f   : > { %1197 = vmatprep.mubr.f32.mxu1 %v7178_v5 }
 0x110   : > { %v5828_v45 = vpop.permute.xlu0 %451  ;;  %746 = vmatprep.subr.mxu0 %v706_v51  ;;  %v575_v54 = vpop.permute.xlu1 %574  ;;  %v4635_v23 = vpack.c.bf16 %v5602_v14, %v573_v48  ;;  %v688_v14 = vrot.slane %v5780_v60, %v5684_v43 }
 0x111   : > { %v461_v56 = vsel %vm459_vm0, %v5828_v45, %v454_v38  ;;  %v621_v57 = vsel %vm606_vm1, %v575_v54, %v577_v13  ;;  %v517_v13 = vrot.slane %v5733_v7, %v5754_v34 }
 0x112   : > { %v572_v11 = vmul.f32 %v537_v49, %v461_v56  ;;  %4636 = vmatprep.subr.bf16.mxu1 %v4635_v23  ;;  %v705_v62 = vmul.f32 %v628_v52, %v621_v57  ;;  %4278 = vmatmul.mubr.msk.f32.gmra.mrb[10].mxu1 %vm735_vm2, %v5729_v18  ;;  %v664_v23 = vrot.slane %v5780_v60, %v5754_v34 }
 0x113   : > { %1345 = vmatprep.mubr.f32.mxu1 %v7178_v5 }
 0x114   : > { %v4637_v0 = vpack.c.bf16 %v5616_v16, %v572_v11  ;;  %v434_v1 = vpop.permute.xlu0 %433  ;;  %747 = vmatpush1.msra.mxu0 %v705_v62  ;;  %v605_v32 = vpop.permute.xlu1 %604  ;;  %v648_v16 = vrot.slane %v5673_v36, %v5819_v46 }
 0x115   : > { %v470_v26 = vsel %vm459_vm0, %v434_v1, %v5717_v63  ;;  %v471_v19 = vsel %vm459_vm0, %v5675_v37, %v434_v1  ;;  %v622_v20 = vsel %vm606_vm1, %v605_v32, %v575_v54  ;;  %4267 = vmatmul.mubr.msk.f32.vlgmr.msra.gmra.mrb[0].mxu0 %vm735_vm2, %v5713_v58  ;;  %v644_v37 = vrot.slane %v5673_v36, %v5816_v42 }
 0x116   : > { %v562_v2 = vmul.f32 %v497_v59, %v471_v19  ;;  %v563_v25 = vmul.f32 %v501_v61, %v470_v26  ;;  %4638 = vmatpush1.bf16.msra.mxu1 %v4637_v0  ;;  %812 = vmatprep.mubr.f32.mxu0 %v7178_v5  ;;  %v720_v30 = vmul.f32 %v688_v14, %v622_v20 }
 0x117   : > { %v533_v54 = vrot.slane %v5733_v7, %v5819_v46  ;;  %v660_v61 = vrot.slane %v5780_v60, %v5766_v47 }
 0x118   : > { %v4617_v63 = vpack.c.bf16 %v5549_v4, %v562_v2  ;;  %v603_v31 = vpop.permute.xlu0 %602  ;;  %1285 = vmatprep.subr.mxu1 %v720_v30  ;;  %v585_v6 = vpop.permute.xlu1 %584  ;;  %v4615_v33 = vpack.c.bf16 %v5568_v8, %v563_v25  ;;  %v513_v4 = vrot.slane %v5733_v7, %v5766_v47 }
 0x119   : > { %v607_v35 = vsel %vm606_vm1, %v603_v31, %v605_v32  ;;  %v616_v38 = vsel %vm606_vm1, %v585_v6, %v5740_v29  ;;  %4268 = vmatmul.mubr.msk.f32.gmra.mrb[2].mxu0 %vm735_vm2, %v5729_v18  ;;  %v617_v8 = vsel %vm606_vm1, %v5686_v44, %v585_v6 }
 0x11a   : > { %v719_v36 = vmul.f32 %v684_v3, %v607_v35  ;;  %4616 = vmatprep.subr.bf16.mxu0 %v4615_v33  ;;  %v710_v40 = vmul.f32 %v648_v16, %v616_v38  ;;  %960 = vmatprep.mubr.f32.mxu0 %v7178_v5  ;;  %v709_v48 = vmul.f32 %v644_v37, %v617_v8 }
 0x11b   : > { %4618 = vmatpush1.bf16.msra.mxu0 %v4617_v63  ;;  %v676_v3 = vrot.slane %v5780_v60, %v5816_v42 }
 0x11c   : > { %v442_v29 = vpop.permute.xlu0 %441  ;;  %900 = vmatprep.subr.mxu0 %v710_v40  ;;  %1286 = vmatpush1.msra.mxu1 %v719_v36  ;;  %v593_v41 = vpop.permute.xlu1 %592 }
 0x11d   : > { %v466_v49 = vsel %vm459_vm0, %v442_v29, %v5770_v50  ;;  %v467_v51 = vsel %vm459_vm0, %v5705_v55, %v442_v29  ;;  %4281 = vmatmul.mubr.msk.f32.vlgmr.msra.gmra.mrb[12].mxu1 %vm735_vm2, %v5713_v58  ;;  %v612_v50 = vsel %vm606_vm1, %v593_v41, %v5797_v10  ;;  %v529_v55 = vrot.slane %v5733_v7, %v5816_v42 }
 0x11e   : > { %v566_v44 = vmul.f32 %v513_v4, %v467_v51  ;;  %v567_v52 = vmul.f32 %v517_v13, %v466_v49  ;;  %1351 = vmatprep.mubr.f32.mxu1 %v7178_v5 }
 0x11f   : > { %901 = vmatpush1.msra.mxu0 %v709_v48 }
 0x120   : > { %v4625_v56 = vpack.c.bf16 %v5575_v9, %v566_v44  ;;  %v450_v57 = vpop.permute.xlu0 %449  ;;  %4271 = vmatmul.mubr.msk.f32.vlgmr.msra.gmra.mrb[4].mxu0 %vm735_vm2, %v5713_v58  ;;  %v4623_v59 = vpack.c.bf16 %v5592_v12, %v567_v52  ;;  %v680_v9 = vrot.slane %v5780_v60, %v5819_v46  ;;  %v613_v12 = vsel %vm606_vm1, %v5736_v24, %v593_v41  ;;  %v601_v62 = vpop.permute.xlu1 %600 }
 0x121   : > { %v462_v11 = vsel %vm459_vm0, %v450_v57, %v5828_v45  ;;  %v463_v10 = vsel %vm459_vm0, %v5756_v39, %v450_v57  ;;  %4282 = vmatmul.mubr.msk.f32.gmra.mrb[14].mxu1 %vm735_vm2, %v5729_v18  ;;  %966 = vmatprep.mubr.f32.mxu0 %v7178_v5  ;;  %v714_v45 = vmul.f32 %v664_v23, %v612_v50 }
 0x122   : > { %v571_v7 = vmul.f32 %v533_v54, %v462_v11  ;;  %4624 = vmatprep.subr.bf16.mxu0 %v4623_v59  ;;  %v570_v14 = vmul.f32 %v529_v55, %v463_v10  ;;  %v608_v39 = vsel %vm606_vm1, %v601_v62, %v603_v31  ;;  %2134 = vmatprep.mubr.f32.mxu1 %v7178_v5 }
 0x123   : > { %4626 = vmatpush1.bf16.msra.mxu0 %v4625_v56  ;;  %v713_v24 = vmul.f32 %v660_v61, %v613_v12  ;;  %v718_v1 = vmul.f32 %v680_v9, %v608_v39  ;;  %v609_v26 = vsel %vm606_vm1, %v5795_v21, %v601_v62 }
 0x124   : > { %4272 = vmatmul.mubr.msk.f32.gmra.mrb[6].mxu0 %vm735_vm2, %v5729_v18  ;;  %1054 = vmatprep.subr.mxu0 %v714_v45  ;;  %v4631_v0 = vpack.c.bf16 %v5623_v17, %v571_v7  ;;  %v4633_v32 = vpack.c.bf16 %v5609_v15, %v570_v14  ;;  %v717_v17 = vmul.f32 %v676_v3, %v609_v26 }
 0x125   : > { %1114 = vmatprep.mubr.f32.mxu0 %v7178_v5 }
 0x127   : > { %1055 = vmatpush1.msra.mxu0 %v713_v24 }
 0x128   : > { %4275 = vmatmul.mubr.msk.f32.vlgmr.msra.gmra.mrb[8].mxu0 %vm735_vm2, %v5713_v58  ;;  %4632 = vmatprep.subr.bf16.mxu0 %v4631_v0 }
 0x129   : > { %4634 = vmatpush1.bf16.msra.mxu0 %v4633_v32  ;;  %1120 = vmatprep.mubr.f32.mxu0 %v7178_v5 }
 0x12a   : > { %1208 = vmatprep.subr.mxu0 %v718_v1 }
 0x12c   : > { %4276 = vmatmul.mubr.msk.f32.gmra.mrb[10].mxu0 %vm735_vm2, %v5729_v18 }
 0x12d   : > { %1209 = vmatpush1.msra.mxu0 %v717_v17  ;;  %1268 = vmatprep.mubr.f32.mxu0 %v7178_v5 }
 0x130   : > { %4279 = vmatmul.mubr.msk.f32.vlgmr.msra.gmra.mrb[12].mxu0 %vm735_vm2, %v5713_v58 }
 0x131   : > { %1274 = vmatprep.mubr.f32.mxu0 %v7178_v5  ;;  %v5953_v31 = vpop.permute.xlu0 %727  ;;  %v5963_v38 = vpop.permute.xlu1 %732 }
 0x134   : > { %4280 = vmatmul.mubr.msk.f32.gmra.mrb[14].mxu0 %vm735_vm2, %v5729_v18 }
 0x135   : > { %2045 = vmatprep.mubr.f32.mxu0 %v7178_v5 }
 0x1c7   : > { %v885_v15 = vpop.f32.mrb[0].mxu1 }
 0x1c8   : > { %v887_v60 = vpop.f32.mrb[1].mxu1  ;;  %v5961_v35 = vadd.f32 %v885_v15, %v5953_v31 }
 0x1c9   : > { %v5994_v50 = vadd.f32 %v887_v60, %v5953_v31 }
 0x1ca   : > { %v1360_v8 = vmax.f32 %v5961_v35, 0.0 }
 0x1cb   : > { %v891_v21 = vpop.f32.mrb[2].mxu1  ;;  %v1361_v10 = vmax.f32 %v5994_v50, 0.0 }
 0x1cc   : > { %v893_v19 = vpop.f32.mrb[3].mxu1  ;;  %v5978_v48 = vadd.f32 %v891_v21, %v5963_v38 }
 0x1cd   : > { %v6010_v9 = vadd.f32 %v893_v19, %v5963_v38 }
 0x1ce   : > { %v1376_v23 = vmax.f32 %v5978_v48, 0.0 }
 0x1cf   : > { %v1377_v14 = vmax.f32 %v6010_v9, 0.0 }
 0x1d2   : > { %v1039_v20 = vpop.f32.mrb[4].mxu1 }
 0x1d3   : > { %v5943_v16 = vpop.f32.mrb[5].mxu1  ;;  %v6024_v39 = vadd.f32 %v1039_v20, %v5953_v31 }
 0x1d5   : > { %v7194_v3 = vmax.f32 %v6024_v39, 0.0 }
 0x1d6   : > { %v1045_v2 = vpop.f32.mrb[6].mxu1 }
 0x1d7   : > { %v5945_v25 = vpop.f32.mrb[7].mxu1  ;;  %v6038_v26 = vadd.f32 %v1045_v2, %v5963_v38 }
 0x1d9   : > { %v7191_v20 = vmax.f32 %v6038_v26, 0.0 }
 0x1e1   : > { %v5947_v30 = vpop.f32.mrb[8].mxu1 }
 0x1e2   : > { %v5949_v58 = vpop.f32.mrb[9].mxu1 }
 0x1e5   : > { %v5951_v63 = vpop.f32.mrb[10].mxu1 }
 0x1e6   : > { %v5955_v18 = vpop.f32.mrb[11].mxu1 }
 0x1e8   : > { %v808_v37 = vpop.f32.mrb[0].mxu0 }
 0x1e9   : > { %v5958_v6 = vadd.f32 %v808_v37, %v5953_v31  ;;  %v810_v33 = vpop.f32.mrb[1].mxu0 }
 0x1ea   : > { %v5974_v29 = vadd.f32 %v810_v33, %v5953_v31 }
 0x1eb   : > { %v1358_v4 = vmax.f32 %v5958_v6, 0.0 }
 0x1ec   : > { %v814_v13 = vpop.f32.mrb[2].mxu0  ;;  %v1359_v44 = vmax.f32 %v5974_v29, 0.0 }
 0x1ed   : > { %v816_v36 = vpop.f32.mrb[3].mxu0  ;;  %1390 = vrot.lane.b32.xlu1 %v1358_v4, %s5296_s16  ;;  %v5971_v40 = vadd.f32 %v814_v13, %v5963_v38 }
 0x1ee   : > { %v5990_v52 = vadd.f32 %v816_v36, %v5963_v38 }
 0x1ef   : > { %v1374_v41 = vmax.f32 %v5971_v40, 0.0 }
 0x1f0   : > { %v5980_v49 = vpop.f32.mrb[12].mxu1  ;;  %v1375_v59 = vmax.f32 %v5990_v52, 0.0 }
 0x1f1   : > { %1398 = vrot.lane.b32.xlu1 %v1360_v8, %s5296_s16  ;;  %v1349_v51 = vpop.f32.mrb[13].mxu1  ;;  %1392 = vrot.lane.b32.xlu0 %v1374_v41, %s5296_s16 }
 0x1f2   : > { %v6047_v15 = vadd.f32 %v1349_v51, %v5953_v31  ;;  %v6069_v51 = vadd.f32 %v5943_v16, %v5953_v31  ;;  %v6086_v16 = vadd.f32 %v5945_v25, %v5963_v38  ;;  %v6110_v25 = vadd.f32 %v5947_v30, %v5953_v31 }
 0x1f3   : > { %v962_v54 = vpop.f32.mrb[4].mxu0  ;;  %v6126_v30 = vadd.f32 %v5949_v58, %v5953_v31 }
 0x1f4   : > { %v964_v55 = vpop.f32.mrb[5].mxu0  ;;  %v5996_v56 = vpop.f32.mrb[14].mxu1  ;;  %v6006_v61 = vadd.f32 %v962_v54, %v5953_v31  ;;  %v7180_v37 = vmax.f32 %v6047_v15, 0.0 }
 0x1f5   : > { %1394 = vrot.lane.b32.xlu1 %v1359_v44, %s5296_s16  ;;  %v1355_v57 = vpop.f32.mrb[15].mxu1  ;;  %1400 = vrot.lane.b32.xlu0 %v1376_v23, %s5296_s16  ;;  %v6033_v24 = vadd.f32 %v964_v55, %v5953_v31 }
 0x1f6   : > { %v7199_v7 = vmax.f32 %v6006_v61, 0.0  ;;  %v6064_v33 = vadd.f32 %v1355_v57, %v5963_v38 }
 0x1f7   : > { %v968_v11 = vpop.f32.mrb[6].mxu0  ;;  %v7198_v60 = vmax.f32 %v6033_v24, 0.0 }
 0x1f8   : > { %v970_v12 = vpop.f32.mrb[7].mxu0  ;;  %v6020_v62 = vadd.f32 %v968_v11, %v5963_v38  ;;  %v7181_v55 = vmax.f32 %v6064_v33, 0.0  ;;  %v7186_v11 = vmax.f32 %v6069_v51, 0.0 }
 0x1f9   : > { %1402 = vrot.lane.b32.xlu1 %v1361_v10, %s5296_s16  ;;  %1396 = vrot.lane.b32.xlu0 %v1375_v59, %s5296_s16  ;;  %v6051_v21 = vadd.f32 %v970_v12, %v5963_v38 }
 0x1fa   : > { %v7197_v1 = vmax.f32 %v6020_v62, 0.0 }
 0x1fb   : > { %v1116_v45 = vpop.f32.mrb[8].mxu0  ;;  %v7195_v13 = vmax.f32 %v6051_v21, 0.0 }
 0x1fc   : > { %v1118_v0 = vpop.f32.mrb[9].mxu0  ;;  %v6081_v57 = vadd.f32 %v1116_v45, %v5953_v31 }
 0x1fd   : > { %1406 = vrot.lane.b32.xlu1 %v7199_v7, %s5296_s16  ;;  %1404 = vrot.lane.b32.xlu0 %v1377_v14, %s5296_s16  ;;  %v6096_v5 = vadd.f32 %v1118_v0, %v5953_v31  ;;  %v7233_v7 = vmax.f32 %v6051_v21, 0.0 }
 0x1fe   : > { %v7182_v12 = vmax.f32 %v6081_v57, 0.0 }
 0x1ff   : > { %v1122_v32 = vpop.f32.mrb[10].mxu0  ;;  %v7184_v0 = vmax.f32 %v6096_v5, 0.0 }
 0x200   : > { %v1124_v17 = vpop.f32.mrb[11].mxu0  ;;  %v6099_v45 = vadd.f32 %v1122_v32, %v5963_v38 }
 0x201   : > { %1414 = vrot.lane.b32.xlu1 %v7194_v3, %s5296_s16  ;;  %1408 = vrot.lane.b32.xlu0 %v7197_v1, %s5296_s16  ;;  %v6115_v32 = vadd.f32 %v1124_v17, %v5963_v38  ;;  %v6131_v17 = vadd.f32 %v5951_v63, %v5963_v38 }
 0x203   : > { %v1270_v19 = vpop.f32.mrb[12].mxu0  ;;  %v7189_v58 = vmax.f32 %v6131_v17, 0.0 }
 0x204   : > { %v6054_v2 = vpop.f32.mrb[13].mxu0 }
 0x205   : > { %1410 = vrot.lane.b32.xlu1 %v7198_v60, %s5296_s16  ;;  %1416 = vrot.lane.b32.xlu0 %v7191_v20, %s5296_s16 }
 0x207   : > { %v1276_v36 = vpop.f32.mrb[14].mxu0 }
 0x208   : > { %v6071_v54 = vpop.f32.mrb[15].mxu0 }
 0x209   : > { %1450 = vrot.lane.b32.xlu1 %v7180_v37, %s5296_s16  ;;  %1412 = vrot.lane.b32.xlu0 %v7195_v13, %s5296_s16  ;;  %v7183_v37 = vmax.f32 %v6086_v16, 0.0 }
 0x20d   : > { %1418 = vrot.lane.b32.xlu1 %v7186_v11, %s5296_s16  ;;  %1452 = vrot.lane.b32.xlu0 %v7181_v55, %s5296_s16  ;;  %v7185_v55 = vmax.f32 %v6099_v45, 0.0  ;;  %v6146_v11 = vadd.f32 %v5955_v18, %v5963_v38 }
 0x211   : > { %1422 = vrot.lane.b32.xlu1 %v7182_v12, %s5296_s16  ;;  %1420 = vrot.lane.b32.xlu0 %v7183_v37, %s5296_s16  ;;  %v7187_v12 = vmax.f32 %v6110_v25, 0.0  ;;  %v7190_v37 = vmax.f32 %v6115_v32, 0.0 }
 0x215   : > { %1426 = vrot.lane.b32.xlu1 %v7184_v0, %s5296_s16  ;;  %1424 = vrot.lane.b32.xlu0 %v7185_v55, %s5296_s16  ;;  %v7188_v0 = vmax.f32 %v6126_v30, 0.0  ;;  %v6141_v55 = vadd.f32 %v1270_v19, %v5953_v31  ;;  %v7193_v19 = vmax.f32 %v6146_v11, 0.0 }
 0x217   : > { %v7192_v63 = vmax.f32 %v6141_v55, 0.0 }
 0x219   : > { %1430 = vrot.lane.b32.xlu1 %v7187_v12, %s5296_s16  ;;  %1428 = vrot.lane.b32.xlu0 %v7190_v37, %s5296_s16  ;;  %v6156_v12 = vadd.f32 %v1276_v36, %v5963_v38 }
 0x21b   : > { %v7196_v18 = vmax.f32 %v6156_v12, 0.0 }
 0x21d   : > { %1434 = vrot.lane.b32.xlu1 %v7188_v0, %s5296_s16  ;;  %1432 = vrot.lane.b32.xlu0 %v7189_v58, %s5296_s16 }
 0x221   : > { %1438 = vrot.lane.b32.xlu1 %v7192_v63, %s5296_s16  ;;  %1436 = vrot.lane.b32.xlu0 %v7193_v19, %s5296_s16 }
 0x225   : > { %1440 = vrot.lane.b32.xlu0 %v7196_v18, %s5296_s16 }
 0x25f   : > { %v6169_v0 = vpop.permute.xlu1 %1390 }
 0x263   : > { %v6171_v36 = vpop.permute.xlu0 %1392  ;;  %v1399_v58 = vpop.permute.xlu1 %1398 }
 0x267   : > { %v1401_v37 = vpop.permute.xlu0 %1400  ;;  %v1395_v20 = vpop.permute.xlu1 %1394 }
 0x268   : > { %v1482_v63 = vsel %vm606_vm1, %v6169_v0, %v1395_v20  ;;  %v1480_v3 = vsel %vm606_vm1, %v1395_v20, %v1399_v58 }
 0x269   : > { %v6178_v19 = vmax.f32 %v1358_v4, %v1482_v63  ;;  %v6191_v6 = vmax.f32 %v1359_v44, %v1480_v3 }
 0x26b   : > { %v1397_v13 = vpop.permute.xlu0 %1396  ;;  %1518 = vrot.lane.b32.xlu1 %v6178_v19, %s5299_s10  ;;  %v1403_v18 = vpop.permute.xlu1 %1402 }
 0x26c   : > { %v1481_v1 = vsel %vm606_vm1, %v1397_v13, %v1401_v37  ;;  %v1483_v60 = vsel %vm606_vm1, %v6171_v36, %v1397_v13  ;;  %v1478_v63 = vsel %vm606_vm1, %v1399_v58, %v1403_v18 }
 0x26d   : > { %v6195_v4 = vmax.f32 %v1374_v41, %v1483_v60  ;;  %v6199_v20 = vmax.f32 %v1375_v59, %v1481_v1  ;;  %v6215_v52 = vmax.f32 %v1360_v8, %v1478_v63 }
 0x26f   : > { %1520 = vrot.lane.b32.xlu0 %v6195_v4, %s5299_s10  ;;  %v1405_v29 = vpop.permute.xlu0 %1404  ;;  %1522 = vrot.lane.b32.xlu1 %v6191_v6, %s5299_s10  ;;  %v1407_v40 = vpop.permute.xlu1 %1406 }
 0x270   : > { %v1479_v44 = vsel %vm606_vm1, %v1401_v37, %v1405_v29  ;;  %v1476_v1 = vsel %vm606_vm1, %v1403_v18, %v1407_v40 }
 0x271   : > { %v6219_v59 = vmax.f32 %v1376_v23, %v1479_v44  ;;  %v6233_v48 = vmax.f32 %v1361_v10, %v1476_v1 }
 0x273   : > { %1524 = vrot.lane.b32.xlu0 %v6199_v20, %s5299_s10  ;;  %v1409_v60 = vpop.permute.xlu0 %1408  ;;  %1526 = vrot.lane.b32.xlu1 %v6215_v52, %s5299_s10  ;;  %v1415_v35 = vpop.permute.xlu1 %1414 }
 0x274   : > { %v1477_v8 = vsel %vm606_vm1, %v1405_v29, %v1409_v60  ;;  %v7230_v29 = vmax.f32 %v6006_v61, 0.0 }
 0x275   : > { %v6237_v23 = vmax.f32 %v1377_v14, %v1477_v8  ;;  %v7232_v8 = vmax.f32 %v6020_v62, 0.0 }
 0x277   : > { %1528 = vrot.lane.b32.xlu0 %v6219_v59, %s5299_s10  ;;  %v1417_v37 = vpop.permute.xlu0 %1416  ;;  %1733 = vrot.lane.b32.xlu1 %v6191_v6, %s5300_s23  ;;  %v1411_v13 = vpop.permute.xlu1 %1410 }
 0x278   : > { %v1472_v50 = vsel %vm606_vm1, %v1411_v13, %v1415_v35  ;;  %v1474_v10 = vsel %vm606_vm1, %v1407_v40, %v1411_v13  ;;  %v7231_v40 = vmax.f32 %v6033_v24, 0.0 }
 0x279   : > { %v6261_v44 = vmax.f32 %v7230_v29, %v1474_v10  ;;  %v7234_v10 = vmax.f32 %v6024_v39, 0.0 }
 0x27a   : > { %v6265_v1 = vmax.f32 %v7231_v40, %v1472_v50 }
 0x27b   : > { %1735 = vrot.lane.b32.xlu0 %v6199_v20, %s5300_s23  ;;  %v1413_v9 = vpop.permute.xlu0 %1412  ;;  %1737 = vrot.lane.b32.xlu1 %v6215_v52, %s5300_s23  ;;  %v6253_v14 = vpop.permute.xlu1 %1450 }
 0x27c   : > { %v1473_v18 = vsel %vm606_vm1, %v1413_v9, %v1417_v37  ;;  %v1475_v63 = vsel %vm606_vm1, %v1409_v60, %v1413_v9 }
 0x27d   : > { %v6269_v13 = vmax.f32 %v7232_v8, %v1475_v63  ;;  %v6273_v41 = vmax.f32 %v7233_v7, %v1473_v18  ;;  %v7236_v18 = vmax.f32 %v6038_v26, 0.0  ;;  %v7238_v8 = vmax.f32 %v6047_v15, 0.0 }
 0x27f   : > { %1739 = vrot.lane.b32.xlu0 %v6219_v59, %s5300_s23  ;;  %v6279_v61 = vpop.permute.xlu0 %1452  ;;  %1729 = vrot.lane.b32.xlu1 %v6178_v19, %s5300_s23  ;;  %v1419_v24 = vpop.permute.xlu1 %1418 }
 0x280   : > { %v1470_v21 = vsel %vm606_vm1, %v1415_v35, %v1419_v24  ;;  %v1484_v35 = vsel %vm606_vm1, %v6253_v14, %v6169_v0 }
 0x281   : > { %v6295_v9 = vmax.f32 %v7234_v10, %v1470_v21  ;;  %v6317_v0 = vmax.f32 %v7238_v8, %v1484_v35 }
 0x283   : > { %1731 = vrot.lane.b32.xlu0 %v6195_v4, %s5300_s23  ;;  %v1421_v7 = vpop.permute.xlu0 %1420  ;;  %1530 = vrot.lane.b32.xlu1 %v6233_v48, %s5299_s10  ;;  %v1423_v60 = vpop.permute.xlu1 %1422  ;;  %7235 = vst [vmem:[#allocation13_spill] sm:$0xff] %v6295_v9  ;;  %7239 = vst [vmem:[#allocation15_spill] sm:$0xff] %v6317_v0 }
 0x284   : > { %v1471_v50 = vsel %vm606_vm1, %v1417_v37, %v1421_v7  ;;  %v1468_v29 = vsel %vm606_vm1, %v1419_v24, %v1423_v60  ;;  %v7240_v24 = vmax.f32 %v6069_v51, 0.0 }
 0x285   : > { %v6299_v63 = vmax.f32 %v7236_v18, %v1471_v50  ;;  %v7242_v50 = vmax.f32 %v6086_v16, 0.0  ;;  %v1485_v18 = vsel %vm606_vm1, %v6279_v61, %v6171_v36  ;;  %v6343_v36 = vadd.f32 %v6054_v2, %v5953_v31 }
 0x286   : > { %v6321_v21 = vmax.f32 %v7240_v24, %v1468_v29  ;;  %v7247_v24 = vmax.f32 %v6099_v45, 0.0 }
 0x287   : > { %7237 = vst [vmem:[#allocation14_spill] sm:$0xff] %v6299_v63  ;;  %1532 = vrot.lane.b32.xlu0 %v6237_v23, %s5299_s10  ;;  %v1425_v39 = vpop.permute.xlu0 %1424  ;;  %1741 = vrot.lane.b32.xlu1 %v6233_v48, %s5300_s23  ;;  %v1427_v26 = vpop.permute.xlu1 %1426  ;;  %v7203_v45 = vmax.f32 %v6343_v36, 0.0 }
 0x288   : > { %v1469_v37 = vsel %vm606_vm1, %v1421_v7, %v1425_v39  ;;  %7241 = vst [vmem:[#allocation16_spill] sm:$0xff] %v6321_v21  ;;  %v1466_v7 = vsel %vm606_vm1, %v1423_v60, %v1427_v26  ;;  %v7243_v60 = vmax.f32 %v6064_v33, 0.0 }
 0x289   : > { %v6325_v10 = vmax.f32 %v7242_v50, %v1469_v37  ;;  %v7245_v37 = vmax.f32 %v6081_v57, 0.0 }
 0x28a   : > { %v6347_v29 = vmax.f32 %v7243_v60, %v1485_v18  ;;  %v6370_v18 = vadd.f32 %v6071_v54, %v5963_v38 }
 0x28b   : > { %1743 = vrot.lane.b32.xlu0 %v6237_v23, %s5300_s23  ;;  %v1429_v15 = vpop.permute.xlu0 %1428  ;;  %1578 = vrot.lane.b32.xlu1 %v6317_v0, %s5299_s10  ;;  %v1431_v51 = vpop.permute.xlu1 %1430  ;;  %v6351_v8 = vmax.f32 %v7245_v37, %v1466_v7 }
 0x28c   : > { %v1467_v35 = vsel %vm606_vm1, %v1425_v39, %v1429_v15  ;;  %7244 = vst [vmem:[#allocation17_spill] sm:$0xff] %v6347_v29  ;;  %v1464_v40 = vsel %vm606_vm1, %v1427_v26, %v1431_v51  ;;  %v7249_v26 = vmax.f32 %v6096_v5, 0.0 }
 0x28d   : > { %7246 = vst [vmem:[#allocation18_spill] sm:$0xff] %v6351_v8  ;;  %v6355_v50 = vmax.f32 %v7247_v24, %v1467_v35  ;;  %v7251_v35 = vmax.f32 %v6115_v32, 0.0 }
 0x28e   : > { %v6374_v7 = vmax.f32 %v7249_v26, %v1464_v40  ;;  %v7201_v40 = vmax.f32 %v6370_v18, 0.0 }
 0x28f   : > { %7248 = vst [vmem:[#allocation19_spill] sm:$0xff] %v6355_v50  ;;  %1580 = vrot.lane.b32.xlu0 %v6347_v29, %s5299_s10  ;;  %v1433_v2 = vpop.permute.xlu0 %1432  ;;  %1745 = vrot.lane.b32.xlu1 %v6261_v44, %s5300_s23  ;;  %v1435_v33 = vpop.permute.xlu1 %1434 }
 0x290   : > { %v1465_v57 = vsel %vm606_vm1, %v1429_v15, %v1433_v2  ;;  %7250 = vst [vmem:[#allocation20_spill] sm:$0xff] %v6374_v7  ;;  %v1462_v37 = vsel %vm606_vm1, %v1431_v51, %v1435_v33  ;;  %v7253_v51 = vmax.f32 %v6110_v25, 0.0 }
 0x291   : > { %v6378_v60 = vmax.f32 %v7251_v35, %v1465_v57  ;;  %v7255_v57 = vmax.f32 %v6131_v17, 0.0  ;;  %v6419_v17 = vadd.f32 %v5980_v49, %v5953_v31  ;;  %v6438_v49 = vadd.f32 %v5996_v56, %v5963_v38  ;;  %v410_v38 = vld [vmem:[#allocation6 + $0x2] ss:$8 sm:$0xf] }
 0x292   : > { %v6396_v24 = vmax.f32 %v7253_v51, %v1462_v37  ;;  %v411_v56 = vld [vmem:[#allocation6 + $0x2] ss:$8 sm:$0xf0] }
 0x293   : > { %7252 = vst [vmem:[#allocation21_spill] sm:$0xff] %v6378_v60  ;;  %1747 = vrot.lane.b32.xlu0 %v6269_v13, %s5300_s23  ;;  %v1437_v15 = vpop.permute.xlu0 %1436  ;;  %1442 = vrot.lane.b32.xlu1 %v7203_v45, %s5296_s16  ;;  %v6387_v54 = vpop.permute.xlu1 %1438  ;;  %v7202_v31 = vmax.f32 %v6419_v17, 0.0 }
 0x294   : > { %v1463_v32 = vsel %vm606_vm1, %v1433_v2, %v1437_v15  ;;  %7254 = vst [vmem:[#allocation22_spill] sm:$0xff] %v6396_v24  ;;  %v1460_v35 = vsel %vm606_vm1, %v1435_v33, %v6387_v54  ;;  %v7257_v33 = vmax.f32 %v6126_v30, 0.0 }
 0x295   : > { %v6400_v26 = vmax.f32 %v7255_v57, %v1463_v32  ;;  %v7259_v32 = vmax.f32 %v6146_v11, 0.0  ;;  %v7200_v11 = vmax.f32 %v6438_v49, 0.0  ;;  %v6501_v57 = vor.u32 %v411_v56, %v410_v38 }
 0x296   : > { %v6423_v37 = vmax.f32 %v7257_v33, %v1460_v35 }
 0x297   : > { %7256 = vst [vmem:[#allocation23_spill] sm:$0xff] %v6400_v26  ;;  %1444 = vrot.lane.b32.xlu0 %v7201_v40, %s5296_s16  ;;  %v6410_v2 = vpop.permute.xlu0 %1440  ;;  %1534 = vrot.lane.b32.xlu1 %v6261_v44, %s5299_s10  ;;  %v1624_v33 = vrot.slane %v6501_v57, %v5754_v34 }
 0x298   : > { %v1461_v25 = vsel %vm606_vm1, %v1437_v15, %v6410_v2  ;;  %7258 = vst [vmem:[#allocation24_spill] sm:$0xff] %v6423_v37 }
 0x299   : > { %v6427_v51 = vmax.f32 %v7259_v32, %v1461_v25 }
 0x29b   : > { %7260 = vst [vmem:[#allocation25_spill] sm:$0xff] %v6427_v51  ;;  %1536 = vrot.lane.b32.xlu0 %v6269_v13, %s5299_s10  ;;  %1538 = vrot.lane.b32.xlu1 %v6265_v1, %s5299_s10 }
 0x29f   : > { %1540 = vrot.lane.b32.xlu0 %v6273_v41, %s5299_s10  ;;  %1446 = vrot.lane.b32.xlu1 %v7202_v31, %s5296_s16 }
 0x2a3   : > { %1448 = vrot.lane.b32.xlu0 %v7200_v11, %s5296_s16  ;;  %1542 = vrot.lane.b32.xlu1 %v6295_v9, %s5299_s10  ;;  %s4158_s16 = scalar_lea.sflag [#allocation5], %s5517_s25 }
 0x2a7   : > { %1544 = vrot.lane.b32.xlu0 %v6299_v63, %s5299_s10  ;;  %1546 = vrot.lane.b32.xlu1 %v6321_v21, %s5299_s10 }
 0x2ab   : > { %1548 = vrot.lane.b32.xlu0 %v6325_v10, %s5299_s10  ;;  %1749 = vrot.lane.b32.xlu1 %v6265_v1, %s5300_s23 }
 0x2af   : > { %1751 = vrot.lane.b32.xlu0 %v6273_v41, %s5300_s23  ;;  %1753 = vrot.lane.b32.xlu1 %v6295_v9, %s5300_s23 }
 0x2b3   : > { %1755 = vrot.lane.b32.xlu0 %v6299_v63, %s5300_s23  ;;  %1757 = vrot.lane.b32.xlu1 %v6321_v21, %s5300_s23 }
 0x2b7   : > { %1759 = vrot.lane.b32.xlu0 %v6325_v10, %s5300_s23  ;;  %1761 = vrot.lane.b32.xlu1 %v6351_v8, %s5300_s23 }
 0x2bb   : > { %1763 = vrot.lane.b32.xlu0 %v6355_v50, %s5300_s23  ;;  %1550 = vrot.lane.b32.xlu1 %v6351_v8, %s5299_s10  ;;  %v419_v8 = vld [vmem:[#allocation6 + $0x3] ss:$8 sm:$0xf0] }
 0x2bf   : > { %1552 = vrot.lane.b32.xlu0 %v6355_v50, %s5299_s10  ;;  %1554 = vrot.lane.b32.xlu1 %v6374_v7, %s5299_s10 }
 0x2c3   : > { %1556 = vrot.lane.b32.xlu0 %v6378_v60, %s5299_s10  ;;  %1558 = vrot.lane.b32.xlu1 %v6396_v24, %s5299_s10 }
 0x2c7   : > { %1560 = vrot.lane.b32.xlu0 %v6400_v26, %s5299_s10  ;;  %1562 = vrot.lane.b32.xlu1 %v6423_v37, %s5299_s10 }
 0x2cb   : > { %1564 = vrot.lane.b32.xlu0 %v6427_v51, %s5299_s10  ;;  %1765 = vrot.lane.b32.xlu1 %v6374_v7, %s5300_s23 }
 0x2cf   : > { %1767 = vrot.lane.b32.xlu0 %v6378_v60, %s5300_s23  ;;  %1769 = vrot.lane.b32.xlu1 %v6396_v24, %s5300_s23 }
 0x2d3   : > { %1771 = vrot.lane.b32.xlu0 %v6400_v26, %s5300_s23  ;;  %1773 = vrot.lane.b32.xlu1 %v6423_v37, %s5300_s23 }
 0x2d7   : > { %1775 = vrot.lane.b32.xlu0 %v6427_v51, %s5300_s23  ;;  %v418_v51 = vld [vmem:[#allocation6 + $0x3] ss:$8 sm:$0xf] }
 0x2d8   : > { %v6536_v21 = vor.u32 %v419_v8, %v418_v51 }
 0x2da   : > { %v1835_v8 = vrot.slane %v6536_v21, %v5754_v34 }
 0x2dd   : > { %v1519_v30 = vpop.permute.xlu1 %1518 }
 0x2e1   : > { %v1521_v35 = vpop.permute.xlu0 %1520  ;;  %v1523_v25 = vpop.permute.xlu1 %1522 }
 0x2e2   : > { %v1611_v32 = vsel %vm1582_vm3, %v1519_v30, %v1523_v25 }
 0x2e3   : > { %v1698_v16 = vmul.f32 %v1624_v33, %v1611_v32 }
 0x2e5   : > { %v1525_v39 = vpop.permute.xlu0 %1524  ;;  %v1527_v15 = vpop.permute.xlu1 %1526 }
 0x2e6   : > { %v1612_v5 = vsel %vm1582_vm3, %v1521_v35, %v1525_v39 }
 0x2e7   : > { %v1714_v3 = vmul.f32 %v1624_v33, %v1612_v5  ;;  %v1632_v5 = vrot.slane %v6501_v57, %v5662_v28  ;;  %v1628_v33 = vrot.slane %v6501_v57, %v5658_v27 }
 0x2e9   : > { %v1529_v62 = vpop.permute.xlu0 %1528  ;;  %v6510_v38 = vpop.permute.xlu1 %1733  ;;  %v4639_v56 = vpack.c.bf16 %v1714_v3, %v1698_v16  ;;  %v1609_v16 = vsel %vm1582_vm3, %v1523_v25, %v1527_v15  ;;  %v7261_v25 = vpack.c.bf16 %v6237_v23, %v6233_v48  ;;  %v1843_v48 = vrot.slane %v6536_v21, %v5662_v28 }
 0x2ea   : > { %v1610_v26 = vsel %vm1582_vm3, %v1525_v39, %v1529_v62  ;;  %v1699_v60 = vmul.f32 %v1628_v33, %v1609_v16  ;;  %v1839_v23 = vrot.slane %v6536_v21, %v5658_v27 }
 0x2eb   : > { %4640 = vmatprep.subr.bf16.mxu0 %v4639_v56  ;;  %v1715_v37 = vmul.f32 %v1628_v33, %v1610_v26 }
 0x2ed   : > { %v1736_v11 = vpop.permute.xlu0 %1735  ;;  %v1738_v40 = vpop.permute.xlu1 %1737  ;;  %v4653_v0 = vpack.c.bf16 %v1715_v37, %v1699_v60 }
 0x2f1   : > { %v1740_v31 = vpop.permute.xlu0 %1739  ;;  %v6512_v45 = vpop.permute.xlu1 %1729 }
 0x2f5   : > { %v6514_v58 = vpop.permute.xlu0 %1731  ;;  %v6516_v24 = vpop.permute.xlu1 %1530 }
 0x2f6   : > { %v1607_v3 = vsel %vm1582_vm3, %v1527_v15, %v6516_v24  ;;  %v1620_v15 = vrot.slane %v6501_v57, %v5766_v47 }
 0x2f7   : > { %v1700_v50 = vmul.f32 %v1632_v5, %v1607_v3 }
 0x2f9   : > { %v6529_v32 = vpop.permute.xlu0 %1532  ;;  %v1742_v56 = vpop.permute.xlu1 %1741 }
 0x2fa   : > { %v1608_v39 = vsel %vm1582_vm3, %v1529_v62, %v6529_v32 }
 0x2fb   : > { %v1716_v7 = vmul.f32 %v1632_v5, %v1608_v39  ;;  %v1818_v5 = vsel %vm1793_vm4, %v1738_v40, %v1742_v56  ;;  %v1823_v39 = vsel %vm1793_vm4, %v6514_v58, %v1736_v11 }
 0x2fd   : > { %v1744_v29 = vpop.permute.xlu0 %1743  ;;  %v6534_v9 = vpop.permute.xlu1 %1578  ;;  %v4651_v63 = vpack.c.bf16 %v1716_v7, %v1700_v50 }
 0x2fe   : > { %v1613_v62 = vsel %vm1582_vm3, %v6534_v9, %v1519_v30  ;;  %v1819_v7 = vsel %vm1793_vm4, %v1740_v31, %v1744_v29  ;;  %v7262_v30 = vpack.c.bf16 %v6219_v59, %v6215_v52 }
 0x2ff   : > { %4652 = vmatprep.subr.bf16.mxu1 %v4651_v63  ;;  %v1821_v63 = vsel %vm1793_vm4, %v1736_v11, %v1740_v31  ;;  %v1697_v60 = vmul.f32 %v1620_v15, %v1613_v62  ;;  %v1820_v31 = vsel %vm1793_vm4, %v6510_v38, %v1738_v40  ;;  %v1831_v40 = vrot.slane %v6536_v21, %v5766_v47 }
 0x300   : > { %4654 = vmatpush1.bf16.msra.mxu1 %v4653_v0  ;;  %v1909_v11 = vmul.f32 %v1835_v8, %v1820_v31 }
 0x301   : > { %v6544_v26 = vpop.permute.xlu0 %1580  ;;  %4656 = vmatprep.subr.bf16.mxu1 %v7261_v25  ;;  %v6549_v50 = vpop.permute.xlu1 %1745  ;;  %v7263_v25 = vmax.f32 %v6141_v55, 0.0 }
 0x302   : > { %v1614_v0 = vsel %vm1582_vm3, %v6544_v26, %v1521_v35  ;;  %v1816_v51 = vsel %vm1793_vm4, %v1742_v56, %v6549_v50  ;;  %v1925_v35 = vmul.f32 %v1835_v8, %v1821_v63 }
 0x303   : > { %v1713_v37 = vmul.f32 %v1620_v15, %v1614_v0  ;;  %v1926_v15 = vmul.f32 %v1839_v23, %v1819_v7  ;;  %v1911_v56 = vmul.f32 %v1843_v48, %v1816_v51  ;;  %v1910_v0 = vmul.f32 %v1839_v23, %v1818_v5 }
 0x304   : > { %4658 = vmatpush1.bf16.msra.mxu1 %v7262_v30  ;;  %v1924_v7 = vmul.f32 %v1831_v40, %v1823_v39  ;;  %v4647_v51 = vpack.c.bf16 %v1925_v35, %v1909_v11  ;;  %v1640_v35 = vrot.slane %v6501_v57, %v5819_v46  ;;  %v1636_v5 = vrot.slane %v6501_v57, %v5816_v42 }
 0x305   : > { %v4641_v33 = vpack.c.bf16 %v1713_v37, %v1697_v60  ;;  %v6575_v3 = vpop.permute.xlu0 %1747  ;;  %v1443_v16 = vpop.permute.xlu1 %1442  ;;  %v7267_v39 = vmov 0.0  }
 0x306   : > { %v1817_v52 = vsel %vm1793_vm4, %v1744_v29, %v6575_v3  ;;  %v1458_v59 = vsel %vm606_vm1, %v6387_v54, %v1443_v16  ;;  %v1822_v29 = vsel %vm1793_vm4, %v6512_v45, %v6510_v38  ;;  %v7264_v54 = vpack.c.bf16 %v6199_v20, %v6191_v6  ;;  %v6614_v20 = vld [vmem:[%s7170_s5] sm:$0xff] }
 0x307   : > { %v1927_v62 = vmul.f32 %v1843_v48, %v1817_v52  ;;  %v6590_v63 = vmax.f32 %v7263_v25, %v1458_v59  ;;  %4642 = vmatpush1.bf16.msra.mxu0 %v4641_v33  ;;  %v4661_v48 = vpack.c.bf16 %v1926_v15, %v1910_v0  ;;  %v1908_v30 = vmul.f32 %v1831_v40, %v1822_v29  ;;  %v6637_v15 = vld [vmem:[%s7170_s5 + $0x8] sm:$0xff] }
 0x308   : > { %4644 = vmatprep.subr.bf16.mxu0 %v7264_v54  ;;  %v7265_v38 = vmax.f32 %v6156_v12, 0.0  ;;  %v7266_v6 = vpack.c.bf16 %v6195_v4, %v6178_v19  ;;  %v7268_v29 = vmax.f32 %v6343_v36, 0.0 }
 0x309   : > { %v1445_v60 = vpop.permute.xlu0 %1444  ;;  %1777 = vrot.lane.b32.xlu1 %v6590_v63, %s5300_s23  ;;  %v1535_v55 = vpop.permute.xlu1 %1534  ;;  %v4659_v37 = vpack.c.bf16 %v1927_v62, %v1911_v56 }
 0x30a   : > { %v1459_v8 = vsel %vm606_vm1, %v6410_v2, %v1445_v60  ;;  %v4649_v2 = vpack.c.bf16 %v1924_v7, %v1908_v30  ;;  %v7270_v30 = vmax.f32 %v6370_v18, 0.0 }
 0x30b   : > { %v6606_v23 = vmax.f32 %v7265_v38, %v1459_v8  ;;  %4646 = vmatpush1.bf16.msra.mxu0 %v7266_v6  ;;  %4660 = vmatprep.subr.bf16.mxu1 %v4659_v37  ;;  %v7269_v8 = vmax.f32 %v6419_v17, 0.0  ;;  %v7271_v6 = vmax.f32 %v6438_v49, 0.0  ;;  %v7272_v17 = vpack.c.bf16 %v6273_v41, %v6265_v1 }
 0x30c   : > { %4648 = vmatprep.subr.bf16.mxu0 %v4647_v51  ;;  %4662 = vmatpush1.bf16.msra.mxu1 %v4661_v48  ;;  %v1648_v1 = vrot.slane %v6501_v57, %v5684_v43 }
 0x30d   : > { %v4717_v31 = vpack.c.bf16 %v6606_v23, %v6590_v63  ;;  %1779 = vrot.lane.b32.xlu0 %v6606_v23, %s5300_s23  ;;  %v1537_v12 = vpop.permute.xlu0 %1536  ;;  %1566 = vrot.lane.b32.xlu1 %v6590_v63, %s5299_s10  ;;  %v1539_v19 = vpop.permute.xlu1 %1538 }
 0x30e   : > { %v1606_v4 = vsel %vm1582_vm3, %v6529_v32, %v1537_v12  ;;  %v1603_v33 = vsel %vm1582_vm3, %v1535_v55, %v1539_v19  ;;  %v1605_v32 = vsel %vm1582_vm3, %v6516_v24, %v1535_v55 }
 0x30f   : > { %4650 = vmatpush1.bf16.msra.mxu0 %v4649_v2  ;;  %4287 = vmatmul.mubr.msk.f32.vlgmr.msra.gmra.mrb[16].mxu1 %vm1968_vm5, %v6614_v20  ;;  %v1717_v40 = vmul.f32 %v1636_v5, %v1606_v4  ;;  %v1702_v25 = vmul.f32 %v1640_v35, %v1603_v33  ;;  %v1701_v0 = vmul.f32 %v1636_v5, %v1605_v32 }
 0x310   : > { %2140 = vmatprep.mubr.f32.mxu1 %v7267_v39  ;;  %v1644_v4 = vrot.slane %v6501_v57, %v5703_v53  ;;  %v7273_v5 = vpack.c.bf16 %v6269_v13, %v6261_v44 }
 0x311   : > { %1568 = vrot.lane.b32.xlu0 %v6606_v23, %s5299_s10  ;;  %v1541_v52 = vpop.permute.xlu0 %1540  ;;  %v1447_v59 = vpop.permute.xlu1 %1446  ;;  %v4665_v37 = vpack.c.bf16 %v1717_v40, %v1701_v0  ;;  %v1847_v0 = vrot.slane %v6536_v21, %v5816_v42 }
 0x312   : > { %v1604_v56 = vsel %vm1582_vm3, %v1537_v12, %v1541_v52  ;;  %v1456_v62 = vsel %vm606_vm1, %v1443_v16, %v1447_v59  ;;  %4283 = vmatmul.mubr.msk.f32.vlgmr.msra.gmra.mrb[16].mxu0 %vm1968_vm5, %v6614_v20  ;;  %v1454_v54 = vsel %vm606_vm1, %v1447_v59, %v6253_v14  ;;  %v6664_v16 = vld [vmem:[%s7170_s5 + $0x10] sm:$0xff] }
 0x313   : > { %v1718_v11 = vmul.f32 %v1640_v35, %v1604_v56  ;;  %v6652_v24 = vmax.f32 %v7268_v29, %v1456_v62  ;;  %4288 = vmatmul.mubr.msk.f32.gmra.mrb[18].mxu1 %vm1968_vm5, %v6637_v15  ;;  %2051 = vmatprep.mubr.f32.mxu0 %v7267_v39  ;;  %v6677_v51 = vmax.f32 %v7269_v8, %v1454_v54  ;;  %v7276_v8 = vld [vmem:[#allocation15_spill] sm:$0xff] }
 0x314   : > { %2146 = vmatprep.mubr.f32.mxu1 %v7267_v39  ;;  %v1851_v29 = vrot.slane %v6536_v21, %v5819_v46 }
 0x315   : > { %v1449_v36 = vpop.permute.xlu0 %1448  ;;  %1570 = vrot.lane.b32.xlu1 %v6652_v24, %s5299_s10  ;;  %v1543_v7 = vpop.permute.xlu1 %1542  ;;  %v4663_v55 = vpack.c.bf16 %v1718_v11, %v1702_v25 }
 0x316   : > { %v1455_v48 = vsel %vm606_vm1, %v1449_v36, %v6279_v61  ;;  %v1457_v14 = vsel %vm606_vm1, %v1445_v60, %v1449_v36  ;;  %4284 = vmatmul.mubr.msk.f32.gmra.mrb[18].mxu0 %vm1968_vm5, %v6637_v15  ;;  %v6702_v60 = vld [vmem:[%s7170_s5 + $0x18] sm:$0xff]  ;;  %v1601_v33 = vsel %vm1582_vm3, %v1539_v19, %v1543_v7 }
 0x317   : > { %v6681_v38 = vmax.f32 %v7270_v30, %v1457_v14  ;;  %v6685_v2 = vmax.f32 %v7271_v6, %v1455_v48  ;;  %4289 = vmatmul.mubr.msk.f32.gmra.mrb[20].mxu1 %vm1968_vm5, %v6664_v16  ;;  %4664 = vmatprep.subr.bf16.mxu0 %v4663_v55  ;;  %v1703_v19 = vmul.f32 %v1644_v4, %v1601_v33 }
 0x318   : > { %4666 = vmatpush1.bf16.msra.mxu0 %v4665_v37  ;;  %2057 = vmatprep.mubr.f32.mxu0 %v7267_v39 }
 0x319   : > { %v4729_v61 = vpack.c.bf16 %v6685_v2, %v6677_v51  ;;  %1572 = vrot.lane.b32.xlu0 %v6681_v38, %s5299_s10  ;;  %v1545_v18 = vpop.permute.xlu0 %1544  ;;  %4668 = vmatprep.subr.bf16.mxu0 %v7272_v17  ;;  %v6697_v49 = vpop.permute.xlu1 %1546  ;;  %v4715_v12 = vpack.c.bf16 %v6681_v38, %v6652_v24  ;;  %v7277_v17 = vld [vmem:[#allocation14_spill] sm:$0xff] }
 0x31a   : > { %1574 = vrot.lane.b32.xlu1 %v6677_v51, %s5299_s10  ;;  %4285 = vmatmul.mubr.msk.f32.gmra.mrb[20].mxu0 %vm1968_vm5, %v6664_v16  ;;  %v1602_v41 = vsel %vm1582_vm3, %v1541_v52, %v1545_v18  ;;  %v1599_v35 = vsel %vm1582_vm3, %v1543_v7, %v6697_v49 }
 0x31b   : > { %2152 = vmatprep.mubr.f32.mxu1 %v7267_v39  ;;  %2063 = vmatprep.mubr.f32.mxu0 %v7267_v39  ;;  %v1719_v52 = vmul.f32 %v1644_v4, %v1602_v41  ;;  %v1704_v44 = vmul.f32 %v1648_v1, %v1599_v35  ;;  %v7278_v41 = vld [vmem:[#allocation13_spill] sm:$0xff] }
 0x31c   : > { %4290 = vmatmul.mubr.msk.f32.gmra.mrb[22].mxu1 %vm1968_vm5, %v6702_v60  ;;  %4670 = vmatpush1.bf16.msra.mxu0 %v7273_v5 }
 0x31d   : > { %1576 = vrot.lane.b32.xlu0 %v6685_v2, %s5299_s10  ;;  %v6730_v32 = vpop.permute.xlu0 %1548  ;;  %v1750_v57 = vpop.permute.xlu1 %1749  ;;  %2312 = vmatprep.mubr.f32.mxu1 %v7267_v39  ;;  %v4677_v25 = vpack.c.bf16 %v1719_v52, %v1703_v19 }
 0x31e   : > { %v1600_v59 = vsel %vm1582_vm3, %v1545_v18, %v6730_v32  ;;  %1781 = vrot.lane.b32.xlu1 %v6652_v24, %s5300_s23  ;;  %4286 = vmatmul.mubr.msk.f32.gmra.mrb[22].mxu0 %vm1968_vm5, %v6702_v60  ;;  %v1814_v36 = vsel %vm1793_vm4, %v6549_v50, %v1750_v57  ;;  %v1944_v50 = vld [vmem:[%s7171_s6] sm:$0xff] }
 0x31f   : > { %v1720_v13 = vmul.f32 %v1648_v1, %v1600_v59  ;;  %2223 = vmatprep.mubr.f32.mxu0 %v7267_v39  ;;  %v1912_v18 = vmul.f32 %v1847_v0, %v1814_v36  ;;  %v7279_v1 = vpack.c.bf16 %v7277_v17, %v7278_v41  ;;  %v1859_v59 = vrot.slane %v6536_v21, %v5684_v43 }
 0x321   : > { %1783 = vrot.lane.b32.xlu0 %v6681_v38, %s5300_s23  ;;  %v1752_v40 = vpop.permute.xlu0 %1751  ;;  %v1754_v56 = vpop.permute.xlu1 %1753  ;;  %v4675_v62 = vpack.c.bf16 %v1720_v13, %v1704_v44  ;;  %v1946_v44 = vld [vmem:[%s7171_s6 + $0x10] sm:$0xff]  ;;  %v1855_v13 = vrot.slane %v6536_v21, %v5703_v53 }
 0x322   : > { %1785 = vrot.lane.b32.xlu1 %v6677_v51, %s5300_s23  ;;  %v1815_v11 = vsel %vm1793_vm4, %v6575_v3, %v1752_v40  ;;  %v1812_v54 = vsel %vm1793_vm4, %v1750_v57, %v1754_v56  ;;  %v7274_v3 = vld [vmem:[#allocation16_spill] sm:$0xff]  ;;  %v1945_v57 = vld [vmem:[%s7171_s6 + $0x8] sm:$0xff] }
 0x323   : > { %4676 = vmatprep.subr.bf16.mxu1 %v4675_v62  ;;  %v7275_v55 = vpack.c.bf16 %v6325_v10, %v7274_v3  ;;  %v1928_v48 = vmul.f32 %v1847_v0, %v1815_v11  ;;  %v1913_v30 = vmul.f32 %v1851_v29, %v1812_v54  ;;  %v7280_v10 = vld [vmem:[#allocation17_spill] sm:$0xff]  ;;  %v1947_v54 = vld [vmem:[%s7171_s6 + $0x18] sm:$0xff] }
 0x324   : > { %4678 = vmatpush1.bf16.msra.mxu1 %v4677_v25  ;;  %v414_v25 = vld [vmem:[#allocation6 + $0x42] ss:$8 sm:$0xf] }
 0x325   : > { %1787 = vrot.lane.b32.xlu0 %v6685_v2, %s5300_s23  ;;  %v1756_v7 = vpop.permute.xlu0 %1755  ;;  %4680 = vmatprep.subr.bf16.mxu1 %v7275_v55  ;;  %v1758_v37 = vpop.permute.xlu1 %1757  ;;  %v4673_v33 = vpack.c.bf16 %v1928_v48, %v1912_v18  ;;  %v415_v21 = vld [vmem:[#allocation6 + $0x42] ss:$8 sm:$0xf0] }
 0x326   : > { %v1813_v14 = vsel %vm1793_vm4, %v1752_v40, %v1756_v7  ;;  %1789 = vrot.lane.b32.xlu1 %v7276_v8, %s5300_s23  ;;  %v1810_v40 = vsel %vm1793_vm4, %v1754_v56, %v1758_v37  ;;  %v3586_v56 = vld [vmem:[#allocation2] sm:$0x1]  ;;  %v6804_v55 = vor.u32 %v415_v21, %v414_v25  ;;  %v422_v21 = vld [vmem:[#allocation6 + $0x43] ss:$8 sm:$0xf] }
 0x327   : > { %v1929_v6 = vmul.f32 %v1851_v29, %v1813_v14  ;;  %v1914_v3 = vmul.f32 %v1855_v13, %v1810_v40 }
 0x328   : > { %4682 = vmatpush1.bf16.msra.mxu1 %v7279_v1  ;;  %v1652_v17 = vrot.slane %v6804_v55, %v5766_v47  ;;  %v1664_v40 = vrot.slane %v6804_v55, %v5662_v28  ;;  %v1660_v25 = vrot.slane %v6804_v55, %v5658_v27 }
 0x329   : > { %1791 = vrot.lane.b32.xlu0 %v7280_v10, %s5300_s23  ;;  %v1760_v4 = vpop.permute.xlu0 %1759  ;;  %v6774_v35 = vpop.permute.xlu1 %1761  ;;  %v4671_v5 = vpack.c.bf16 %v1929_v6, %v1913_v30  ;;  %v1656_v6 = vrot.slane %v6804_v55, %v5754_v34  ;;  %s5222_s23 = sshll.u32 %s5301_s8, 4  ;;  %s5223_s23 = int_to_ptr.vmem [resolvable:$false] %s5222_s23 }
 0x32a   : > { %1950 = vperm.xlu1 %5131, %v1944_v50   ;;  %v1811_v52 = vsel %vm1793_vm4, %v1756_v7, %v1760_v4  ;;  %v1808_v19 = vsel %vm1793_vm4, %v1758_v37, %v6774_v35  ;;  %s5224_s15 = scalar_lea.vmem %s5223_s23, 32  ;;  %p5225_p8 = scmp.lt.s32.totalorder %s7123_s20, %s5223_s23 }
 0x32b   : > { %4672 = vmatprep.subr.bf16.mxu0 %v4671_v5  ;;  %v1930_v29 = vmul.f32 %v1855_v13, %v1811_v52  ;;  %v1915_v36 = vmul.f32 %v1859_v59, %v1808_v19  ;;  %p5226_p12 = scmp.lt.s32.totalorder %s5224_s15, %s5218_s30 }
 0x32c   : > { %4674 = vmatpush1.bf16.msra.mxu0 %v4673_v33 }
 0x32d   : > { %1955 = vperm.xlu0 %5130, %v1945_v57   ;;  %v6793_v62 = vpop.permute.xlu0 %1763  ;;  %v1551_v11 = vpop.permute.xlu1 %1550  ;;  %v4685_v30 = vpack.c.bf16 %v1930_v29, %v1914_v3  ;;  %v7281_v3 = vld [vmem:[#allocation21_spill] sm:$0xff]  ;;  %p5227_p3 = por %p5226_p12, %p5225_p8 }
 0x32e   : > { %v1809_v0 = vsel %vm1793_vm4, %v1760_v4, %v6793_v62  ;;  %1960 = vperm.xlu1 %5131, %v1946_v44   ;;  %v1597_v4 = vsel %vm1582_vm3, %v6697_v49, %v1551_v11 }
 0x32f   : > { %v1931_v7 = vmul.f32 %v1859_v59, %v1809_v0  ;;  %4291 = vmatmul.mubr.msk.f32.vlgmr.msra.gmra.mrb[24].mxu0 %vm1968_vm5, %v6614_v20  ;;  %v1705_v52 = vmul.f32 %v1652_v17, %v1597_v4  ;;  %p5228_p7 = pnand %p5227_p3, %p5221_p6 }
 0x330   : > { %2229 = vmatprep.mubr.f32.mxu0 %v7267_v39 }
 0x331   : > { %1965 = vperm.xlu0 %5130, %v1947_v54   ;;  %v1553_v37 = vpop.permute.xlu0 %1552  ;;  %v1555_v48 = vpop.permute.xlu1 %1554  ;;  %v4683_v14 = vpack.c.bf16 %v1931_v7, %v1915_v36  ;;  %v423_v54 = vld [vmem:[#allocation6 + $0x43] ss:$8 sm:$0xf0] }
 0x332   : > { %3589 = vperm.xlu1 %5131, %v3586_v56   ;;  %v1598_v50 = vsel %vm1582_vm3, %v6730_v32, %v1553_v37  ;;  %v1595_v18 = vsel %vm1582_vm3, %v1551_v11, %v1555_v48 }
 0x333   : > { %4292 = vmatmul.mubr.msk.f32.gmra.mrb[26].mxu0 %vm1968_vm5, %v6637_v15  ;;  %4684 = vmatprep.subr.bf16.mxu1 %v4683_v14  ;;  %v1721_v33 = vmul.f32 %v1652_v17, %v1598_v50  ;;  %v1706_v32 = vmul.f32 %v1656_v6, %v1595_v18  ;;  %v6858_v50 = vor.u32 %v423_v54, %v422_v21  ;;  %v7284_v18 = vld [vmem:[#allocation19_spill] sm:$0xff]  ;;  %v7285_v17 = vld [vmem:[#allocation18_spill] sm:$0xff] }
 0x334   : > { %4686 = vmatpush1.bf16.msra.mxu1 %v4685_v30  ;;  %2235 = vmatprep.mubr.f32.mxu0 %v7267_v39  ;;  %v7290_v54 = vld [vmem:[#allocation23_spill] sm:$0xff] }
 0x335   : > { %v1557_v41 = vpop.permute.xlu0 %1556  ;;  %v1559_v1 = vpop.permute.xlu1 %1558  ;;  %v4689_v13 = vpack.c.bf16 %v1721_v33, %v1705_v52  ;;  %v1863_v52 = vrot.slane %v6858_v50, %v5766_v47  ;;  %v1887_v63 = vrot.slane %v6858_v50, %v5703_v53  ;;  %v1891_v23 = vrot.slane %v6858_v50, %v5684_v43 }
 0x336   : > { %v1596_v5 = vsel %vm1582_vm3, %v1553_v37, %v1557_v41  ;;  %v1593_v29 = vsel %vm1582_vm3, %v1555_v48, %v1559_v1  ;;  %v7282_v37 = vld [vmem:[#allocation20_spill] sm:$0xff] }
 0x337   : > { %v1722_v57 = vmul.f32 %v1656_v6, %v1596_v5  ;;  %4293 = vmatmul.mubr.msk.f32.gmra.mrb[28].mxu0 %vm1968_vm5, %v6664_v16  ;;  %4295 = vmatmul.mubr.msk.f32.vlgmr.msra.gmra.mrb[24].mxu1 %vm1968_vm5, %v6614_v20  ;;  %v7283_v14 = vpack.c.bf16 %v7281_v3, %v7282_v37  ;;  %v1707_v48 = vmul.f32 %v1660_v25, %v1593_v29 }
 0x338   : > { %2241 = vmatprep.mubr.f32.mxu0 %v7267_v39  ;;  %2318 = vmatprep.mubr.f32.mxu1 %v7267_v39 }
 0x339   : > { %v1561_v59 = vpop.permute.xlu0 %1560  ;;  %v6829_v44 = vpop.permute.xlu1 %1562  ;;  %v4687_v49 = vpack.c.bf16 %v1722_v57, %v1706_v32  ;;  %v1867_v57 = vrot.slane %v6858_v50, %v5754_v34  ;;  %v7288_v34 = vld [vmem:[#allocation24_spill] sm:$0xff] }
 0x33a   : > { %v1594_v19 = vsel %vm1582_vm3, %v1557_v41, %v1561_v59  ;;  %v1591_v11 = vsel %vm1582_vm3, %v1559_v1, %v6829_v44  ;;  %v7286_v41 = vpack.c.bf16 %v7284_v18, %v7285_v17 }
 0x33b   : > { %4294 = vmatmul.mubr.msk.f32.gmra.mrb[30].mxu0 %vm1968_vm5, %v6702_v60  ;;  %4296 = vmatmul.mubr.msk.f32.gmra.mrb[26].mxu1 %vm1968_vm5, %v6637_v15  ;;  %v1723_v7 = vmul.f32 %v1660_v25, %v1594_v19  ;;  %v1708_v30 = vmul.f32 %v1664_v40, %v1591_v11 }
 0x33c   : > { %4688 = vmatprep.subr.bf16.mxu0 %v4687_v49  ;;  %2324 = vmatprep.mubr.f32.mxu1 %v7267_v39 }
 0x33d   : > { %4690 = vmatpush1.bf16.msra.mxu0 %v4689_v13  ;;  %v6847_v0 = vpop.permute.xlu0 %1564  ;;  %v1766_v36 = vpop.permute.xlu1 %1765  ;;  %2401 = vmatprep.mubr.f32.mxu0 %v7267_v39  ;;  %v4701_v33 = vpack.c.bf16 %v1723_v7, %v1707_v48  ;;  %v7287_v13 = vld [vmem:[#allocation25_spill] sm:$0xff]  ;;  %v7291_v7 = vld [vmem:[#allocation22_spill] sm:$0xff]  ;;  %v1871_v48 = vrot.slane %v6858_v50, %v5658_v27 }
 0x33e   : > { %v1592_v56 = vsel %vm1582_vm3, %v1561_v59, %v6847_v0  ;;  %4692 = vmatprep.subr.bf16.mxu0 %v7283_v14  ;;  %v7289_v19 = vpack.c.bf16 %v7287_v13, %v7288_v34  ;;  %v1668_v13 = vrot.slane %v6804_v55, %v5816_v42 }
 0x33f   : > { %v1724_v6 = vmul.f32 %v1664_v40, %v1592_v56  ;;  %4297 = vmatmul.mubr.msk.f32.gmra.mrb[28].mxu1 %vm1968_vm5, %v6664_v16  ;;  %v7292_v56 = vpack.c.bf16 %v7290_v54, %v7291_v7  ;;  %v1680_v7 = vrot.slane %v6804_v55, %v5684_v43 }
 0x340   : > { %2330 = vmatprep.mubr.f32.mxu1 %v7267_v39 }
 0x341   : > { %4694 = vmatpush1.bf16.msra.mxu0 %v7286_v41  ;;  %v1768_v1 = vpop.permute.xlu0 %1767  ;;  %v1770_v4 = vpop.permute.xlu1 %1769  ;;  %v4699_v5 = vpack.c.bf16 %v1724_v6, %v1708_v30  ;;  %v1875_v6 = vrot.slane %v6858_v50, %v5662_v28 }
 0x342   : > { %v1807_v32 = vsel %vm1793_vm4, %v6793_v62, %v1768_v1  ;;  %v1804_v59 = vsel %vm1793_vm4, %v1766_v36, %v1770_v4  ;;  %v1806_v62 = vsel %vm1793_vm4, %v6774_v35, %v1766_v36 }
 0x343   : > { %4298 = vmatmul.mubr.msk.f32.gmra.mrb[30].mxu1 %vm1968_vm5, %v6702_v60  ;;  %4700 = vmatprep.subr.bf16.mxu1 %v4699_v5  ;;  %v1932_v40 = vmul.f32 %v1863_v52, %v1807_v32  ;;  %v1917_v11 = vmul.f32 %v1867_v57, %v1804_v59  ;;  %v1916_v21 = vmul.f32 %v1863_v52, %v1806_v62 }
 0x344   : > { %4702 = vmatpush1.bf16.msra.mxu1 %v4701_v33  ;;  %2490 = vmatprep.mubr.f32.mxu1 %v7267_v39 }
 0x345   : > { %v1772_v49 = vpop.permute.xlu0 %1771  ;;  %4704 = vmatprep.subr.bf16.mxu1 %v7289_v19  ;;  %v4697_v37 = vpack.c.bf16 %v1932_v40, %v1916_v21  ;;  %v1774_v35 = vpop.permute.xlu1 %1773 }
 0x346   : > { %v1805_v25 = vsel %vm1793_vm4, %v1768_v1, %v1772_v49  ;;  %v1802_v17 = vsel %vm1793_vm4, %v1770_v4, %v1774_v35  ;;  %v1672_v4 = vrot.slane %v6804_v55, %v5819_v46 }
 0x347   : > { %v1933_v29 = vmul.f32 %v1867_v57, %v1805_v25  ;;  %v1918_v57 = vmul.f32 %v1871_v48, %v1802_v17 }
 0x348   : > { %4706 = vmatpush1.bf16.msra.mxu1 %v7292_v56 }
 0x349   : > { %v4695_v3 = vpack.c.bf16 %v1933_v29, %v1917_v11  ;;  %v1776_v36 = vpop.permute.xlu0 %1775  ;;  %v1676_v11 = vrot.slane %v6804_v55, %v5703_v53 }
 0x34a   : > { %v1803_v30 = vsel %vm1793_vm4, %v1772_v49, %v1776_v36 }
 0x34b   : > { %4696 = vmatprep.subr.bf16.mxu0 %v4695_v3  ;;  %v1934_v1 = vmul.f32 %v1871_v48, %v1803_v30 }
 0x34c   : > { %4698 = vmatpush1.bf16.msra.mxu0 %v4697_v37 }
 0x34d   : > { %v4709_v59 = vpack.c.bf16 %v1934_v1, %v1918_v57  ;;  %v1883_v57 = vrot.slane %v6858_v50, %v5819_v46 }
 0x34f   : > { %4299 = vmatmul.mubr.msk.f32.vlgmr.msra.gmra.mrb[32].mxu0 %vm1968_vm5, %v6614_v20 }
 0x350   : > { %2407 = vmatprep.mubr.f32.mxu0 %v7267_v39 }
 0x353   : > { %4300 = vmatmul.mubr.msk.f32.gmra.mrb[34].mxu0 %vm1968_vm5, %v6637_v15 }
 0x354   : > { %2413 = vmatprep.mubr.f32.mxu0 %v7267_v39 }
 0x357   : > { %4301 = vmatmul.mubr.msk.f32.gmra.mrb[36].mxu0 %vm1968_vm5, %v6664_v16 }
 0x358   : > { %2419 = vmatprep.mubr.f32.mxu0 %v7267_v39 }
 0x35b   : > { %4302 = vmatmul.mubr.msk.f32.gmra.mrb[38].mxu0 %vm1968_vm5, %v6702_v60 }
 0x35c   : > { %2579 = vmatprep.mubr.f32.mxu0 %v7267_v39 }
 0x37b   : > { %v6899_v14 = vpop.permute.xlu1 %1777 }
 0x37c   : > { %v1800_v18 = vsel %vm1793_vm4, %v1774_v35, %v6899_v14 }
 0x37d   : > { %v1919_v33 = vmul.f32 %v1875_v6, %v1800_v18 }
 0x37f   : > { %v1780_v41 = vpop.permute.xlu0 %1779  ;;  %v1567_v52 = vpop.permute.xlu1 %1566 }
 0x380   : > { %v1801_v5 = vsel %vm1793_vm4, %v1776_v36, %v1780_v41  ;;  %v1589_v19 = vsel %vm1582_vm3, %v6829_v44, %v1567_v52 }
 0x381   : > { %v1935_v32 = vmul.f32 %v1875_v6, %v1801_v5  ;;  %v1709_v44 = vmul.f32 %v1668_v13, %v1589_v19 }
 0x383   : > { %v4707_v28 = vpack.c.bf16 %v1935_v32, %v1919_v33  ;;  %v1569_v27 = vpop.permute.xlu0 %1568 }
 0x384   : > { %v1590_v49 = vsel %vm1582_vm3, %v6847_v0, %v1569_v27 }
 0x385   : > { %4708 = vmatprep.subr.bf16.mxu1 %v4707_v28  ;;  %v1725_v0 = vmul.f32 %v1668_v13, %v1590_v49  ;;  %v1879_v28 = vrot.slane %v6858_v50, %v5816_v42 }
 0x386   : > { %4710 = vmatpush1.bf16.msra.mxu1 %v4709_v59 }
 0x387   : > { %v1571_v62 = vpop.permute.xlu1 %1570  ;;  %v4713_v36 = vpack.c.bf16 %v1725_v0, %v1709_v44 }
 0x388   : > { %v1587_v34 = vsel %vm1582_vm3, %v1567_v52, %v1571_v62  ;;  %v4727_v52 = vpack.c.bf16 %v7280_v10, %v7276_v8 }
 0x389   : > { %4303 = vmatmul.mubr.msk.f32.vlgmr.msra.gmra.mrb[32].mxu1 %vm1968_vm5, %v6614_v20  ;;  %v1710_v21 = vmul.f32 %v1672_v4, %v1587_v34 }
 0x38a   : > { %2496 = vmatprep.mubr.f32.mxu1 %v7267_v39 }
 0x38b   : > { %v1573_v40 = vpop.permute.xlu0 %1572 }
 0x38c   : > { %v1588_v25 = vsel %vm1582_vm3, %v1569_v27, %v1573_v40  ;;  %v1575_v29 = vpop.permute.xlu1 %1574 }
 0x38d   : > { %v1726_v54 = vmul.f32 %v1672_v4, %v1588_v25  ;;  %v1585_v56 = vsel %vm1582_vm3, %v1571_v62, %v1575_v29  ;;  %4304 = vmatmul.mubr.msk.f32.gmra.mrb[34].mxu1 %vm1968_vm5, %v6637_v15  ;;  %v1583_v3 = vsel %vm1582_vm3, %v1575_v29, %v6534_v9 }
 0x38e   : > { %2502 = vmatprep.mubr.f32.mxu1 %v7267_v39  ;;  %v1711_v30 = vmul.f32 %v1676_v11, %v1585_v56  ;;  %v1712_v18 = vmul.f32 %v1680_v7, %v1583_v3 }
 0x38f   : > { %v1577_v37 = vpop.permute.xlu0 %1576  ;;  %v4711_v35 = vpack.c.bf16 %v1726_v54, %v1710_v21 }
 0x390   : > { %v1584_v55 = vsel %vm1582_vm3, %v1577_v37, %v6544_v26  ;;  %v1586_v6 = vsel %vm1582_vm3, %v1573_v40, %v1577_v37  ;;  %v1782_v48 = vpop.permute.xlu1 %1781 }
 0x391   : > { %v1727_v17 = vmul.f32 %v1676_v11, %v1586_v6  ;;  %v1728_v1 = vmul.f32 %v1680_v7, %v1584_v55  ;;  %4305 = vmatmul.mubr.msk.f32.gmra.mrb[36].mxu1 %vm1968_vm5, %v6664_v16  ;;  %4712 = vmatprep.subr.bf16.mxu0 %v4711_v35  ;;  %v1798_v46 = vsel %vm1793_vm4, %v6899_v14, %v1782_v48 }
 0x392   : > { %4714 = vmatpush1.bf16.msra.mxu0 %v4713_v36  ;;  %2508 = vmatprep.mubr.f32.mxu1 %v7267_v39 }
 0x393   : > { %v4725_v9 = vpack.c.bf16 %v1727_v17, %v1711_v30  ;;  %v1784_v5 = vpop.permute.xlu0 %1783  ;;  %4716 = vmatprep.subr.bf16.mxu0 %v4715_v12  ;;  %v4723_v26 = vpack.c.bf16 %v1728_v1, %v1712_v18 }
 0x394   : > { %v1786_v33 = vpop.permute.xlu1 %1785  ;;  %v1799_v32 = vsel %vm1793_vm4, %v1780_v41, %v1784_v5 }
 0x395   : > { %4306 = vmatmul.mubr.msk.f32.gmra.mrb[38].mxu1 %vm1968_vm5, %v6702_v60  ;;  %4724 = vmatprep.subr.bf16.mxu1 %v4723_v26  ;;  %v1796_v24 = vsel %vm1793_vm4, %v1782_v48, %v1786_v33  ;;  %v1936_v12 = vmul.f32 %v1879_v28, %v1799_v32 }
 0x396   : > { %4718 = vmatpush1.bf16.msra.mxu0 %v4717_v31  ;;  %4726 = vmatpush1.bf16.msra.mxu1 %v4725_v9  ;;  %v1921_v10 = vmul.f32 %v1883_v57, %v1796_v24  ;;  %v1920_v31 = vmul.f32 %v1879_v28, %v1798_v46 }
 0x397   : > { %v1788_v38 = vpop.permute.xlu0 %1787  ;;  %4728 = vmatprep.subr.bf16.mxu1 %v4727_v52  ;;  %2668 = vmatprep.mubr.f32.mxu1 %v7267_v39 }
 0x398   : > { %v1797_v42 = vsel %vm1793_vm4, %v1784_v5, %v1788_v38  ;;  %v1790_v8 = vpop.permute.xlu1 %1789  ;;  %v4721_v49 = vpack.c.bf16 %v1936_v12, %v1920_v31 }
 0x399   : > { %v1937_v41 = vmul.f32 %v1883_v57, %v1797_v42  ;;  %v1794_v14 = vsel %vm1793_vm4, %v1786_v33, %v1790_v8  ;;  %v1824_v59 = vsel %vm1793_vm4, %v1790_v8, %v6512_v45 }
 0x39a   : > { %4730 = vmatpush1.bf16.msra.mxu1 %v4729_v61  ;;  %v1922_v50 = vmul.f32 %v1887_v63, %v1794_v14  ;;  %v1923_v4 = vmul.f32 %v1891_v23, %v1824_v59 }
 0x39b   : > { %v1792_v27 = vpop.permute.xlu0 %1791  ;;  %v4719_v62 = vpack.c.bf16 %v1937_v41, %v1921_v10 }
 0x39c   : > { %v1795_v53 = vsel %vm1793_vm4, %v1788_v38, %v1792_v27  ;;  %v1825_v43 = vsel %vm1793_vm4, %v1792_v27, %v6514_v58 }
 0x39d   : > { %v1938_v13 = vmul.f32 %v1887_v63, %v1795_v53  ;;  %v1939_v34 = vmul.f32 %v1891_v23, %v1825_v43  ;;  %4720 = vmatprep.subr.bf16.mxu0 %v4719_v62 }
 0x39e   : > { %4722 = vmatpush1.bf16.msra.mxu0 %v4721_v49 }
 0x39f   : > { %v4733_v45 = vpack.c.bf16 %v1938_v13, %v1922_v50  ;;  %v4731_v19 = vpack.c.bf16 %v1939_v34, %v1923_v4 }
 0x3a1   : > { %4307 = vmatmul.mubr.msk.f32.vlgmr.msra.gmra.mrb[40].mxu0 %vm1968_vm5, %v6614_v20  ;;  %4732 = vmatprep.subr.bf16.mxu1 %v4731_v19 }
 0x3a2   : > { %4734 = vmatpush1.bf16.msra.mxu1 %v4733_v45  ;;  %2585 = vmatprep.mubr.f32.mxu0 %v7267_v39  ;;  %v7043_v45 = vld [vmem:[%s7172_s7] sm:$0x1] }
 0x3a5   : > { %4308 = vmatmul.mubr.msk.f32.gmra.mrb[42].mxu0 %vm1968_vm5, %v6637_v15  ;;  %4311 = vmatmul.mubr.msk.f32.vlgmr.msra.gmra.mrb[40].mxu1 %vm1968_vm5, %v6614_v20 }
 0x3a6   : > { %2591 = vmatprep.mubr.f32.mxu0 %v7267_v39  ;;  %2674 = vmatprep.mubr.f32.mxu1 %v7267_v39 }
 0x3a9   : > { %4309 = vmatmul.mubr.msk.f32.gmra.mrb[44].mxu0 %vm1968_vm5, %v6664_v16  ;;  %4312 = vmatmul.mubr.msk.f32.gmra.mrb[42].mxu1 %vm1968_vm5, %v6637_v15  ;;  %v7016_v20 = vpop.permute.xlu1 %1950 }
 0x3aa   : > { %2597 = vmatprep.mubr.f32.mxu0 %v7267_v39  ;;  %2680 = vmatprep.mubr.f32.mxu1 %v7267_v39 }
 0x3ac   : > { %v7018_v15 = vpop.permute.xlu0 %1955 }
 0x3ad   : > { %4310 = vmatmul.mubr.msk.f32.gmra.mrb[46].mxu0 %vm1968_vm5, %v6702_v60  ;;  %4313 = vmatmul.mubr.msk.f32.gmra.mrb[44].mxu1 %vm1968_vm5, %v6664_v16  ;;  %v7028_v17 = vpop.permute.xlu1 %1960 }
 0x3ae   : > { %2686 = vmatprep.mubr.f32.mxu1 %v7267_v39  ;;  %2826 = vmatprep.mubr.f32.mxu0 %v7267_v39 }
 0x3b0   : > { %v7031_v57 = vpop.permute.xlu0 %1965 }
 0x3b1   : > { %4314 = vmatmul.mubr.msk.f32.gmra.mrb[46].mxu1 %vm1968_vm5, %v6702_v60 }
 0x3b2   : > { %2897 = vmatprep.mubr.f32.mxu1 %v7267_v39 }
 0x3e2   : > { %v2136_v22 = vpop.f32.mrb[16].mxu1 }
 0x3e3   : > { %v2138_v58 = vpop.f32.mrb[17].mxu1  ;;  %v2137_v51 = vadd.f32 %v2136_v22, %v7016_v20 }
 0x3e4   : > { %v2139_v16 = vadd.f32 %v2138_v58, %v7016_v20 }
 0x3e5   : > { %v2047_v2 = vpop.f32.mrb[16].mxu0  ;;  %v2695_v29 = vmax.f32 %v2137_v51, 0.0 }
 0x3e6   : > { %v2049_v61 = vpop.f32.mrb[17].mxu0  ;;  %v2142_v40 = vpop.f32.mrb[18].mxu1  ;;  %v2048_v60 = vadd.f32 %v2047_v2, %v7016_v20  ;;  %v2696_v56 = vmax.f32 %v2139_v16, 0.0 }
 0x3e7   : > { %v2143_v0 = vadd.f32 %v2142_v40, %v7018_v15  ;;  %v2144_v25 = vpop.f32.mrb[19].mxu1  ;;  %v2050_v21 = vadd.f32 %v2049_v61, %v7016_v20 }
 0x3e8   : > { %v2145_v11 = vadd.f32 %v2144_v25, %v7018_v15  ;;  %v2693_v6 = vmax.f32 %v2048_v60, 0.0 }
 0x3e9   : > { %v2711_v54 = vmax.f32 %v2143_v0, 0.0  ;;  %v2053_v7 = vpop.f32.mrb[18].mxu0  ;;  %v2694_v1 = vmax.f32 %v2050_v21, 0.0 }
 0x3ea   : > { %v2712_v44 = vmax.f32 %v2145_v11, 0.0  ;;  %v2054_v3 = vadd.f32 %v2053_v7, %v7018_v15  ;;  %v2055_v37 = vpop.f32.mrb[19].mxu0  ;;  %v2148_v35 = vpop.f32.mrb[20].mxu1 }
 0x3eb   : > { %v4745_v36 = vpack.c.bf16 %v2711_v54, %v2695_v29  ;;  %v2056_v30 = vadd.f32 %v2055_v37, %v7018_v15  ;;  %v2150_v55 = vpop.f32.mrb[21].mxu1  ;;  %v2149_v33 = vadd.f32 %v2148_v35, %v7028_v17 }
 0x3ec   : > { %v4743_v48 = vpack.c.bf16 %v2712_v44, %v2696_v56  ;;  %v2709_v18 = vmax.f32 %v2054_v3, 0.0  ;;  %v2151_v28 = vadd.f32 %v2150_v55, %v7028_v17 }
 0x3ed   : > { %v2710_v9 = vmax.f32 %v2056_v30, 0.0  ;;  %v2059_v5 = vpop.f32.mrb[20].mxu0  ;;  %v2727_v41 = vmax.f32 %v2149_v33, 0.0 }
 0x3ee   : > { %v4737_v26 = vpack.c.bf16 %v2709_v18, %v2693_v6  ;;  %v2061_v32 = vpop.f32.mrb[21].mxu0  ;;  %4744 = vmatprep.subr.bf16.mxu1 %v4743_v48  ;;  %v2060_v46 = vadd.f32 %v2059_v5, %v7028_v17  ;;  %v2728_v14 = vmax.f32 %v2151_v28, 0.0 }
 0x3ef   : > { %v4735_v52 = vpack.c.bf16 %v2710_v9, %v2694_v1  ;;  %v2154_v24 = vpop.f32.mrb[22].mxu1  ;;  %4746 = vmatpush1.bf16.msra.mxu1 %v4745_v36  ;;  %v2062_v42 = vadd.f32 %v2061_v32, %v7028_v17 }
 0x3f0   : > { %v2155_v38 = vadd.f32 %v2154_v24, %v7031_v57  ;;  %v2156_v12 = vpop.f32.mrb[23].mxu1  ;;  %v2725_v62 = vmax.f32 %v2060_v46, 0.0 }
 0x3f1   : > { %v2157_v8 = vadd.f32 %v2156_v12, %v7031_v57  ;;  %v2065_v10 = vpop.f32.mrb[22].mxu0  ;;  %4736 = vmatprep.subr.bf16.mxu0 %v4735_v52  ;;  %v2726_v43 = vmax.f32 %v2062_v42, 0.0 }
 0x3f2   : > { %v2743_v63 = vmax.f32 %v2155_v38, 0.0  ;;  %v2066_v23 = vadd.f32 %v2065_v10, %v7031_v57  ;;  %v2067_v31 = vpop.f32.mrb[23].mxu0  ;;  %4738 = vmatpush1.bf16.msra.mxu0 %v4737_v26 }
 0x3f3   : > { %v2744_v59 = vmax.f32 %v2157_v8, 0.0  ;;  %v2068_v27 = vadd.f32 %v2067_v31, %v7031_v57 }
 0x3f4   : > { %v4749_v49 = vpack.c.bf16 %v2743_v63, %v2727_v41  ;;  %v2741_v53 = vmax.f32 %v2066_v23, 0.0 }
 0x3f5   : > { %v4747_v50 = vpack.c.bf16 %v2744_v59, %v2728_v14  ;;  %v2742_v4 = vmax.f32 %v2068_v27, 0.0 }
 0x3f6   : > { %v4741_v13 = vpack.c.bf16 %v2741_v53, %v2725_v62 }
 0x3f7   : > { %v4739_v34 = vpack.c.bf16 %v2742_v4, %v2726_v43  ;;  %4748 = vmatprep.subr.bf16.mxu1 %v4747_v50 }
 0x3f8   : > { %4750 = vmatpush1.bf16.msra.mxu1 %v4749_v49 }
 0x3f9   : > { %4740 = vmatprep.subr.bf16.mxu0 %v4739_v34 }
 0x3fa   : > { %4742 = vmatpush1.bf16.msra.mxu0 %v4741_v13 }
 0x3fb   : > { %4316 = vmatmul.mubr.msk.f32.vlgmr.msra.gmra.mrb[48].mxu1 %vm2758_vm6, %v7043_v45 }
 0x3fc   : > { %3039 = vmatprep.mubr.f32.mxu1 %v7267_v39 }
 0x3fd   : > { %4315 = vmatmul.mubr.msk.f32.vlgmr.msra.gmra.mrb[48].mxu0 %vm2758_vm6, %v7043_v45 }
 0x3fe   : > { %2968 = vmatprep.mubr.f32.mxu0 %v7267_v39 }
 0x402   : > { %v2225_v19 = vpop.f32.mrb[24].mxu0 }
 0x403   : > { %v2227_v22 = vpop.f32.mrb[25].mxu0  ;;  %v2226_v58 = vadd.f32 %v2225_v19, %v7016_v20 }
 0x404   : > { %v2228_v51 = vadd.f32 %v2227_v22, %v7016_v20 }
 0x405   : > { %v2697_v0 = vmax.f32 %v2226_v58, 0.0 }
 0x406   : > { %v2231_v2 = vpop.f32.mrb[26].mxu0  ;;  %v2698_v60 = vmax.f32 %v2228_v51, 0.0 }
 0x407   : > { %v2232_v16 = vadd.f32 %v2231_v2, %v7018_v15  ;;  %v2233_v61 = vpop.f32.mrb[27].mxu0 }
 0x408   : > { %v2234_v40 = vadd.f32 %v2233_v61, %v7018_v15 }
 0x409   : > { %v2713_v25 = vmax.f32 %v2232_v16, 0.0 }
 0x40a   : > { %v2714_v11 = vmax.f32 %v2234_v40, 0.0  ;;  %v2237_v29 = vpop.f32.mrb[28].mxu0  ;;  %v2314_v21 = vpop.f32.mrb[24].mxu1 }
 0x40b   : > { %v4753_v54 = vpack.c.bf16 %v2713_v25, %v2697_v0  ;;  %v2239_v7 = vpop.f32.mrb[29].mxu0  ;;  %v2316_v56 = vpop.f32.mrb[25].mxu1  ;;  %v2238_v3 = vadd.f32 %v2237_v29, %v7028_v17  ;;  %v2315_v37 = vadd.f32 %v2314_v21, %v7016_v20 }
 0x40c   : > { %v4751_v44 = vpack.c.bf16 %v2714_v11, %v2698_v60  ;;  %v2240_v35 = vadd.f32 %v2239_v7, %v7028_v17  ;;  %v2317_v36 = vadd.f32 %v2316_v56, %v7016_v20 }
 0x40d   : > { %v2729_v26 = vmax.f32 %v2238_v3, 0.0  ;;  %v2699_v33 = vmax.f32 %v2315_v37, 0.0 }
 0x40e   : > { %v2243_v30 = vpop.f32.mrb[30].mxu0  ;;  %v2320_v55 = vpop.f32.mrb[26].mxu1  ;;  %4752 = vmatprep.subr.bf16.mxu0 %v4751_v44  ;;  %v2730_v28 = vmax.f32 %v2240_v35, 0.0  ;;  %v2700_v24 = vmax.f32 %v2317_v36, 0.0 }
 0x40f   : > { %v2244_v6 = vadd.f32 %v2243_v30, %v7031_v57  ;;  %v2321_v48 = vadd.f32 %v2320_v55, %v7018_v15  ;;  %v2245_v18 = vpop.f32.mrb[31].mxu0  ;;  %v2322_v1 = vpop.f32.mrb[27].mxu1  ;;  %4754 = vmatpush1.bf16.msra.mxu0 %v4753_v54 }
 0x410   : > { %v2246_v9 = vadd.f32 %v2245_v18, %v7031_v57  ;;  %v2323_v5 = vadd.f32 %v2322_v1, %v7018_v15 }
 0x411   : > { %v2745_v32 = vmax.f32 %v2244_v6, 0.0  ;;  %v2715_v52 = vmax.f32 %v2321_v48, 0.0 }
 0x412   : > { %v2746_v46 = vmax.f32 %v2246_v9, 0.0  ;;  %v2716_v38 = vmax.f32 %v2323_v5, 0.0  ;;  %v2326_v12 = vpop.f32.mrb[28].mxu1 }
 0x413   : > { %v4757_v42 = vpack.c.bf16 %v2745_v32, %v2729_v26  ;;  %v4761_v8 = vpack.c.bf16 %v2715_v52, %v2699_v33  ;;  %v2328_v10 = vpop.f32.mrb[29].mxu1  ;;  %v2327_v23 = vadd.f32 %v2326_v12, %v7028_v17 }
 0x414   : > { %v4755_v41 = vpack.c.bf16 %v2746_v46, %v2730_v28  ;;  %v4759_v63 = vpack.c.bf16 %v2716_v38, %v2700_v24  ;;  %v2329_v31 = vadd.f32 %v2328_v10, %v7028_v17 }
 0x415   : > { %v2731_v49 = vmax.f32 %v2327_v23, 0.0 }
 0x416   : > { %v2332_v14 = vpop.f32.mrb[30].mxu1  ;;  %4756 = vmatprep.subr.bf16.mxu0 %v4755_v41  ;;  %4760 = vmatprep.subr.bf16.mxu1 %v4759_v63  ;;  %v2732_v43 = vmax.f32 %v2329_v31, 0.0 }
 0x417   : > { %v2333_v59 = vadd.f32 %v2332_v14, %v7031_v57  ;;  %v2334_v27 = vpop.f32.mrb[31].mxu1  ;;  %4758 = vmatpush1.bf16.msra.mxu0 %v4757_v42  ;;  %4762 = vmatpush1.bf16.msra.mxu1 %v4761_v8 }
 0x418   : > { %v2335_v62 = vadd.f32 %v2334_v27, %v7031_v57 }
 0x419   : > { %v2747_v53 = vmax.f32 %v2333_v59, 0.0 }
 0x41a   : > { %v2748_v50 = vmax.f32 %v2335_v62, 0.0  ;;  %4317 = vmatmul.mubr.msk.f32.vlgmr.msra.gmra.mrb[50].mxu0 %vm2758_vm6, %v7043_v45 }
 0x41b   : > { %v4765_v4 = vpack.c.bf16 %v2747_v53, %v2731_v49  ;;  %3110 = vmatprep.mubr.f32.mxu0 %v7267_v39 }
 0x41c   : > { %v4763_v13 = vpack.c.bf16 %v2748_v50, %v2732_v43 }
 0x41e   : > { %4764 = vmatprep.subr.bf16.mxu1 %v4763_v13 }
 0x41f   : > { %4766 = vmatpush1.bf16.msra.mxu1 %v4765_v4 }
 0x422   : > { %v2403_v34 = vpop.f32.mrb[32].mxu0  ;;  %4318 = vmatmul.mubr.msk.f32.vlgmr.msra.gmra.mrb[50].mxu1 %vm2758_vm6, %v7043_v45 }
 0x423   : > { %v2405_v19 = vpop.f32.mrb[33].mxu0  ;;  %3181 = vmatprep.mubr.f32.mxu1 %v7267_v39  ;;  %v2404_v22 = vadd.f32 %v2403_v34, %v7016_v20 }
 0x424   : > { %v2406_v58 = vadd.f32 %v2405_v19, %v7016_v20 }
 0x425   : > { %v2701_v40 = vmax.f32 %v2404_v22, 0.0 }
 0x426   : > { %v2409_v51 = vpop.f32.mrb[34].mxu0  ;;  %v2702_v25 = vmax.f32 %v2406_v58, 0.0 }
 0x427   : > { %v2410_v2 = vadd.f32 %v2409_v51, %v7018_v15  ;;  %v2411_v16 = vpop.f32.mrb[35].mxu0 }
 0x428   : > { %v2412_v61 = vadd.f32 %v2411_v16, %v7018_v15 }
 0x429   : > { %v2717_v0 = vmax.f32 %v2410_v2, 0.0 }
 0x42a   : > { %v2718_v60 = vmax.f32 %v2412_v61, 0.0  ;;  %v2415_v11 = vpop.f32.mrb[36].mxu0 }
 0x42b   : > { %v4769_v29 = vpack.c.bf16 %v2717_v0, %v2701_v40  ;;  %v2417_v21 = vpop.f32.mrb[37].mxu0  ;;  %v2416_v7 = vadd.f32 %v2415_v11, %v7028_v17 }
 0x42c   : > { %v4767_v54 = vpack.c.bf16 %v2718_v60, %v2702_v25  ;;  %v2418_v56 = vadd.f32 %v2417_v21, %v7028_v17 }
 0x42d   : > { %v2733_v36 = vmax.f32 %v2416_v7, 0.0 }
 0x42e   : > { %v2421_v44 = vpop.f32.mrb[38].mxu0  ;;  %4768 = vmatprep.subr.bf16.mxu0 %v4767_v54  ;;  %v2734_v55 = vmax.f32 %v2418_v56, 0.0 }
 0x42f   : > { %v2422_v3 = vadd.f32 %v2421_v44, %v7031_v57  ;;  %v2423_v37 = vpop.f32.mrb[39].mxu0  ;;  %4770 = vmatpush1.bf16.msra.mxu0 %v4769_v29 }
 0x430   : > { %v2424_v35 = vadd.f32 %v2423_v37, %v7031_v57 }
 0x431   : > { %v2749_v30 = vmax.f32 %v2422_v3, 0.0 }
 0x432   : > { %v2750_v6 = vmax.f32 %v2424_v35, 0.0 }
 0x433   : > { %v4773_v48 = vpack.c.bf16 %v2749_v30, %v2733_v36 }
 0x434   : > { %v4771_v18 = vpack.c.bf16 %v2750_v6, %v2734_v55 }
 0x436   : > { %4772 = vmatprep.subr.bf16.mxu0 %v4771_v18 }
 0x437   : > { %4774 = vmatpush1.bf16.msra.mxu0 %v4773_v48 }
 0x43a   : > { %4319 = vmatmul.mubr.msk.f32.vlgmr.msra.gmra.mrb[52].mxu0 %vm2758_vm6, %v7043_v45 }
 0x43b   : > { %3252 = vmatprep.mubr.f32.mxu0 %v7267_v39 }
 0x45c   : > { %v2492_v1 = vpop.f32.mrb[32].mxu1 }
 0x45d   : > { %v2494_v9 = vpop.f32.mrb[33].mxu1  ;;  %v2493_v5 = vadd.f32 %v2492_v1, %v7016_v20 }
 0x45e   : > { %v2495_v26 = vadd.f32 %v2494_v9, %v7016_v20 }
 0x45f   : > { %v2703_v24 = vmax.f32 %v2493_v5, 0.0 }
 0x460   : > { %v2498_v33 = vpop.f32.mrb[34].mxu1  ;;  %v2704_v38 = vmax.f32 %v2495_v26, 0.0 }
 0x461   : > { %v2499_v32 = vadd.f32 %v2498_v33, %v7018_v15  ;;  %v2500_v52 = vpop.f32.mrb[35].mxu1 }
 0x462   : > { %v2501_v28 = vadd.f32 %v2500_v52, %v7018_v15 }
 0x463   : > { %v2719_v46 = vmax.f32 %v2499_v32, 0.0 }
 0x464   : > { %v2720_v12 = vmax.f32 %v2501_v28, 0.0  ;;  %v2504_v42 = vpop.f32.mrb[36].mxu1 }
 0x465   : > { %v4777_v8 = vpack.c.bf16 %v2719_v46, %v2703_v24  ;;  %v2506_v10 = vpop.f32.mrb[37].mxu1  ;;  %v2505_v63 = vadd.f32 %v2504_v42, %v7028_v17  ;;  %v3346_v46 = vld [vmem:[#allocation8 + $0x80] sm:$0xff] }
 0x466   : > { %v4775_v41 = vpack.c.bf16 %v2720_v12, %v2704_v38  ;;  %v2507_v23 = vadd.f32 %v2506_v10, %v7028_v17  ;;  %v3347_v38 = vld [vmem:[#allocation8 + $0x88] sm:$0xff] }
 0x467   : > { %v2735_v62 = vmax.f32 %v2505_v63, 0.0 }
 0x468   : > { %v2510_v31 = vpop.f32.mrb[38].mxu1  ;;  %4776 = vmatprep.subr.bf16.mxu1 %v4775_v41  ;;  %v2736_v53 = vmax.f32 %v2507_v23, 0.0 }
 0x469   : > { %v2511_v14 = vadd.f32 %v2510_v31, %v7031_v57  ;;  %v2512_v59 = vpop.f32.mrb[39].mxu1  ;;  %4778 = vmatpush1.bf16.msra.mxu1 %v4777_v8 }
 0x46a   : > { %v2513_v27 = vadd.f32 %v2512_v59, %v7031_v57  ;;  %v4799_v59 = vpack.c.bf16 %v3347_v38, %v3346_v46 }
 0x46b   : > { %v2751_v49 = vmax.f32 %v2511_v14, 0.0 }
 0x46c   : > { %v2752_v43 = vmax.f32 %v2513_v27, 0.0  ;;  %v3330_v27 = vld [vmem:[#allocation8] sm:$0xff] }
 0x46d   : > { %v4781_v50 = vpack.c.bf16 %v2751_v49, %v2735_v62  ;;  %v3331_v62 = vld [vmem:[#allocation8 + $0x8] sm:$0xff]  ;;  %v3378_v49 = vld [vmem:[#allocation8 + $0x180] sm:$0xff] }
 0x46e   : > { %v4779_v4 = vpack.c.bf16 %v2752_v43, %v2736_v53 }
 0x470   : > { %4780 = vmatprep.subr.bf16.mxu1 %v4779_v4  ;;  %v3348_v4 = vld [vmem:[#allocation8 + $0x90] sm:$0xff] }
 0x471   : > { %4782 = vmatpush1.bf16.msra.mxu1 %v4781_v50  ;;  %v3379_v50 = vld [vmem:[#allocation8 + $0x188] sm:$0xff] }
 0x474   : > { %v2581_v13 = vpop.f32.mrb[40].mxu0  ;;  %4320 = vmatmul.mubr.msk.f32.vlgmr.msra.gmra.mrb[52].mxu1 %vm2758_vm6, %v7043_v45 }
 0x475   : > { %v2583_v34 = vpop.f32.mrb[41].mxu0  ;;  %3323 = vmatprep.mubr.f32.mxu1 %v7267_v39  ;;  %v2582_v19 = vadd.f32 %v2581_v13, %v7016_v20  ;;  %v3349_v13 = vld [vmem:[#allocation8 + $0x98] sm:$0xff] }
 0x476   : > { %v2584_v22 = vadd.f32 %v2583_v34, %v7016_v20 }
 0x477   : > { %v2705_v0 = vmax.f32 %v2582_v19, 0.0 }
 0x478   : > { %v2587_v58 = vpop.f32.mrb[42].mxu0  ;;  %v2670_v51 = vpop.f32.mrb[40].mxu1  ;;  %v2706_v11 = vmax.f32 %v2584_v22, 0.0  ;;  %v4801_v22 = vpack.c.bf16 %v3331_v62, %v3330_v27 }
 0x479   : > { %v2588_v2 = vadd.f32 %v2587_v58, %v7018_v15  ;;  %v2589_v16 = vpop.f32.mrb[43].mxu0  ;;  %v2672_v61 = vpop.f32.mrb[41].mxu1  ;;  %v2671_v60 = vadd.f32 %v2670_v51, %v7016_v20  ;;  %v3362_v58 = vld [vmem:[#allocation8 + $0x100] sm:$0xff]  ;;  %v3363_v51 = vld [vmem:[#allocation8 + $0x108] sm:$0xff] }
 0x47a   : > { %v2590_v40 = vadd.f32 %v2589_v16, %v7018_v15  ;;  %v2673_v39 = vadd.f32 %v2672_v61, %v7016_v20  ;;  %v4803_v16 = vpack.c.bf16 %v3349_v13, %v3348_v4  ;;  %v3332_v61 = vld [vmem:[#allocation8 + $0x10] sm:$0xff]  ;;  %v3358_v4 = vld [vmem:[#allocation8 + $0xe0] sm:$0xff]  ;;  %v3359_v13 = vld [vmem:[#allocation8 + $0xe8] sm:$0xff] }
 0x47b   : > { %v2721_v25 = vmax.f32 %v2588_v2, 0.0  ;;  %v2707_v36 = vmax.f32 %v2671_v60, 0.0  ;;  %v3350_v60 = vld [vmem:[#allocation8 + $0xa0] sm:$0xff] }
 0x47c   : > { %v2722_v29 = vmax.f32 %v2590_v40, 0.0  ;;  %v2593_v21 = vpop.f32.mrb[44].mxu0  ;;  %v2676_v54 = vpop.f32.mrb[42].mxu1  ;;  %v2708_v6 = vmax.f32 %v2673_v39, 0.0  ;;  %v3333_v40 = vld [vmem:[#allocation8 + $0x18] sm:$0xff] }
 0x47d   : > { %v4785_v7 = vpack.c.bf16 %v2721_v25, %v2705_v0  ;;  %v2677_v56 = vadd.f32 %v2676_v54, %v7018_v15  ;;  %v2595_v44 = vpop.f32.mrb[45].mxu0  ;;  %v2678_v3 = vpop.f32.mrb[43].mxu1  ;;  %v2594_v30 = vadd.f32 %v2593_v21, %v7028_v17  ;;  %v3380_v0 = vld [vmem:[#allocation8 + $0x190] sm:$0xff]  ;;  %v3381_v25 = vld [vmem:[#allocation8 + $0x198] sm:$0xff]  ;;  %v4805_v39 = vpack.c.bf16 %v3333_v40, %v3332_v61  ;;  %v3391_v61 = vld [vmem:[#allocation8 + $0x1e8] sm:$0xff] }
 0x47e   : > { %v4783_v37 = vpack.c.bf16 %v2722_v29, %v2706_v11  ;;  %v2679_v35 = vadd.f32 %v2678_v3, %v7018_v15  ;;  %v2596_v48 = vadd.f32 %v2595_v44, %v7028_v17  ;;  %v3351_v11 = vld [vmem:[#allocation8 + $0xa8] sm:$0xff]  ;;  %v4833_v29 = vpack.c.bf16 %v3363_v51, %v3362_v58  ;;  %v3364_v21 = vld [vmem:[#allocation8 + $0x110] sm:$0xff]  ;;  %v3365_v54 = vld [vmem:[#allocation8 + $0x118] sm:$0xff] }
 0x47f   : > { %v2723_v55 = vmax.f32 %v2677_v56, 0.0  ;;  %v2737_v52 = vmax.f32 %v2594_v30, 0.0  ;;  %v4807_v56 = vpack.c.bf16 %v3351_v11, %v3350_v60  ;;  %v3334_v44 = vld [vmem:[#allocation8 + $0x20] sm:$0xff]  ;;  %v3335_v3 = vld [vmem:[#allocation8 + $0x28] sm:$0xff]  ;;  %v3353_v30 = vld [vmem:[#allocation8 + $0xb8] sm:$0xff]  ;;  %v4823_v51 = vpack.c.bf16 %v3359_v13, %v3358_v4 }
 0x480   : > { %v2724_v18 = vmax.f32 %v2679_v35, 0.0  ;;  %v2599_v1 = vpop.f32.mrb[46].mxu0  ;;  %v2682_v20 = vpop.f32.mrb[44].mxu1  ;;  %4784 = vmatprep.subr.bf16.mxu0 %v4783_v37  ;;  %v2738_v12 = vmax.f32 %v2596_v48, 0.0  ;;  %v3382_v37 = vld [vmem:[#allocation8 + $0x1a0] sm:$0xff]  ;;  %v3383_v35 = vld [vmem:[#allocation8 + $0x1a8] sm:$0xff] }
 0x481   : > { %v4793_v9 = vpack.c.bf16 %v2723_v55, %v2707_v36  ;;  %v2600_v5 = vadd.f32 %v2599_v1, %v7031_v57  ;;  %v2601_v26 = vpop.f32.mrb[47].mxu0  ;;  %v2684_v33 = vpop.f32.mrb[45].mxu1  ;;  %4786 = vmatpush1.bf16.msra.mxu0 %v4785_v7  ;;  %v2683_v24 = vadd.f32 %v2682_v20, %v7028_v17  ;;  %v4835_v7 = vpack.c.bf16 %v3381_v25, %v3380_v0  ;;  %v3352_v36 = vld [vmem:[#allocation8 + $0xb0] sm:$0xff]  ;;  %v3366_v48 = vld [vmem:[#allocation8 + $0x120] sm:$0xff]  ;;  %v3361_v0 = vld [vmem:[#allocation8 + $0xf8] sm:$0xff] }
 0x482   : > { %v4791_v32 = vpack.c.bf16 %v2724_v18, %v2708_v6  ;;  %v2602_v15 = vadd.f32 %v2601_v26, %v7031_v57  ;;  %v2685_v8 = vadd.f32 %v2684_v33, %v7028_v17  ;;  %v4837_v55 = vpack.c.bf16 %v3365_v54, %v3364_v21  ;;  %v3367_v18 = vld [vmem:[#allocation8 + $0x128] sm:$0xff]  ;;  %v3384_v26 = vld [vmem:[#allocation8 + $0x1b0] sm:$0xff]  ;;  %v3385_v33 = vld [vmem:[#allocation8 + $0x1b8] sm:$0xff] }
 0x483   : > { %v2753_v28 = vmax.f32 %v2600_v5, 0.0  ;;  %v2739_v53 = vmax.f32 %v2683_v24, 0.0  ;;  %v4809_v6 = vpack.c.bf16 %v3335_v3, %v3334_v44  ;;  %v4839_v1 = vpack.c.bf16 %v3383_v35, %v3382_v37  ;;  %v3337_v5 = vld [vmem:[#allocation8 + $0x38] sm:$0xff]  ;;  %v3360_v40 = vld [vmem:[#allocation8 + $0xf0] sm:$0xff]  ;;  %v3374_v11 = vld [vmem:[#allocation8 + $0x160] sm:$0xff] }
 0x484   : > { %v2754_v42 = vmax.f32 %v2602_v15, 0.0  ;;  %v2688_v10 = vpop.f32.mrb[46].mxu1  ;;  %4792 = vmatprep.subr.bf16.mxu1 %v4791_v32  ;;  %v2740_v17 = vmax.f32 %v2685_v8, 0.0  ;;  %v4811_v20 = vpack.c.bf16 %v3353_v30, %v3352_v36  ;;  %v3354_v32 = vld [vmem:[#allocation8 + $0xc0] sm:$0xff]  ;;  %v3355_v15 = vld [vmem:[#allocation8 + $0xc8] sm:$0xff]  ;;  %v3369_v24 = vld [vmem:[#allocation8 + $0x138] sm:$0xff]  ;;  %v4843_v46 = vpack.c.bf16 %v3385_v33, %v3384_v26 }
 0x485   : > { %v4789_v41 = vpack.c.bf16 %v2753_v28, %v2737_v52  ;;  %v2689_v63 = vadd.f32 %v2688_v10, %v7031_v57  ;;  %v2690_v23 = vpop.f32.mrb[47].mxu1  ;;  %4794 = vmatpush1.bf16.msra.mxu1 %v4793_v9  ;;  %v3336_v9 = vld [vmem:[#allocation8 + $0x30] sm:$0xff]  ;;  %v4841_v52 = vpack.c.bf16 %v3367_v18, %v3366_v48  ;;  %v4815_v38 = vpack.c.bf16 %v3355_v15, %v3354_v32  ;;  %v3386_v8 = vld [vmem:[#allocation8 + $0x1c0] sm:$0xff]  ;;  %v3387_v10 = vld [vmem:[#allocation8 + $0x1c8] sm:$0xff] }
 0x486   : > { %v4787_v31 = vpack.c.bf16 %v2754_v42, %v2738_v12  ;;  %v2691_v14 = vadd.f32 %v2690_v23, %v7031_v57  ;;  %v4831_v57 = vpack.c.bf16 %v3379_v50, %v3378_v49  ;;  %v3368_v28 = vld [vmem:[#allocation8 + $0x130] sm:$0xff]  ;;  %v3338_v12 = vld [vmem:[#allocation8 + $0x40] sm:$0xff]  ;;  %v3339_v42 = vld [vmem:[#allocation8 + $0x48] sm:$0xff]  ;;  %v4847_v27 = vpack.c.bf16 %v3387_v10, %v3386_v8 }
 0x487   : > { %v2755_v43 = vmax.f32 %v2689_v63, 0.0  ;;  %v3357_v63 = vld [vmem:[#allocation8 + $0xd8] sm:$0xff]  ;;  %v4845_v23 = vpack.c.bf16 %v3369_v24, %v3368_v28  ;;  %v3340_v49 = vld [vmem:[#allocation8 + $0x50] sm:$0xff]  ;;  %v4827_v21 = vpack.c.bf16 %v3361_v0, %v3360_v40  ;;  %v3410_v3 = vld [vmem:[#allocation8 + $0x280] sm:$0xff] }
 0x488   : > { %v2756_v34 = vmax.f32 %v2691_v14, 0.0  ;;  %4788 = vmatprep.subr.bf16.mxu0 %v4787_v31  ;;  %v4817_v31 = vpack.c.bf16 %v3339_v42, %v3338_v12  ;;  %v3370_v14 = vld [vmem:[#allocation8 + $0x140] sm:$0xff]  ;;  %v3389_v50 = vld [vmem:[#allocation8 + $0x1d8] sm:$0xff]  ;;  %v3344_v54 = vld [vmem:[#allocation8 + $0x70] sm:$0xff] }
 0x489   : > { %v4797_v19 = vpack.c.bf16 %v2755_v43, %v2739_v53  ;;  %4790 = vmatpush1.bf16.msra.mxu0 %v4789_v41  ;;  %v3356_v41 = vld [vmem:[#allocation8 + $0xd0] sm:$0xff]  ;;  %v3341_v53 = vld [vmem:[#allocation8 + $0x58] sm:$0xff]  ;;  %v3411_v37 = vld [vmem:[#allocation8 + $0x288] sm:$0xff] }
 0x48a   : > { %v4795_v2 = vpack.c.bf16 %v2756_v34, %v2740_v17  ;;  %4800 = vmatprep.subr.bf16.mxu0 %v4799_v59  ;;  %v3371_v59 = vld [vmem:[#allocation8 + $0x148] sm:$0xff]  ;;  %v4819_v62 = vpack.c.bf16 %v3357_v63, %v3356_v41  ;;  %v3388_v43 = vld [vmem:[#allocation8 + $0x1d0] sm:$0xff]  ;;  %v4821_v34 = vpack.c.bf16 %v3341_v53, %v3340_v49  ;;  %v3393_v44 = vld [vmem:[#allocation8 + $0x1f8] sm:$0xff]  ;;  %v4863_v48 = vpack.c.bf16 %v3411_v37, %v3410_v3 }
 0x48b   : > { %v4849_v17 = vpack.c.bf16 %v3371_v59, %v3370_v14  ;;  %v4851_v58 = vpack.c.bf16 %v3389_v50, %v3388_v43  ;;  %v3442_v18 = vld [vmem:[#allocation8 + $0x380] sm:$0xff]  ;;  %v3427_v26 = vld [vmem:[#allocation8 + $0x308] sm:$0xff]  ;;  %v3444_v33 = vld [vmem:[#allocation8 + $0x390] sm:$0xff] }
 0x48c   : > { %4321 = vmatmul.mubr.msk.f32.vlgmr.msra.gmra.mrb[54].mxu0 %vm2758_vm6, %v7043_v45  ;;  %4796 = vmatprep.subr.bf16.mxu1 %v4795_v2  ;;  %v3342_v2 = vld [vmem:[#allocation8 + $0x60] sm:$0xff]  ;;  %v3445_v32 = vld [vmem:[#allocation8 + $0x398] sm:$0xff]  ;;  %v3412_v28 = vld [vmem:[#allocation8 + $0x290] sm:$0xff] }
 0x48d   : > { %4798 = vmatpush1.bf16.msra.mxu1 %v4797_v19  ;;  %4802 = vmatpush3.bf16.msra.mxu0 %v4801_v22  ;;  %v3372_v19 = vld [vmem:[#allocation8 + $0x150] sm:$0xff]  ;;  %v3373_v22 = vld [vmem:[#allocation8 + $0x158] sm:$0xff]  ;;  %v3394_v15 = vld [vmem:[#allocation8 + $0x200] sm:$0xff]  ;;  %v4899_v12 = vpack.c.bf16 %v3445_v32, %v3444_v33 }
 0x48e   : > { %4832 = vmatprep.subr.bf16.mxu1 %v4831_v57  ;;  %4804 = vmatprep.subr.bf16.mxu0 %v4803_v16  ;;  %v3343_v57 = vld [vmem:[#allocation8 + $0x68] sm:$0xff]  ;;  %v3390_v16 = vld [vmem:[#allocation8 + $0x1e0] sm:$0xff]  ;;  %v4853_v25 = vpack.c.bf16 %v3373_v22, %v3372_v19  ;;  %v3413_v24 = vld [vmem:[#allocation8 + $0x298] sm:$0xff] }
 0x48f   : > { %v4825_v60 = vpack.c.bf16 %v3343_v57, %v3342_v2  ;;  %v3428_v42 = vld [vmem:[#allocation8 + $0x310] sm:$0xff]  ;;  %v3429_v8 = vld [vmem:[#allocation8 + $0x318] sm:$0xff]  ;;  %v3446_v63 = vld [vmem:[#allocation8 + $0x3a0] sm:$0xff]  ;;  %v4867_v14 = vpack.c.bf16 %v3413_v24, %v3412_v28 }
 0x490   : > { %4322 = vmatmul.mubr.msk.f32.vlgmr.msra.gmra.mrb[54].mxu1 %vm2758_vm6, %v7043_v45  ;;  %v4813_v45 = vpack.c.bf16 %v3337_v5, %v3336_v9  ;;  %v3426_v5 = vld [vmem:[#allocation8 + $0x300] sm:$0xff]  ;;  %v3396_v59 = vld [vmem:[#allocation8 + $0x210] sm:$0xff]  ;;  %v3415_v49 = vld [vmem:[#allocation8 + $0x2a8] sm:$0xff]  ;;  %v4901_v53 = vpack.c.bf16 %v3429_v8, %v3428_v42 }
 0x491   : > { %4834 = vmatpush3.bf16.msra.mxu1 %v4833_v29  ;;  %4806 = vmatpush3.bf16.msra.mxu0 %v4805_v39  ;;  %v3375_v29 = vld [vmem:[#allocation8 + $0x168] sm:$0xff]  ;;  %v4855_v39 = vpack.c.bf16 %v3391_v61, %v3390_v16  ;;  %v3430_v50 = vld [vmem:[#allocation8 + $0x320] sm:$0xff]  ;;  %v3417_v2 = vld [vmem:[#allocation8 + $0x2b8] sm:$0xff] }
 0x492   : > { %4836 = vmatprep.subr.bf16.mxu1 %v4835_v7  ;;  %4808 = vmatprep.subr.bf16.mxu0 %v4807_v56  ;;  %v3345_v7 = vld [vmem:[#allocation8 + $0x78] sm:$0xff]  ;;  %v3392_v56 = vld [vmem:[#allocation8 + $0x1f0] sm:$0xff]  ;;  %v4857_v35 = vpack.c.bf16 %v3375_v29, %v3374_v11  ;;  %v3431_v4 = vld [vmem:[#allocation8 + $0x328] sm:$0xff] }
 0x493   : > { %v4829_v36 = vpack.c.bf16 %v3345_v7, %v3344_v54  ;;  %v4859_v30 = vpack.c.bf16 %v3393_v44, %v3392_v56  ;;  %v3398_v22 = vld [vmem:[#allocation8 + $0x220] sm:$0xff]  ;;  %v4905_v57 = vpack.c.bf16 %v3431_v4, %v3430_v50  ;;  %v3432_v61 = vld [vmem:[#allocation8 + $0x330] sm:$0xff]  ;;  %v3433_v40 = vld [vmem:[#allocation8 + $0x338] sm:$0xff] }
 0x494   : > { %v3400_v29 = vld [vmem:[#allocation8 + $0x230] sm:$0xff]  ;;  %v3419_v54 = vld [vmem:[#allocation8 + $0x2c8] sm:$0xff]  ;;  %v4909_v7 = vpack.c.bf16 %v3433_v40, %v3432_v61  ;;  %v3434_v44 = vld [vmem:[#allocation8 + $0x340] sm:$0xff] }
 0x495   : > { %4838 = vmatpush3.bf16.msra.mxu1 %v4837_v55  ;;  %4810 = vmatpush3.bf16.msra.mxu0 %v4809_v6  ;;  %v3376_v55 = vld [vmem:[#allocation8 + $0x170] sm:$0xff]  ;;  %v3377_v6 = vld [vmem:[#allocation8 + $0x178] sm:$0xff]  ;;  %v3435_v3 = vld [vmem:[#allocation8 + $0x348] sm:$0xff] }
 0x496   : > { %4840 = vmatprep.subr.bf16.mxu1 %v4839_v1  ;;  %4812 = vmatprep.subr.bf16.mxu0 %v4811_v20  ;;  %v3443_v1 = vld [vmem:[#allocation8 + $0x388] sm:$0xff]  ;;  %v4861_v20 = vpack.c.bf16 %v3377_v6, %v3376_v55  ;;  %v3402_v55 = vld [vmem:[#allocation8 + $0x240] sm:$0xff] }
 0x497   : > { %v4895_v9 = vpack.c.bf16 %v3443_v1, %v3442_v18  ;;  %v3403_v6 = vld [vmem:[#allocation8 + $0x248] sm:$0xff]  ;;  %v3421_v18 = vld [vmem:[#allocation8 + $0x2d8] sm:$0xff]  ;;  %v4913_v1 = vpack.c.bf16 %v3435_v3, %v3434_v44  ;;  %v3454_v33 = vld [vmem:[#allocation8 + $0x3e0] sm:$0xff] }
 0x498   : > { %v3455_v32 = vld [vmem:[#allocation8 + $0x3e8] sm:$0xff]  ;;  %v3422_v28 = vld [vmem:[#allocation8 + $0x2e0] sm:$0xff]  ;;  %v3508_v3 = vld [vmem:[#allocation8 + $0x590] sm:$0xff] }
 0x499   : > { %4842 = vmatpush3.bf16.msra.mxu1 %v4841_v52  ;;  %4814 = vmatpush3.bf16.msra.mxu0 %v4813_v45  ;;  %v3395_v52 = vld [vmem:[#allocation8 + $0x208] sm:$0xff]  ;;  %v3506_v50 = vld [vmem:[#allocation8 + $0x580] sm:$0xff] }
 0x49a   : > { %4844 = vmatprep.subr.bf16.mxu1 %v4843_v46  ;;  %4816 = vmatprep.subr.bf16.mxu0 %v4815_v38  ;;  %v4897_v46 = vpack.c.bf16 %v3427_v26, %v3426_v5  ;;  %v4865_v41 = vpack.c.bf16 %v3395_v52, %v3394_v15  ;;  %v3437_v5 = vld [vmem:[#allocation8 + $0x358] sm:$0xff]  ;;  %v4881_v26 = vpack.c.bf16 %v3403_v6, %v3402_v55  ;;  %v3404_v52 = vld [vmem:[#allocation8 + $0x250] sm:$0xff]  ;;  %v3423_v24 = vld [vmem:[#allocation8 + $0x2e8] sm:$0xff] }
 0x49b   : > { %v3439_v42 = vld [vmem:[#allocation8 + $0x368] sm:$0xff]  ;;  %v3458_v61 = vld [vmem:[#allocation8 + $0x400] sm:$0xff] }
 0x49c   : > { %v3507_v4 = vld [vmem:[#allocation8 + $0x588] sm:$0xff]  ;;  %v3462_v55 = vld [vmem:[#allocation8 + $0x420] sm:$0xff] }
 0x49d   : > { %4846 = vmatpush3.bf16.msra.mxu1 %v4845_v23  ;;  %4818 = vmatpush3.bf16.msra.mxu0 %v4817_v31  ;;  %v3447_v23 = vld [vmem:[#allocation8 + $0x3a8] sm:$0xff] }
 0x49e   : > { %4848 = vmatprep.subr.bf16.mxu1 %v4847_v27  ;;  %4820 = vmatprep.subr.bf16.mxu0 %v4819_v62  ;;  %v3397_v27 = vld [vmem:[#allocation8 + $0x218] sm:$0xff]  ;;  %v3414_v62 = vld [vmem:[#allocation8 + $0x2a0] sm:$0xff]  ;;  %v4903_v43 = vpack.c.bf16 %v3447_v23, %v3446_v63  ;;  %v4887_v63 = vpack.c.bf16 %v3423_v24, %v3422_v28  ;;  %v3459_v40 = vld [vmem:[#allocation8 + $0x408] sm:$0xff] }
 0x49f   : > { %v4869_v13 = vpack.c.bf16 %v3397_v27, %v3396_v59  ;;  %v4871_v19 = vpack.c.bf16 %v3415_v49, %v3414_v62  ;;  %v3406_v23 = vld [vmem:[#allocation8 + $0x260] sm:$0xff]  ;;  %v3425_v59 = vld [vmem:[#allocation8 + $0x2f8] sm:$0xff]  ;;  %v3440_v49 = vld [vmem:[#allocation8 + $0x370] sm:$0xff] }
 0x4a0   : > { %v3491_v44 = vld [vmem:[#allocation8 + $0x508] sm:$0xff]  ;;  %v3465_v28 = vld [vmem:[#allocation8 + $0x438] sm:$0xff]  ;;  %v3482_v24 = vld [vmem:[#allocation8 + $0x4c0] sm:$0xff] }
 0x4a1   : > { %4850 = vmatpush3.bf16.msra.mxu1 %v4849_v17  ;;  %4822 = vmatpush3.bf16.msra.mxu0 %v4821_v34  ;;  %v3448_v17 = vld [vmem:[#allocation8 + $0x3b0] sm:$0xff]  ;;  %v3449_v34 = vld [vmem:[#allocation8 + $0x3b8] sm:$0xff]  ;;  %v3463_v6 = vld [vmem:[#allocation8 + $0x428] sm:$0xff] }
 0x4a2   : > { %4852 = vmatprep.subr.bf16.mxu1 %v4851_v58  ;;  %4824 = vmatprep.subr.bf16.mxu0 %v4823_v51  ;;  %v3399_v58 = vld [vmem:[#allocation8 + $0x228] sm:$0xff]  ;;  %v3416_v51 = vld [vmem:[#allocation8 + $0x2b0] sm:$0xff]  ;;  %v4907_v16 = vpack.c.bf16 %v3449_v34, %v3448_v17  ;;  %v3409_v34 = vld [vmem:[#allocation8 + $0x278] sm:$0xff] }
 0x4a3   : > { %v4873_v0 = vpack.c.bf16 %v3399_v58, %v3398_v22  ;;  %v4875_v11 = vpack.c.bf16 %v3417_v2, %v3416_v51  ;;  %v3408_v17 = vld [vmem:[#allocation8 + $0x270] sm:$0xff]  ;;  %v3475_v22 = vld [vmem:[#allocation8 + $0x488] sm:$0xff]  ;;  %v4959_v51 = vpack.c.bf16 %v3507_v4, %v3506_v50  ;;  %v3514_v50 = vld [vmem:[#allocation8 + $0x5c0] sm:$0xff] }
 0x4a4   : > { %v4893_v2 = vpack.c.bf16 %v3409_v34, %v3408_v17  ;;  %v3515_v4 = vld [vmem:[#allocation8 + $0x5c8] sm:$0xff]  ;;  %v3468_v34 = vld [vmem:[#allocation8 + $0x450] sm:$0xff] }
 0x4a5   : > { %4854 = vmatpush3.bf16.msra.mxu1 %v4853_v25  ;;  %4826 = vmatpush3.bf16.msra.mxu0 %v4825_v60  ;;  %v3450_v25 = vld [vmem:[#allocation8 + $0x3c0] sm:$0xff]  ;;  %v3451_v60 = vld [vmem:[#allocation8 + $0x3c8] sm:$0xff] }
 0x4a6   : > { %4856 = vmatprep.subr.bf16.mxu1 %v4855_v39  ;;  %4828 = vmatprep.subr.bf16.mxu0 %v4827_v21  ;;  %v3401_v39 = vld [vmem:[#allocation8 + $0x238] sm:$0xff]  ;;  %v3418_v21 = vld [vmem:[#allocation8 + $0x2c0] sm:$0xff]  ;;  %v4911_v56 = vpack.c.bf16 %v3451_v60, %v3450_v25  ;;  %v3476_v25 = vld [vmem:[#allocation8 + $0x490] sm:$0xff] }
 0x4a7   : > { %v4877_v37 = vpack.c.bf16 %v3401_v39, %v3400_v29  ;;  %v3477_v60 = vld [vmem:[#allocation8 + $0x498] sm:$0xff]  ;;  %v3460_v39 = vld [vmem:[#allocation8 + $0x410] sm:$0xff] }
 0x4a8   : > { %v4931_v29 = vpack.c.bf16 %v3477_v60, %v3476_v25  ;;  %v3470_v60 = vld [vmem:[#allocation8 + $0x460] sm:$0xff] }
 0x4a9   : > { %4858 = vmatpush3.bf16.msra.mxu1 %v4857_v35  ;;  %4830 = vmatpush3.bf16.msra.mxu0 %v4829_v36  ;;  %v3452_v35 = vld [vmem:[#allocation8 + $0x3d0] sm:$0xff]  ;;  %v3453_v36 = vld [vmem:[#allocation8 + $0x3d8] sm:$0xff] }
 0x4aa   : > { %4860 = vmatprep.subr.bf16.mxu1 %v4859_v30  ;;  %4864 = vmatprep.subr.bf16.mxu0 %v4863_v48  ;;  %v4879_v30 = vpack.c.bf16 %v3419_v54, %v3418_v21  ;;  %v3420_v48 = vld [vmem:[#allocation8 + $0x2d0] sm:$0xff]  ;;  %v3461_v21 = vld [vmem:[#allocation8 + $0x418] sm:$0xff]  ;;  %v3478_v54 = vld [vmem:[#allocation8 + $0x4a0] sm:$0xff] }
 0x4ab   : > { %v4883_v15 = vpack.c.bf16 %v3421_v18, %v3420_v48  ;;  %v3480_v48 = vld [vmem:[#allocation8 + $0x4b0] sm:$0xff] }
 0x4ad   : > { %4862 = vmatpush3.bf16.msra.mxu1 %v4861_v20  ;;  %v4915_v20 = vpack.c.bf16 %v3453_v36, %v3452_v35  ;;  %v4933_v35 = vpack.c.bf16 %v3461_v21, %v3460_v39  ;;  %v3489_v21 = vld [vmem:[#allocation8 + $0x4f8] sm:$0xff] }
 0x4ae   : > { %4896 = vmatprep.subr.bf16.mxu1 %v4895_v9  ;;  %v3436_v9 = vld [vmem:[#allocation8 + $0x350] sm:$0xff] }
 0x4ce   : > { %v2899_v45 = vpop.f32.mrb[48].mxu1 }
 0x4cf   : > { %v2901_v38 = vpop.f32.mrb[49].mxu1 }
 0x4d0   : > { %v2828_v10 = vpop.f32.mrb[48].mxu0  ;;  %3730 = vmatprep.mubr.f32.mxu1 %v2901_v38  ;;  %v4919_v38 = vpack.c.bf16 %v3455_v32, %v3454_v33  ;;  %v3510_v33 = vld [vmem:[#allocation8 + $0x5a0] sm:$0xff]  ;;  %v3511_v32 = vld [vmem:[#allocation8 + $0x5a8] sm:$0xff] }
 0x4d1   : > { %v2830_v31 = vpop.f32.mrb[49].mxu0  ;;  %3731 = vmatmul.mubr.f32.vlgmr.msra.gmra.mrb[56].mxu1 %v2899_v45  ;;  %v3405_v45 = vld [vmem:[#allocation8 + $0x258] sm:$0xff] }
 0x4d2   : > { %3660 = vmatprep.mubr.f32.mxu0 %v2830_v31  ;;  %4898 = vmatpush3.bf16.msra.mxu1 %v4897_v46  ;;  %v4917_v46 = vpack.c.bf16 %v3437_v5, %v3436_v9  ;;  %v4885_v8 = vpack.c.bf16 %v3405_v45, %v3404_v52  ;;  %v3407_v31 = vld [vmem:[#allocation8 + $0x268] sm:$0xff]  ;;  %v3492_v5 = vld [vmem:[#allocation8 + $0x510] sm:$0xff] }
 0x4d3   : > { %3661 = vmatmul.mubr.f32.vlgmr.msra.gmra.mrb[56].mxu0 %v2828_v10  ;;  %4900 = vmatprep.subr.bf16.mxu1 %v4899_v12  ;;  %v3438_v12 = vld [vmem:[#allocation8 + $0x360] sm:$0xff]  ;;  %v3456_v10 = vld [vmem:[#allocation8 + $0x3f0] sm:$0xff] }
 0x4d4   : > { %4866 = vmatpush3.bf16.msra.mxu0 %v4865_v41  ;;  %v3457_v41 = vld [vmem:[#allocation8 + $0x3f8] sm:$0xff]  ;;  %v4921_v27 = vpack.c.bf16 %v3439_v42, %v3438_v12  ;;  %v3464_v45 = vld [vmem:[#allocation8 + $0x430] sm:$0xff]  ;;  %v4967_v12 = vpack.c.bf16 %v3511_v32, %v3510_v33  ;;  %v3494_v42 = vld [vmem:[#allocation8 + $0x520] sm:$0xff] }
 0x4d5   : > { %4868 = vmatprep.subr.bf16.mxu0 %v4867_v14  ;;  %v3424_v14 = vld [vmem:[#allocation8 + $0x2f0] sm:$0xff]  ;;  %v4923_v62 = vpack.c.bf16 %v3457_v41, %v3456_v10  ;;  %v3513_v41 = vld [vmem:[#allocation8 + $0x5b8] sm:$0xff] }
 0x4d6   : > { %4902 = vmatpush3.bf16.msra.mxu1 %v4901_v53  ;;  %v3441_v53 = vld [vmem:[#allocation8 + $0x378] sm:$0xff]  ;;  %v3512_v10 = vld [vmem:[#allocation8 + $0x5b0] sm:$0xff] }
 0x4d7   : > { %4904 = vmatprep.subr.bf16.mxu1 %v4903_v43  ;;  %v4889_v43 = vpack.c.bf16 %v3407_v31, %v3406_v23  ;;  %v4925_v58 = vpack.c.bf16 %v3441_v53, %v3440_v49  ;;  %v3466_v31 = vld [vmem:[#allocation8 + $0x440] sm:$0xff]  ;;  %v4971_v49 = vpack.c.bf16 %v3513_v41, %v3512_v10  ;;  %v3496_v53 = vld [vmem:[#allocation8 + $0x530] sm:$0xff]  ;;  %v3571_v10 = vld [vmem:[#allocation8 + $0x788] sm:$0xff] }
 0x4d8   : > { %4870 = vmatpush3.bf16.msra.mxu0 %v4869_v13  ;;  %v4891_v13 = vpack.c.bf16 %v3425_v59, %v3424_v14  ;;  %v3467_v14 = vld [vmem:[#allocation8 + $0x448] sm:$0xff]  ;;  %v3484_v59 = vld [vmem:[#allocation8 + $0x4d0] sm:$0xff] }
 0x4d9   : > { %4872 = vmatprep.subr.bf16.mxu0 %v4871_v19  ;;  %v3474_v19 = vld [vmem:[#allocation8 + $0x480] sm:$0xff] }
 0x4da   : > { %4906 = vmatpush3.bf16.msra.mxu1 %v4905_v57 }
 0x4db   : > { %4908 = vmatprep.subr.bf16.mxu1 %v4907_v16  ;;  %v4927_v16 = vpack.c.bf16 %v3475_v22, %v3474_v19  ;;  %v3469_v19 = vld [vmem:[#allocation8 + $0x458] sm:$0xff]  ;;  %v3486_v22 = vld [vmem:[#allocation8 + $0x4e0] sm:$0xff] }
 0x4dc   : > { %4874 = vmatpush3.bf16.msra.mxu0 %v4873_v0 }
 0x4dd   : > { %4876 = vmatprep.subr.bf16.mxu0 %v4875_v11  ;;  %v4929_v11 = vpack.c.bf16 %v3459_v40, %v3458_v61  ;;  %v3516_v61 = vld [vmem:[#allocation8 + $0x5d0] sm:$0xff]  ;;  %v3517_v40 = vld [vmem:[#allocation8 + $0x5d8] sm:$0xff] }
 0x4de   : > { %4910 = vmatpush3.bf16.msra.mxu1 %v4909_v7  ;;  %v3479_v7 = vld [vmem:[#allocation8 + $0x4a8] sm:$0xff] }
 0x4df   : > { %4912 = vmatprep.subr.bf16.mxu1 %v4911_v56  ;;  %v3490_v56 = vld [vmem:[#allocation8 + $0x500] sm:$0xff] }
 0x4e0   : > { %4878 = vmatpush3.bf16.msra.mxu0 %v4877_v37  ;;  %v3509_v37 = vld [vmem:[#allocation8 + $0x598] sm:$0xff]  ;;  %v4961_v18 = vpack.c.bf16 %v3491_v44, %v3490_v56  ;;  %v3518_v44 = vld [vmem:[#allocation8 + $0x5e0] sm:$0xff] }
 0x4e1   : > { %4880 = vmatprep.subr.bf16.mxu0 %v4879_v30  ;;  %v4935_v30 = vpack.c.bf16 %v3479_v7, %v3478_v54  ;;  %v4963_v9 = vpack.c.bf16 %v3509_v37, %v3508_v3  ;;  %v4979_v54 = vpack.c.bf16 %v3517_v40, %v3516_v61  ;;  %v3500_v7 = vld [vmem:[#allocation8 + $0x550] sm:$0xff]  ;;  %v3501_v56 = vld [vmem:[#allocation8 + $0x558] sm:$0xff]  ;;  %v3519_v3 = vld [vmem:[#allocation8 + $0x5e8] sm:$0xff] }
 0x4e2   : > { %4914 = vmatpush3.bf16.msra.mxu1 %v4913_v1  ;;  %v3531_v61 = vld [vmem:[#allocation8 + $0x648] sm:$0xff]  ;;  %v3548_v40 = vld [vmem:[#allocation8 + $0x6d0] sm:$0xff] }
 0x4e3   : > { %4916 = vmatprep.subr.bf16.mxu1 %v4915_v20  ;;  %v3481_v20 = vld [vmem:[#allocation8 + $0x4b8] sm:$0xff] }
 0x4e4   : > { %4882 = vmatpush3.bf16.msra.mxu0 %v4881_v26  ;;  %v3493_v26 = vld [vmem:[#allocation8 + $0x518] sm:$0xff]  ;;  %v4939_v52 = vpack.c.bf16 %v3481_v20, %v3480_v48  ;;  %v4983_v48 = vpack.c.bf16 %v3519_v3, %v3518_v44  ;;  %v3539_v20 = vld [vmem:[#allocation8 + $0x688] sm:$0xff]  ;;  %v3552_v3 = vld [vmem:[#allocation8 + $0x6f0] sm:$0xff] }
 0x4e5   : > { %4884 = vmatprep.subr.bf16.mxu0 %v4883_v15  ;;  %v4937_v15 = vpack.c.bf16 %v3463_v6, %v3462_v55  ;;  %v4981_v55 = vpack.c.bf16 %v3501_v56, %v3500_v7  ;;  %v3502_v6 = vld [vmem:[#allocation8 + $0x560] sm:$0xff]  ;;  %v3535_v44 = vld [vmem:[#allocation8 + $0x668] sm:$0xff] }
 0x4e6   : > { %4918 = vmatpush3.bf16.msra.mxu1 %v4917_v46  ;;  %v4965_v46 = vpack.c.bf16 %v3493_v26, %v3492_v5  ;;  %v3521_v5 = vld [vmem:[#allocation8 + $0x5f8] sm:$0xff]  ;;  %v3534_v56 = vld [vmem:[#allocation8 + $0x660] sm:$0xff] }
 0x4e7   : > { %4920 = vmatprep.subr.bf16.mxu1 %v4919_v38  ;;  %v3483_v38 = vld [vmem:[#allocation8 + $0x4c8] sm:$0xff] }
 0x4e8   : > { %4886 = vmatpush3.bf16.msra.mxu0 %v4885_v8  ;;  %v3495_v8 = vld [vmem:[#allocation8 + $0x528] sm:$0xff]  ;;  %v4943_v23 = vpack.c.bf16 %v3483_v38, %v3482_v24  ;;  %v3505_v38 = vld [vmem:[#allocation8 + $0x578] sm:$0xff] }
 0x4e9   : > { %4888 = vmatprep.subr.bf16.mxu0 %v4887_v63  ;;  %v4941_v63 = vpack.c.bf16 %v3465_v28, %v3464_v45  ;;  %v3523_v45 = vld [vmem:[#allocation8 + $0x608] sm:$0xff]  ;;  %v3504_v28 = vld [vmem:[#allocation8 + $0x570] sm:$0xff] }
 0x4ea   : > { %4922 = vmatpush3.bf16.msra.mxu1 %v4921_v27  ;;  %v4969_v27 = vpack.c.bf16 %v3495_v8, %v3494_v42  ;;  %v3541_v42 = vld [vmem:[#allocation8 + $0x698] sm:$0xff]  ;;  %v3570_v8 = vld [vmem:[#allocation8 + $0x780] sm:$0xff] }
 0x4eb   : > { %4924 = vmatprep.subr.bf16.mxu1 %v4923_v62  ;;  %v3485_v62 = vld [vmem:[#allocation8 + $0x4d8] sm:$0xff] }
 0x4ec   : > { %4890 = vmatpush3.bf16.msra.mxu0 %v4889_v43  ;;  %v3497_v43 = vld [vmem:[#allocation8 + $0x538] sm:$0xff]  ;;  %v4947_v17 = vpack.c.bf16 %v3485_v62, %v3484_v59  ;;  %v5023_v59 = vpack.c.bf16 %v3571_v10, %v3570_v8  ;;  %v3543_v62 = vld [vmem:[#allocation8 + $0x6a8] sm:$0xff] }
 0x4ed   : > { %4892 = vmatprep.subr.bf16.mxu0 %v4891_v13  ;;  %v2970_v57 = vpop.f32.mrb[50].mxu0  ;;  %v4945_v13 = vpack.c.bf16 %v3467_v14, %v3466_v31  ;;  %v3524_v31 = vld [vmem:[#allocation8 + $0x610] sm:$0xff]  ;;  %v3525_v14 = vld [vmem:[#allocation8 + $0x618] sm:$0xff] }
 0x4ee   : > { %v2972_v0 = vpop.f32.mrb[51].mxu0  ;;  %4926 = vmatpush3.bf16.msra.mxu1 %v4925_v58  ;;  %v4973_v58 = vpack.c.bf16 %v3497_v43, %v3496_v53  ;;  %v3526_v43 = vld [vmem:[#allocation8 + $0x620] sm:$0xff] }
 0x4ef   : > { %3800 = vmatprep.mubr.f32.mxu0 %v2972_v0  ;;  %4960 = vmatprep.subr.bf16.mxu1 %v4959_v51  ;;  %v3487_v51 = vld [vmem:[#allocation8 + $0x4e8] sm:$0xff]  ;;  %v4949_v0 = vpack.c.bf16 %v3469_v19, %v3468_v34  ;;  %v3528_v19 = vld [vmem:[#allocation8 + $0x630] sm:$0xff] }
 0x4f0   : > { %4894 = vmatpush3.bf16.msra.mxu0 %v4893_v2  ;;  %v4975_v2 = vpack.c.bf16 %v3515_v4, %v3514_v50  ;;  %v4951_v25 = vpack.c.bf16 %v3487_v51, %v3486_v22  ;;  %v3527_v50 = vld [vmem:[#allocation8 + $0x628] sm:$0xff]  ;;  %v3544_v4 = vld [vmem:[#allocation8 + $0x6b0] sm:$0xff]  ;;  %v3529_v22 = vld [vmem:[#allocation8 + $0x638] sm:$0xff] }
 0x4f1   : > { %4928 = vmatprep.subr.bf16.mxu0 %v4927_v16  ;;  %v3499_v16 = vld [vmem:[#allocation8 + $0x548] sm:$0xff] }
 0x4f2   : > { %v3547_v51 = vld [vmem:[#allocation8 + $0x6c8] sm:$0xff] }
 0x4f3   : > { %3801 = vmatmul.mubr.f32.vlgmr.msra.gmra.mrb[58].mxu0 %v2970_v57  ;;  %v3498_v57 = vld [vmem:[#allocation8 + $0x540] sm:$0xff] }
 0x4f4   : > { %4930 = vmatpush3.bf16.msra.mxu0 %v4929_v11  ;;  %v3471_v11 = vld [vmem:[#allocation8 + $0x468] sm:$0xff]  ;;  %v4977_v39 = vpack.c.bf16 %v3499_v16, %v3498_v57  ;;  %v3530_v16 = vld [vmem:[#allocation8 + $0x640] sm:$0xff] }
 0x4f5   : > { %v3041_v36 = vpop.f32.mrb[50].mxu1  ;;  %4932 = vmatprep.subr.bf16.mxu0 %v4931_v29  ;;  %v3488_v29 = vld [vmem:[#allocation8 + $0x4f0] sm:$0xff]  ;;  %v4953_v37 = vpack.c.bf16 %v3471_v11, %v3470_v60 }
 0x4f6   : > { %v3043_v1 = vpop.f32.mrb[51].mxu1  ;;  %v3532_v11 = vld [vmem:[#allocation8 + $0x650] sm:$0xff] }
 0x4f7   : > { %3870 = vmatprep.mubr.f32.mxu1 %v3043_v1  ;;  %v3538_v1 = vld [vmem:[#allocation8 + $0x680] sm:$0xff] }
 0x4f8   : > { %4934 = vmatpush3.bf16.msra.mxu0 %v4933_v35  ;;  %3871 = vmatmul.mubr.f32.vlgmr.msra.gmra.mrb[58].mxu1 %v3041_v36  ;;  %v4955_v35 = vpack.c.bf16 %v3489_v21, %v3488_v29  ;;  %v3472_v36 = vld [vmem:[#allocation8 + $0x470] sm:$0xff]  ;;  %v3533_v29 = vld [vmem:[#allocation8 + $0x658] sm:$0xff]  ;;  %v3551_v21 = vld [vmem:[#allocation8 + $0x6e8] sm:$0xff] }
 0x4f9   : > { %4936 = vmatprep.subr.bf16.mxu0 %v4935_v30  ;;  %4962 = vmatpush3.bf16.msra.mxu1 %v4961_v18  ;;  %v3473_v30 = vld [vmem:[#allocation8 + $0x478] sm:$0xff]  ;;  %v3503_v18 = vld [vmem:[#allocation8 + $0x568] sm:$0xff] }
 0x4fa   : > { %4964 = vmatprep.subr.bf16.mxu1 %v4963_v9  ;;  %v3520_v9 = vld [vmem:[#allocation8 + $0x5f0] sm:$0xff]  ;;  %v4957_v26 = vpack.c.bf16 %v3473_v30, %v3472_v36  ;;  %v4985_v32 = vpack.c.bf16 %v3503_v18, %v3502_v6  ;;  %v3555_v18 = vld [vmem:[#allocation8 + $0x708] sm:$0xff] }
 0x4fb   : > { %v3536_v30 = vld [vmem:[#allocation8 + $0x670] sm:$0xff] }
 0x4fc   : > { %4938 = vmatpush3.bf16.msra.mxu0 %v4937_v15  ;;  %v4991_v15 = vpack.c.bf16 %v3539_v20, %v3538_v1  ;;  %v3572_v1 = vld [vmem:[#allocation8 + $0x790] sm:$0xff]  ;;  %v3573_v20 = vld [vmem:[#allocation8 + $0x798] sm:$0xff] }
 0x4fd   : > { %4940 = vmatprep.subr.bf16.mxu0 %v4939_v52  ;;  %4966 = vmatpush3.bf16.msra.mxu1 %v4965_v46  ;;  %v3522_v52 = vld [vmem:[#allocation8 + $0x600] sm:$0xff]  ;;  %v4987_v46 = vpack.c.bf16 %v3521_v5, %v3520_v9 }
 0x4fe   : > { %4968 = vmatprep.subr.bf16.mxu1 %v4967_v12  ;;  %v3540_v12 = vld [vmem:[#allocation8 + $0x690] sm:$0xff]  ;;  %v4993_v41 = vpack.c.bf16 %v3523_v45, %v3522_v52  ;;  %v3574_v52 = vld [vmem:[#allocation8 + $0x7a0] sm:$0xff]  ;;  %v3575_v45 = vld [vmem:[#allocation8 + $0x7a8] sm:$0xff] }
 0x500   : > { %4942 = vmatpush3.bf16.msra.mxu0 %v4941_v63  ;;  %v4989_v63 = vpack.c.bf16 %v3505_v38, %v3504_v28  ;;  %v3559_v38 = vld [vmem:[#allocation8 + $0x728] sm:$0xff] }
 0x501   : > { %4944 = vmatprep.subr.bf16.mxu0 %v4943_v23  ;;  %4970 = vmatpush3.bf16.msra.mxu1 %v4969_v27  ;;  %v4995_v23 = vpack.c.bf16 %v3541_v42, %v3540_v12  ;;  %v3542_v27 = vld [vmem:[#allocation8 + $0x6a0] sm:$0xff]  ;;  %v3576_v12 = vld [vmem:[#allocation8 + $0x7b0] sm:$0xff]  ;;  %v3577_v42 = vld [vmem:[#allocation8 + $0x7b8] sm:$0xff] }
 0x502   : > { %4972 = vmatprep.subr.bf16.mxu1 %v4971_v49  ;;  %v4997_v49 = vpack.c.bf16 %v3525_v14, %v3524_v31  ;;  %v4999_v53 = vpack.c.bf16 %v3543_v62, %v3542_v27  ;;  %v5035_v10 = vpack.c.bf16 %v3577_v42, %v3576_v12  ;;  %v3579_v31 = vld [vmem:[#allocation8 + $0x7c8] sm:$0xff]  ;;  %v3562_v27 = vld [vmem:[#allocation8 + $0x740] sm:$0xff] }
 0x503   : > { %v3563_v62 = vld [vmem:[#allocation8 + $0x748] sm:$0xff] }
 0x504   : > { %4946 = vmatpush3.bf16.msra.mxu0 %v4945_v13  ;;  %v3545_v13 = vld [vmem:[#allocation8 + $0x6b8] sm:$0xff] }
 0x505   : > { %4948 = vmatprep.subr.bf16.mxu0 %v4947_v17  ;;  %4974 = vmatpush3.bf16.msra.mxu1 %v4973_v58  ;;  %v5001_v17 = vpack.c.bf16 %v3527_v50, %v3526_v43  ;;  %v5003_v34 = vpack.c.bf16 %v3545_v13, %v3544_v4  ;;  %v3546_v58 = vld [vmem:[#allocation8 + $0x6c0] sm:$0xff]  ;;  %v5041_v43 = vpack.c.bf16 %v3563_v62, %v3562_v27  ;;  %v3564_v4 = vld [vmem:[#allocation8 + $0x750] sm:$0xff]  ;;  %v3565_v13 = vld [vmem:[#allocation8 + $0x758] sm:$0xff] }
 0x506   : > { %4976 = vmatprep.subr.bf16.mxu1 %v4975_v2  ;;  %v5005_v2 = vpack.c.bf16 %v3529_v22, %v3528_v19  ;;  %v5007_v57 = vpack.c.bf16 %v3547_v51, %v3546_v58  ;;  %v5045_v19 = vpack.c.bf16 %v3565_v13, %v3564_v4  ;;  %v3566_v58 = vld [vmem:[#allocation8 + $0x760] sm:$0xff]  ;;  %v3567_v51 = vld [vmem:[#allocation8 + $0x768] sm:$0xff] }
 0x508   : > { %4950 = vmatpush3.bf16.msra.mxu0 %v4949_v0  ;;  %v3549_v0 = vld [vmem:[#allocation8 + $0x6d8] sm:$0xff] }
 0x509   : > { %4952 = vmatprep.subr.bf16.mxu0 %v4951_v25  ;;  %4978 = vmatpush3.bf16.msra.mxu1 %v4977_v39  ;;  %v5009_v25 = vpack.c.bf16 %v3531_v61, %v3530_v16  ;;  %v5011_v60 = vpack.c.bf16 %v3549_v0, %v3548_v40  ;;  %v3550_v39 = vld [vmem:[#allocation8 + $0x6e0] sm:$0xff]  ;;  %v5049_v61 = vpack.c.bf16 %v3567_v51, %v3566_v58 }
 0x50a   : > { %4980 = vmatprep.subr.bf16.mxu1 %v4979_v54  ;;  %v5013_v54 = vpack.c.bf16 %v3533_v29, %v3532_v11  ;;  %v5015_v7 = vpack.c.bf16 %v3551_v21, %v3550_v39 }
 0x50c   : > { %4954 = vmatpush3.bf16.msra.mxu0 %v4953_v37  ;;  %v3553_v37 = vld [vmem:[#allocation8 + $0x6f8] sm:$0xff] }
 0x50d   : > { %4956 = vmatprep.subr.bf16.mxu0 %v4955_v35  ;;  %v3112_v33 = vpop.f32.mrb[52].mxu0  ;;  %4982 = vmatpush3.bf16.msra.mxu1 %v4981_v55  ;;  %v5017_v35 = vpack.c.bf16 %v3535_v44, %v3534_v56  ;;  %v5019_v36 = vpack.c.bf16 %v3553_v37, %v3552_v3  ;;  %v3537_v55 = vld [vmem:[#allocation8 + $0x678] sm:$0xff] }
 0x50e   : > { %v3114_v24 = vpop.f32.mrb[53].mxu0  ;;  %4984 = vmatprep.subr.bf16.mxu1 %v4983_v48  ;;  %v5021_v6 = vpack.c.bf16 %v3537_v55, %v3536_v30  ;;  %v3554_v48 = vld [vmem:[#allocation8 + $0x700] sm:$0xff] }
 0x50f   : > { %3940 = vmatprep.mubr.f32.mxu0 %v3114_v24  ;;  %v5025_v5 = vpack.c.bf16 %v3555_v18, %v3554_v48  ;;  %v5031_v24 = vpack.c.bf16 %v3575_v45, %v3574_v52 }
 0x510   : > { %4958 = vmatpush3.bf16.msra.mxu0 %v4957_v26 }
 0x511   : > { %4986 = vmatpush3.bf16.msra.mxu1 %v4985_v32  ;;  %4992 = vmatprep.subr.bf16.mxu0 %v4991_v15  ;;  %v3556_v32 = vld [vmem:[#allocation8 + $0x710] sm:$0xff]  ;;  %v3557_v15 = vld [vmem:[#allocation8 + $0x718] sm:$0xff] }
 0x512   : > { %4988 = vmatprep.subr.bf16.mxu1 %v4987_v46  ;;  %v5029_v28 = vpack.c.bf16 %v3557_v15, %v3556_v32  ;;  %v3558_v46 = vld [vmem:[#allocation8 + $0x720] sm:$0xff] }
 0x513   : > { %3941 = vmatmul.mubr.f32.vlgmr.msra.gmra.mrb[60].mxu0 %v3112_v33  ;;  %v5027_v33 = vpack.c.bf16 %v3573_v20, %v3572_v1  ;;  %v5033_v8 = vpack.c.bf16 %v3559_v38, %v3558_v46 }
 0x514   : > { %4994 = vmatpush3.bf16.msra.mxu0 %v4993_v41  ;;  %v3560_v41 = vld [vmem:[#allocation8 + $0x730] sm:$0xff] }
 0x515   : > { %4990 = vmatpush3.bf16.msra.mxu1 %v4989_v63  ;;  %4996 = vmatprep.subr.bf16.mxu0 %v4995_v23  ;;  %v3561_v63 = vld [vmem:[#allocation8 + $0x738] sm:$0xff]  ;;  %v3578_v23 = vld [vmem:[#allocation8 + $0x7c0] sm:$0xff] }
 0x516   : > { %5024 = vmatprep.subr.bf16.mxu1 %v5023_v59  ;;  %v5037_v14 = vpack.c.bf16 %v3561_v63, %v3560_v41  ;;  %v5039_v59 = vpack.c.bf16 %v3579_v31, %v3578_v23 }
 0x518   : > { %4998 = vmatpush3.bf16.msra.mxu0 %v4997_v49  ;;  %v3580_v49 = vld [vmem:[#allocation8 + $0x7d0] sm:$0xff] }
 0x519   : > { %5000 = vmatprep.subr.bf16.mxu0 %v4999_v53  ;;  %v3581_v53 = vld [vmem:[#allocation8 + $0x7d8] sm:$0xff] }
 0x51a   : > { %v5043_v50 = vpack.c.bf16 %v3581_v53, %v3580_v49 }
 0x51c   : > { %5002 = vmatpush3.bf16.msra.mxu0 %v5001_v17  ;;  %v3582_v17 = vld [vmem:[#allocation8 + $0x7e0] sm:$0xff] }
 0x51d   : > { %5004 = vmatprep.subr.bf16.mxu0 %v5003_v34  ;;  %v3583_v34 = vld [vmem:[#allocation8 + $0x7e8] sm:$0xff] }
 0x51e   : > { %v5047_v22 = vpack.c.bf16 %v3583_v34, %v3582_v17 }
 0x520   : > { %5006 = vmatpush3.bf16.msra.mxu0 %v5005_v2  ;;  %v3584_v2 = vld [vmem:[#allocation8 + $0x7f0] sm:$0xff] }
 0x521   : > { %5008 = vmatprep.subr.bf16.mxu0 %v5007_v57  ;;  %v3585_v57 = vld [vmem:[#allocation8 + $0x7f8] sm:$0xff] }
 0x522   : > { %v5051_v0 = vpack.c.bf16 %v3585_v57, %v3584_v2 }
 0x524   : > { %5010 = vmatpush3.bf16.msra.mxu0 %v5009_v25  ;;  %v3568_v25 = vld [vmem:[#allocation8 + $0x770] sm:$0xff] }
 0x525   : > { %5012 = vmatprep.subr.bf16.mxu0 %v5011_v60  ;;  %v3569_v60 = vld [vmem:[#allocation8 + $0x778] sm:$0xff] }
 0x526   : > { %v5053_v29 = vpack.c.bf16 %v3569_v60, %v3568_v25 }
 0x528   : > { %5014 = vmatpush3.bf16.msra.mxu0 %v5013_v54  ;;  %v3590_v54 = vpop.permute.xlu1 %3589 }
 0x529   : > { %5016 = vmatprep.subr.bf16.mxu0 %v5015_v7  ;;  %v3595_v37 = vrot.slane %v3590_v54, %v5766_v47 }
 0x52c   : > { %5018 = vmatpush3.bf16.msra.mxu0 %v5017_v35 }
 0x52d   : > { %5020 = vmatprep.subr.bf16.mxu0 %v5019_v36 }
 0x530   : > { %5022 = vmatpush3.bf16.msra.mxu0 %v5021_v6 }
 0x547   : > { %v3183_v9 = vpop.f32.mrb[52].mxu1 }
 0x548   : > { %v3185_v26 = vpop.f32.mrb[53].mxu1 }
 0x549   : > { %4010 = vmatprep.mubr.f32.mxu1 %v3185_v26 }
 0x54a   : > { %4011 = vmatmul.mubr.f32.vlgmr.msra.gmra.mrb[60].mxu1 %v3183_v9 }
 0x54b   : > { %5026 = vmatpush3.bf16.msra.mxu1 %v5025_v5 }
 0x54c   : > { %5028 = vmatprep.subr.bf16.mxu1 %v5027_v33 }
 0x54f   : > { %5030 = vmatpush3.bf16.msra.mxu1 %v5029_v28 }
 0x550   : > { %5032 = vmatprep.subr.bf16.mxu1 %v5031_v24 }
 0x553   : > { %5034 = vmatpush3.bf16.msra.mxu1 %v5033_v8 }
 0x554   : > { %5036 = vmatprep.subr.bf16.mxu1 %v5035_v10 }
 0x557   : > { %5038 = vmatpush3.bf16.msra.mxu1 %v5037_v14 }
 0x558   : > { %5040 = vmatprep.subr.bf16.mxu1 %v5039_v59 }
 0x55b   : > { %5042 = vmatpush3.bf16.msra.mxu1 %v5041_v43 }
 0x55c   : > { %5044 = vmatprep.subr.bf16.mxu1 %v5043_v50 }
 0x55f   : > { %5046 = vmatpush3.bf16.msra.mxu1 %v5045_v19  ;;  %v3254_v16 = vpop.f32.mrb[54].mxu0 }
 0x560   : > { %v3256_v40 = vpop.f32.mrb[55].mxu0  ;;  %5048 = vmatprep.subr.bf16.mxu1 %v5047_v22 }
 0x561   : > { %4080 = vmatprep.mubr.f32.mxu0 %v3256_v40 }
 0x562   : > { %4081 = vmatmul.mubr.f32.vlgmr.msra.gmra.mrb[62].mxu0 %v3254_v16 }
 0x563   : > { %5050 = vmatpush3.bf16.msra.mxu1 %v5049_v61  ;;  %v3325_v11 = vpop.f32.mrb[54].mxu1 }
 0x564   : > { %5052 = vmatprep.subr.bf16.mxu1 %v5051_v0  ;;  %v3327_v39 = vpop.f32.mrb[55].mxu1 }
 0x565   : > { %4150 = vmatprep.mubr.f32.mxu1 %v3327_v39 }
 0x567   : > { %5054 = vmatpush3.bf16.msra.mxu1 %v5053_v29 }
 0x56a   : > { %4151 = vmatmul.mubr.f32.vlgmr.msra.gmra.mrb[62].mxu1 %v3325_v11 }
 0x5a4   : > { %v4394_v21 = vpop.f32.mrb[56].mxu1 }
 0x5a5   : > { %v4395_v7 = vpop.f32.mrb[57].mxu1 }
 0x5a6   : > { %v4359_v56 = vpop.f32.mrb[56].mxu0  ;;  %v4396_v44 = vadd.f32 %v4395_v7, %v4394_v21 }
 0x5a7   : > { %v4360_v3 = vpop.f32.mrb[57].mxu0 }
 0x5a8   : > { %v4361_v35 = vadd.f32 %v4360_v3, %v4359_v56 }
 0x5aa   : > { %v3663_v36 = vadd.f32 %v4361_v35, %v3595_v37 }
 0x5ac   : > { %v3733_v30 = vadd.f32 %v4396_v44, %v3663_v36 }
 0x5c6   : > { %v4429_v55 = vpop.f32.mrb[58].mxu0 }
 0x5c7   : > { %v4430_v6 = vpop.f32.mrb[59].mxu0 }
 0x5c8   : > { %v4431_v48 = vadd.f32 %v4430_v6, %v4429_v55 }
 0x5ca   : > { %v3803_v18 = vadd.f32 %v4431_v48, %v3733_v30 }
 0x5cb   : > { %v4464_v1 = vpop.f32.mrb[58].mxu1 }
 0x5cc   : > { %v4465_v20 = vpop.f32.mrb[59].mxu1 }
 0x5cd   : > { %v4466_v9 = vadd.f32 %v4465_v20, %v4464_v1 }
 0x5cf   : > { %v3873_v5 = vadd.f32 %v4466_v9, %v3803_v18 }
 0x5e6   : > { %v4499_v26 = vpop.f32.mrb[60].mxu0 }
 0x5e7   : > { %v4500_v33 = vpop.f32.mrb[61].mxu0 }
 0x5e8   : > { %v4501_v32 = vadd.f32 %v4500_v33, %v4499_v26 }
 0x5ea   : > { %v3943_v15 = vadd.f32 %v4501_v32, %v3873_v5 }
 0x61d   : > { %v4534_v52 = vpop.f32.mrb[60].mxu1 }
 0x61e   : > { %v4535_v45 = vpop.f32.mrb[61].mxu1 }
 0x61f   : > { %v4536_v47 = vadd.f32 %v4535_v45, %v4534_v52 }
 0x621   : > { %v4013_v28 = vadd.f32 %v4536_v47, %v3943_v15 }
 0x635   : > { %v4569_v24 = vpop.f32.mrb[62].mxu0 }
 0x636   : > { %v4570_v46 = vpop.f32.mrb[63].mxu0 }
 0x637   : > { %v4571_v38 = vadd.f32 %v4570_v46, %v4569_v24 }
 0x639   : > { %v4083_v12 = vadd.f32 %v4571_v38, %v4013_v28 }
 0x63d   : > { %v4604_v42 = vpop.f32.mrb[62].mxu1 }
 0x63e   : > { %v4605_v8 = vpop.f32.mrb[63].mxu1 }
 0x63f   : > { %v4606_v10 = vadd.f32 %v4605_v8, %v4604_v42 }
 0x641   : > { %v4153_v41 = vadd.f32 %v4606_v10, %v4083_v12 }
 0x643   : > { %4156 = vst [vmem:[%s376_s28] sm:$0x1] %v4153_v41 }
 0x644   : > { %5231 = shalt.err (!%p5228_p7)
}
 0x645   : > { %s5232_s25 = scalar_lea.hbm %s7121_s18, 16  ;;  %s5236_s22 = scalar_lea.hbm %s7174_s9, 32 }
 0x646   : > { %p5233_p10 = scmp.ne.s32.totalorder %s7121_s18, %s5232_s25  ;;  %p5237_p0 = scmp.lt.u32.totalorder %s7121_s18, %s7174_s9 }
 0x647   : > { %p5238_p11 = scmp.lt.u32.totalorder %s5236_s22, %s5232_s25  ;;  %p5240_p2 = scmp.lt.u32.totalorder %s5232_s25, %s7121_s18 }
 0x648   : > { %p5234_p13 = pnand %p5233_p10, %p5468_p4 }
 0x649   : > { %p5239_p9 = por %p5238_p11, %p5237_p0 }
 0x64a   : > { %p5235_p5 = pneg %p5234_p13 }
 0x64b   : > { %p5241_p1 = por %p5240_p2, %p5239_p9 }
 0x64d   : > { %p5242_p6 = pnand %p5241_p1, %p5235_p5 }
 0x64f   : > { %5245 = shalt.err (!%p5242_p6)
}
 0x650   : > { %5065 = dma.vmem_to_hbm [thread:$0]  (%p5468_p4), %s7123_s20, 16, %s7121_s18, %s4158_s16  }
 0x651 PF: > { %s4182_s10 = sand.u32 1, %s5276_s11   ;;  %p7293_p8 = scmp.ne.s32.totalorder %s7220_s17, 0 }
 0x652   : > { %p7294_p12 = scmp.ge.s32.totalorder %s5288_s14, 2  ;;  %s4183_s30 = scalar_lea.sflag [#allocation5], %s4182_s10 }
 0x654   : > { %p5079_p3 = pnand %p7294_p12, %p7293_p8 }
 0x656   : > { %5271 = dma.done.wait (!%p5079_p3), %s4183_s30, 16  }
 0x657   : > { %5273 = vsyncadd (!%p5079_p3), %s4183_s30, 4294967280  ;;  %p25_p7 = scmp.ge.s32.totalorder %s5458_s21, 4   ;;  %s7295_s11 = smov %s5280_s12 }
 0x658   : > { %s7296_s12 = smov %s5284_s13  ;;  %s7297_s13 = smov %s5474_s27 }
 0x659   : > { %s7298_s14 = smov %s5458_s21  ;;  %27 = sbr.rel (!%p25_p7) target bundleno = 9 (0x9), region = 116 }
 0x660   :  { %4187 = vsyncpa [#allocation4], 1 }
 0x661   :  { %4189 = vsyncpa [#allocation4 + $0x1], 1 }
 0x662   :  { %4190 = vsyncpa [#allocation7], 1 }
 0x663   :  { %4191 = vsyncpa [#allocation5], 1 }
 0x664   :  { %4193 = vsyncpa [#allocation5 + $0x1], 1 }

</bundles_post_ra>
